<compile_context>
chip_gen: v7x
topology: tpu7x:2x2x1
jax: 0.10.0
libtpu: 0.0.40
codegen_flags: <defaults>
</compile_context>

<pallas_src>
import math
import jax
import jax.numpy as jnp
from jax import lax
from jax.experimental import pallas as pl
from jax.experimental.pallas import tpu as pltpu


def make_satriangle_kernel(num_heads, eps=1e-5):
    def kernel(x_ref, mask_ref, gamma_ref, beta_ref,
               wq_ref, wk_ref, wv_ref, bq_ref, bk_ref, bv_ref,
               wo_ref, bo_ref, o_ref):
        Bt, L, E = x_ref.shape
        D = E // num_heads
        scale = 1.0 / math.sqrt(D)

        x = x_ref[...].astype(jnp.float32)                  # (Bt, L, E)
        x2 = x.reshape(Bt * L, E)                            # leading-dim merge (free)

        # ---- LayerNorm over E (f32, VPU) ----
        mean = jnp.mean(x2, axis=-1, keepdims=True)
        var = jnp.mean(jnp.square(x2 - mean), axis=-1, keepdims=True)
        xn = (x2 - mean) * lax.rsqrt(var + eps)
        xn = xn * gamma_ref[...] + beta_ref[...]             # (Bt*L, E)

        # ---- Q/K/V projections: pre-transposed (E,E) weights, bf16 MXU, f32 accumulate ----
        xn_b = xn.astype(jnp.bfloat16)
        q = jnp.dot(xn_b, wq_ref[...], preferred_element_type=jnp.float32) + bq_ref[...]
        k = jnp.dot(xn_b, wk_ref[...], preferred_element_type=jnp.float32) + bk_ref[...]
        v = jnp.dot(xn_b, wv_ref[...], preferred_element_type=jnp.float32) + bv_ref[...]

        q3 = (q * scale).astype(jnp.bfloat16).reshape(Bt, L, E)
        k3 = k.astype(jnp.bfloat16).reshape(Bt, L, E)
        v3 = v.astype(jnp.bfloat16).reshape(Bt, L, E)

        mask = mask_ref[...].astype(jnp.float32)[None]       # (1, L, L) additive float mask
        wo = wo_ref[...]                                     # (E, E) bf16, pre-transposed

        # ---- per-head attention, output projection folded in (no lane-concat) ----
        acc = jnp.zeros((Bt * L, E), jnp.float32)
        for h in range(num_heads):
            sl = slice(h * D, (h + 1) * D)
            s = jnp.einsum('bqd,bkd->bqk', q3[:, :, sl], k3[:, :, sl],
                           preferred_element_type=jnp.float32) + mask     # (Bt, L, L)
            s = s - jnp.max(s, axis=-1, keepdims=True)
            p = jnp.exp(s)
            p = p * pl.reciprocal(jnp.sum(p, axis=-1, keepdims=True), approx=True)
            ho = jnp.einsum('bqk,bkd->bqd', p.astype(jnp.bfloat16), v3[:, :, sl],
                            preferred_element_type=jnp.float32)           # (Bt, L, D)
            acc = acc + jnp.dot(ho.astype(jnp.bfloat16).reshape(Bt * L, D), wo[sl, :],
                                preferred_element_type=jnp.float32)       # (Bt*L, E)

        # TODO(synk): attention dropout / nn.Dropout are identity in eval mode.
        out = acc + bo_ref[...] + x2                         # out-proj bias + residual
        o_ref[...] = out.reshape(Bt, L, E).astype(o_ref.dtype)

    return kernel


def _pick_block_batch(B, max_bt=16):
    """Largest batch tile that divides B, keeps >=2 grid steps when B >= 2
    (so both v7x TensorCores get work), and is capped at max_bt."""
    if B < 2:
        return max(B, 1)
    best = 1
    for bt in range(1, min(B, max_bt) + 1):
        if B % bt == 0 and B // bt >= 2:
            best = bt
    return best


def satriangle_forward(E_feature, A_hat, params, *, num_heads, block_batch=None):
    """E_feature: (B, L, E) float32. A_hat: (L, L) additive float attention mask."""
    B, L, E = E_feature.shape
    assert E % num_heads == 0
    Bt = block_batch if block_batch is not None else _pick_block_batch(B)
    assert B % Bt == 0

    f32, bf16 = jnp.float32, jnp.bfloat16

    # Hoist the weight transposes / splits out of the kernel (done once in HBM instead of
    # an XLU transpose every grid step). Weights stored in bf16 (halves DMA bytes / VMEM).
    w_in, b_in = params["w_in"], params["b_in"]              # (3E, E), (1, 3E) PyTorch layout
    w_q_t = jnp.asarray(w_in[0 * E:1 * E].T, bf16)
    w_k_t = jnp.asarray(w_in[1 * E:2 * E].T, bf16)
    w_v_t = jnp.asarray(w_in[2 * E:3 * E].T, bf16)
    b_q = jnp.asarray(b_in[:, 0 * E:1 * E], f32)
    b_k = jnp.asarray(b_in[:, 1 * E:2 * E], f32)
    b_v = jnp.asarray(b_in[:, 2 * E:3 * E], f32)
    w_out_t = jnp.asarray(params["w_out"].T, bf16)
    b_out = jnp.asarray(params["b_out"], f32)
    gamma = jnp.asarray(params["gamma"], f32)
    beta = jnp.asarray(params["beta"], f32)
    mask = jnp.asarray(A_hat, f32)

    kernel = make_satriangle_kernel(num_heads)

    def build(single_buffer_consts):
        def const_spec(shape):
            # index_map never changes across the grid -> one resident copy suffices.
            if single_buffer_consts:
                return pl.BlockSpec(shape, lambda b: (0, 0), pipeline_mode=pl.Buffered(1))
            return pl.BlockSpec(shape, lambda b: (0, 0))

        grid_spec = pltpu.PrefetchScalarGridSpec(
            num_scalar_prefetch=0,
            grid=(B // Bt,),
            in_specs=[
                pl.BlockSpec((Bt, L, E), lambda b: (b, 0, 0)),             # E_feature tile
                const_spec((L, L)),                                         # A_hat
                const_spec((1, E)), const_spec((1, E)),                     # gamma, beta
                const_spec((E, E)), const_spec((E, E)), const_spec((E, E)), # Wq^T, Wk^T, Wv^T
                const_spec((1, E)), const_spec((1, E)), const_spec((1, E)), # bq, bk, bv
                const_spec((E, E)), const_spec((1, E)),                     # Wo^T, bo
            ],
            out_specs=pl.BlockSpec((Bt, L, E), lambda b: (b, 0, 0)),
        )
        return pl.pallas_call(
            kernel,
            out_shape=jax.ShapeDtypeStruct((B, L, E), E_feature.dtype),
            grid_spec=grid_spec,
            compiler_params=pltpu.CompilerParams(
                dimension_semantics=("parallel",),
                # above the 16/32 MiB scoped defaults, below v7x's 64 MiB physical cap
                vmem_limit_bytes=48 * 1024 * 1024,
            ),
        )

    args = (E_feature, mask, gamma, beta, w_q_t, w_k_t, w_v_t,
            b_q, b_k, b_v, w_out_t, b_out)
    try:
        return build(single_buffer_consts=True)(*args)
    except Exception:
        # pl.Buffered(1) unsupported on this jax build -> default double-buffering.
        return build(single_buffer_consts=False)(*args)


def satriangle_reference(E_feature, A_hat, params, *, num_heads):
    """Pure-JAX f32 reference (matches the PyTorch module in eval mode)."""
    B, L, E = E_feature.shape
    D = E // num_heads
    x = E_feature.astype(jnp.float32)
    mean = jnp.mean(x, axis=-1, keepdims=True)
    var = jnp.mean((x - mean) ** 2, axis=-1, keepdims=True)
    xn = (x - mean) / jnp.sqrt(var + 1e-5)
    xn = xn * params["gamma"][0] + params["beta"][0]
    qkv = jnp.einsum("ble,fe->blf", xn, params["w_in"]) + params["b_in"][0]
    q, k, v = jnp.split(qkv, 3, axis=-1)
    q = q.reshape(B, L, num_heads, D).transpose(0, 2, 1, 3) / math.sqrt(D)
    k = k.reshape(B, L, num_heads, D).transpose(0, 2, 1, 3)
    v = v.reshape(B, L, num_heads, D).transpose(0, 2, 1, 3)
    scores = jnp.einsum("bhqd,bhkd->bhqk", q, k) + A_hat[None, None]
    p = jax.nn.softmax(scores, axis=-1)
    attn = jnp.einsum("bhqk,bhkd->bhqd", p, v).transpose(0, 2, 1, 3).reshape(B, L, E)
    out = jnp.einsum("ble,fe->blf", attn, params["w_out"]) + params["b_out"][0]
    return out + x


if __name__ == "__main__":
    B, L, E, H = 4, 8, 32, 4   # B=4 exercises Bt=2 batching with 2 parallel grid steps

    key = jax.random.PRNGKey(0)
    k_x, k_m, k_wi, k_bi, k_wo, k_bo, k_g, k_b = jax.random.split(key, 8)

    E_feature = jax.random.normal(k_x, (B, L, E), dtype=jnp.float32)
    A_hat = 0.5 * jax.random.normal(k_m, (L, L), dtype=jnp.float32)  # additive float mask

    params = {
        "gamma": 1.0 + 0.1 * jax.random.normal(k_g, (1, E), dtype=jnp.float32),
        "beta": 0.1 * jax.random.normal(k_b, (1, E), dtype=jnp.float32),
        "w_in": (1.0 / math.sqrt(E)) * jax.random.normal(k_wi, (3 * E, E), dtype=jnp.float32),
        "b_in": 0.05 * jax.random.normal(k_bi, (1, 3 * E), dtype=jnp.float32),
        "w_out": (1.0 / math.sqrt(E)) * jax.random.normal(k_wo, (E, E), dtype=jnp.float32),
        "b_out": 0.05 * jax.random.normal(k_bo, (1, E), dtype=jnp.float32),
    }

    out = satriangle_forward(E_feature, A_hat, params, num_heads=H)
    out = jax.block_until_ready(out)

    ref = satriangle_reference(E_feature, A_hat, params, num_heads=H)
    assert out.shape == (B, L, E)
    # bf16 MXU operands (f32 accumulate) + approx reciprocal -> compare against the
    # pure-f32 reference with a correspondingly relaxed tolerance.
    max_err = jnp.max(jnp.abs(out - ref))
    assert jnp.allclose(out, ref, atol=3e-2, rtol=3e-2), f"mismatch vs reference (max abs err {max_err:.3e})"

    print("KERNEL_OK")
</pallas_src>

<mosaic_0001>
module attributes {stable_mosaic.version = 11 : i64} {
  func.func @kernel(%arg0: i32, %arg1: memref<2x8x32xf32, #tpu.memory_space<vmem>>, %arg2: memref<8x8xf32, #tpu.memory_space<vmem>>, %arg3: memref<1x32xf32, #tpu.memory_space<vmem>>, %arg4: memref<1x32xf32, #tpu.memory_space<vmem>>, %arg5: memref<32x32xbf16, #tpu.memory_space<vmem>>, %arg6: memref<32x32xbf16, #tpu.memory_space<vmem>>, %arg7: memref<32x32xbf16, #tpu.memory_space<vmem>>, %arg8: memref<1x32xf32, #tpu.memory_space<vmem>>, %arg9: memref<1x32xf32, #tpu.memory_space<vmem>>, %arg10: memref<1x32xf32, #tpu.memory_space<vmem>>, %arg11: memref<32x32xbf16, #tpu.memory_space<vmem>>, %arg12: memref<1x32xf32, #tpu.memory_space<vmem>>, %arg13: memref<2x8x32xf32, #tpu.memory_space<vmem>>) attributes {dimension_semantics = [#tpu.dimension_semantics<parallel>], iteration_bounds = array<i64: 2>, scalar_prefetch = 0 : i64, scratch_operands = 0 : i64, tpu.core_type = #tpu.core_type<tc>, window_params = [{transform_indices = @transform_0, window_bounds = array<i64: 2, 8, 32>}, {pipeline_mode = #tpu.pipeline_mode<synchronous>, transform_indices = @transform_1, window_bounds = array<i64: 8, 8>}, {pipeline_mode = #tpu.pipeline_mode<synchronous>, transform_indices = @transform_2, window_bounds = array<i64: 1, 32>}, {pipeline_mode = #tpu.pipeline_mode<synchronous>, transform_indices = @transform_3, window_bounds = array<i64: 1, 32>}, {pipeline_mode = #tpu.pipeline_mode<synchronous>, transform_indices = @transform_4, window_bounds = array<i64: 32, 32>}, {pipeline_mode = #tpu.pipeline_mode<synchronous>, transform_indices = @transform_5, window_bounds = array<i64: 32, 32>}, {pipeline_mode = #tpu.pipeline_mode<synchronous>, transform_indices = @transform_6, window_bounds = array<i64: 32, 32>}, {pipeline_mode = #tpu.pipeline_mode<synchronous>, transform_indices = @transform_7, window_bounds = array<i64: 1, 32>}, {pipeline_mode = #tpu.pipeline_mode<synchronous>, transform_indices = @transform_8, window_bounds = array<i64: 1, 32>}, {pipeline_mode = #tpu.pipeline_mode<synchronous>, transform_indices = @transform_9, window_bounds = array<i64: 1, 32>}, {pipeline_mode = #tpu.pipeline_mode<synchronous>, transform_indices = @transform_10, window_bounds = array<i64: 32, 32>}, {pipeline_mode = #tpu.pipeline_mode<synchronous>, transform_indices = @transform_11, window_bounds = array<i64: 1, 32>}, {transform_indices = @transform_12, window_bounds = array<i64: 2, 8, 32>}]} {
    %c0 = arith.constant 0 : index
    %c0_0 = arith.constant 0 : index
    %c0_1 = arith.constant 0 : index
    %0 = vector.load %arg1[%c0, %c0_0, %c0_1] : memref<2x8x32xf32, #tpu.memory_space<vmem>>, vector<2x8x32xf32>
    %1 = vector.shape_cast %0 : vector<2x8x32xf32> to vector<16x32xf32>
    %cst = arith.constant dense<0.000000e+00> : vector<16xf32>
    %2 = vector.multi_reduction <add>, %1, %cst [1] : vector<16x32xf32> to vector<16xf32>
    %3 = vector.shape_cast %2 : vector<16xf32> to vector<16x1xf32>
    %cst_2 = arith.constant 3.200000e+01 : f32
    %4 = vector.broadcast %cst_2 : f32 to vector<16x1xf32>
    %5 = arith.divf %3, %4 : vector<16x1xf32>
    %6 = vector.broadcast %5 : vector<16x1xf32> to vector<16x32xf32>
    %7 = arith.subf %1, %6 : vector<16x32xf32>
    %8 = arith.mulf %7, %7 : vector<16x32xf32>
    %cst_3 = arith.constant dense<0.000000e+00> : vector<16xf32>
    %9 = vector.multi_reduction <add>, %8, %cst_3 [1] : vector<16x32xf32> to vector<16xf32>
    %10 = vector.shape_cast %9 : vector<16xf32> to vector<16x1xf32>
    %cst_4 = arith.constant 3.200000e+01 : f32
    %11 = vector.broadcast %cst_4 : f32 to vector<16x1xf32>
    %12 = arith.divf %10, %11 : vector<16x1xf32>
    %13 = vector.broadcast %5 : vector<16x1xf32> to vector<16x32xf32>
    %14 = arith.subf %1, %13 : vector<16x32xf32>
    %cst_5 = arith.constant 9.99999974E-6 : f32
    %15 = vector.broadcast %cst_5 : f32 to vector<16x1xf32>
    %16 = arith.addf %12, %15 : vector<16x1xf32>
    %17 = math.rsqrt %16 : vector<16x1xf32>
    %18 = vector.broadcast %17 : vector<16x1xf32> to vector<16x32xf32>
    %19 = arith.mulf %14, %18 : vector<16x32xf32>
    %c0_6 = arith.constant 0 : index
    %c0_7 = arith.constant 0 : index
    %20 = vector.load %arg3[%c0_6, %c0_7] : memref<1x32xf32, #tpu.memory_space<vmem>>, vector<1x32xf32>
    %21 = vector.broadcast %20 : vector<1x32xf32> to vector<16x32xf32>
    %22 = arith.mulf %19, %21 : vector<16x32xf32>
    %c0_8 = arith.constant 0 : index
    %c0_9 = arith.constant 0 : index
    %23 = vector.load %arg4[%c0_8, %c0_9] : memref<1x32xf32, #tpu.memory_space<vmem>>, vector<1x32xf32>
    %24 = vector.broadcast %23 : vector<1x32xf32> to vector<16x32xf32>
    %25 = arith.addf %22, %24 : vector<16x32xf32>
    %26 = arith.truncf %25 : vector<16x32xf32> to vector<16x32xbf16>
    %c0_10 = arith.constant 0 : index
    %c0_11 = arith.constant 0 : index
    %27 = vector.load %arg5[%c0_10, %c0_11] : memref<32x32xbf16, #tpu.memory_space<vmem>>, vector<32x32xbf16>
    %cst_12 = arith.constant dense<0.000000e+00> : vector<16x32xf32>
    %28 = tpu.matmul %26, %27, %cst_12 {dimension_numbers = #tpu.dot_dimension_numbers<[1], [0], [0], [1], [0, 0, 1, 1], [], []>} : vector<16x32xbf16>, vector<32x32xbf16>, vector<16x32xf32> -> vector<16x32xf32>
    %c0_13 = arith.constant 0 : index
    %c0_14 = arith.constant 0 : index
    %29 = vector.load %arg8[%c0_13, %c0_14] : memref<1x32xf32, #tpu.memory_space<vmem>>, vector<1x32xf32>
    %30 = vector.broadcast %29 : vector<1x32xf32> to vector<16x32xf32>
    %31 = arith.addf %28, %30 : vector<16x32xf32>
    %c0_15 = arith.constant 0 : index
    %c0_16 = arith.constant 0 : index
    %32 = vector.load %arg6[%c0_15, %c0_16] : memref<32x32xbf16, #tpu.memory_space<vmem>>, vector<32x32xbf16>
    %cst_17 = arith.constant dense<0.000000e+00> : vector<16x32xf32>
    %33 = tpu.matmul %26, %32, %cst_17 {dimension_numbers = #tpu.dot_dimension_numbers<[1], [0], [0], [1], [0, 0, 1, 1], [], []>} : vector<16x32xbf16>, vector<32x32xbf16>, vector<16x32xf32> -> vector<16x32xf32>
    %c0_18 = arith.constant 0 : index
    %c0_19 = arith.constant 0 : index
    %34 = vector.load %arg9[%c0_18, %c0_19] : memref<1x32xf32, #tpu.memory_space<vmem>>, vector<1x32xf32>
    %35 = vector.broadcast %34 : vector<1x32xf32> to vector<16x32xf32>
    %36 = arith.addf %33, %35 : vector<16x32xf32>
    %c0_20 = arith.constant 0 : index
    %c0_21 = arith.constant 0 : index
    %37 = vector.load %arg7[%c0_20, %c0_21] : memref<32x32xbf16, #tpu.memory_space<vmem>>, vector<32x32xbf16>
    %cst_22 = arith.constant dense<0.000000e+00> : vector<16x32xf32>
    %38 = tpu.matmul %26, %37, %cst_22 {dimension_numbers = #tpu.dot_dimension_numbers<[1], [0], [0], [1], [0, 0, 1, 1], [], []>} : vector<16x32xbf16>, vector<32x32xbf16>, vector<16x32xf32> -> vector<16x32xf32>
    %c0_23 = arith.constant 0 : index
    %c0_24 = arith.constant 0 : index
    %39 = vector.load %arg10[%c0_23, %c0_24] : memref<1x32xf32, #tpu.memory_space<vmem>>, vector<1x32xf32>
    %40 = vector.broadcast %39 : vector<1x32xf32> to vector<16x32xf32>
    %41 = arith.addf %38, %40 : vector<16x32xf32>
    %cst_25 = arith.constant 0.353553385 : f32
    %42 = vector.broadcast %cst_25 : f32 to vector<16x32xf32>
    %43 = arith.mulf %31, %42 : vector<16x32xf32>
    %44 = arith.truncf %43 : vector<16x32xf32> to vector<16x32xbf16>
    %45 = vector.shape_cast %44 : vector<16x32xbf16> to vector<2x8x32xbf16>
    %46 = arith.truncf %36 : vector<16x32xf32> to vector<16x32xbf16>
    %47 = vector.shape_cast %46 : vector<16x32xbf16> to vector<2x8x32xbf16>
    %48 = arith.truncf %41 : vector<16x32xf32> to vector<16x32xbf16>
    %49 = vector.shape_cast %48 : vector<16x32xbf16> to vector<2x8x32xbf16>
    %c0_26 = arith.constant 0 : index
    %c0_27 = arith.constant 0 : index
    %50 = vector.load %arg2[%c0_26, %c0_27] : memref<8x8xf32, #tpu.memory_space<vmem>>, vector<8x8xf32>
    %51 = vector.shape_cast %50 : vector<8x8xf32> to vector<1x8x8xf32>
    %c0_28 = arith.constant 0 : index
    %c0_29 = arith.constant 0 : index
    %52 = vector.load %arg11[%c0_28, %c0_29] : memref<32x32xbf16, #tpu.memory_space<vmem>>, vector<32x32xbf16>
    %cst_30 = arith.constant 0.000000e+00 : f32
    %53 = vector.broadcast %cst_30 : f32 to vector<16x32xf32>
    %54 = vector.extract_strided_slice %45 {offsets = [0, 0, 0], sizes = [2, 8, 8], strides = [1, 1, 1]} : vector<2x8x32xbf16> to vector<2x8x8xbf16>
    %55 = vector.extract_strided_slice %47 {offsets = [0, 0, 0], sizes = [2, 8, 8], strides = [1, 1, 1]} : vector<2x8x32xbf16> to vector<2x8x8xbf16>
    "tpu.trace_start"() <{level = 10 : i32, message = "bqd,bkd->bqk"}> : () -> ()
    %cst_31 = arith.constant dense<0.000000e+00> : vector<2x8x8xf32>
    %56 = tpu.matmul %54, %55, %cst_31 {dimension_numbers = #tpu.dot_dimension_numbers<[2], [2], [1], [1], [0, 0, 0, 1, 1, 1], [0], [0]>} : vector<2x8x8xbf16>, vector<2x8x8xbf16>, vector<2x8x8xf32> -> vector<2x8x8xf32>
    "tpu.trace_stop"() : () -> ()
    %57 = vector.broadcast %51 : vector<1x8x8xf32> to vector<2x8x8xf32>
    %58 = arith.addf %56, %57 : vector<2x8x8xf32>
    %cst_32 = arith.constant dense<0xFF800000> : vector<2x8xf32>
    %59 = vector.multi_reduction <maximumf>, %58, %cst_32 [2] : vector<2x8x8xf32> to vector<2x8xf32>
    %60 = vector.shape_cast %59 : vector<2x8xf32> to vector<2x8x1xf32>
    %61 = vector.broadcast %60 : vector<2x8x1xf32> to vector<2x8x8xf32>
    %62 = arith.subf %58, %61 : vector<2x8x8xf32>
    %63 = math.exp %62 : vector<2x8x8xf32>
    %cst_33 = arith.constant dense<0.000000e+00> : vector<2x8xf32>
    %64 = vector.multi_reduction <add>, %63, %cst_33 [2] : vector<2x8x8xf32> to vector<2x8xf32>
    %65 = vector.shape_cast %64 : vector<2x8xf32> to vector<2x8x1xf32>
    %66 = tpu.reciprocal %65 {approx = true} : vector<2x8x1xf32> -> vector<2x8x1xf32>
    %67 = vector.broadcast %66 : vector<2x8x1xf32> to vector<2x8x8xf32>
    %68 = arith.mulf %63, %67 : vector<2x8x8xf32>
    %69 = arith.truncf %68 : vector<2x8x8xf32> to vector<2x8x8xbf16>
    %70 = vector.extract_strided_slice %49 {offsets = [0, 0, 0], sizes = [2, 8, 8], strides = [1, 1, 1]} : vector<2x8x32xbf16> to vector<2x8x8xbf16>
    "tpu.trace_start"() <{level = 10 : i32, message = "bqk,bkd->bqd"}> : () -> ()
    %cst_34 = arith.constant dense<0.000000e+00> : vector<2x8x8xf32>
    %71 = tpu.matmul %69, %70, %cst_34 {dimension_numbers = #tpu.dot_dimension_numbers<[2], [1], [1], [2], [0, 0, 0, 1, 1, 2], [0], [0]>} : vector<2x8x8xbf16>, vector<2x8x8xbf16>, vector<2x8x8xf32> -> vector<2x8x8xf32>
    "tpu.trace_stop"() : () -> ()
    %72 = arith.truncf %71 : vector<2x8x8xf32> to vector<2x8x8xbf16>
    %73 = vector.shape_cast %72 : vector<2x8x8xbf16> to vector<16x8xbf16>
    %74 = vector.extract_strided_slice %52 {offsets = [0, 0], sizes = [8, 32], strides = [1, 1]} : vector<32x32xbf16> to vector<8x32xbf16>
    %cst_35 = arith.constant dense<0.000000e+00> : vector<16x32xf32>
    %75 = tpu.matmul %73, %74, %cst_35 {dimension_numbers = #tpu.dot_dimension_numbers<[1], [0], [0], [1], [0, 0, 1, 1], [], []>} : vector<16x8xbf16>, vector<8x32xbf16>, vector<16x32xf32> -> vector<16x32xf32>
    %76 = arith.addf %53, %75 : vector<16x32xf32>
    %77 = vector.extract_strided_slice %45 {offsets = [0, 0, 8], sizes = [2, 8, 8], strides = [1, 1, 1]} : vector<2x8x32xbf16> to vector<2x8x8xbf16>
    %78 = vector.extract_strided_slice %47 {offsets = [0, 0, 8], sizes = [2, 8, 8], strides = [1, 1, 1]} : vector<2x8x32xbf16> to vector<2x8x8xbf16>
    "tpu.trace_start"() <{level = 10 : i32, message = "bqd,bkd->bqk"}> : () -> ()
    %cst_36 = arith.constant dense<0.000000e+00> : vector<2x8x8xf32>
    %79 = tpu.matmul %77, %78, %cst_36 {dimension_numbers = #tpu.dot_dimension_numbers<[2], [2], [1], [1], [0, 0, 0, 1, 1, 1], [0], [0]>} : vector<2x8x8xbf16>, vector<2x8x8xbf16>, vector<2x8x8xf32> -> vector<2x8x8xf32>
    "tpu.trace_stop"() : () -> ()
    %80 = vector.broadcast %51 : vector<1x8x8xf32> to vector<2x8x8xf32>
    %81 = arith.addf %79, %80 : vector<2x8x8xf32>
    %cst_37 = arith.constant dense<0xFF800000> : vector<2x8xf32>
    %82 = vector.multi_reduction <maximumf>, %81, %cst_37 [2] : vector<2x8x8xf32> to vector<2x8xf32>
    %83 = vector.shape_cast %82 : vector<2x8xf32> to vector<2x8x1xf32>
    %84 = vector.broadcast %83 : vector<2x8x1xf32> to vector<2x8x8xf32>
    %85 = arith.subf %81, %84 : vector<2x8x8xf32>
    %86 = math.exp %85 : vector<2x8x8xf32>
    %cst_38 = arith.constant dense<0.000000e+00> : vector<2x8xf32>
    %87 = vector.multi_reduction <add>, %86, %cst_38 [2] : vector<2x8x8xf32> to vector<2x8xf32>
    %88 = vector.shape_cast %87 : vector<2x8xf32> to vector<2x8x1xf32>
    %89 = tpu.reciprocal %88 {approx = true} : vector<2x8x1xf32> -> vector<2x8x1xf32>
    %90 = vector.broadcast %89 : vector<2x8x1xf32> to vector<2x8x8xf32>
    %91 = arith.mulf %86, %90 : vector<2x8x8xf32>
    %92 = arith.truncf %91 : vector<2x8x8xf32> to vector<2x8x8xbf16>
    %93 = vector.extract_strided_slice %49 {offsets = [0, 0, 8], sizes = [2, 8, 8], strides = [1, 1, 1]} : vector<2x8x32xbf16> to vector<2x8x8xbf16>
    "tpu.trace_start"() <{level = 10 : i32, message = "bqk,bkd->bqd"}> : () -> ()
    %cst_39 = arith.constant dense<0.000000e+00> : vector<2x8x8xf32>
    %94 = tpu.matmul %92, %93, %cst_39 {dimension_numbers = #tpu.dot_dimension_numbers<[2], [1], [1], [2], [0, 0, 0, 1, 1, 2], [0], [0]>} : vector<2x8x8xbf16>, vector<2x8x8xbf16>, vector<2x8x8xf32> -> vector<2x8x8xf32>
    "tpu.trace_stop"() : () -> ()
    %95 = arith.truncf %94 : vector<2x8x8xf32> to vector<2x8x8xbf16>
    %96 = vector.shape_cast %95 : vector<2x8x8xbf16> to vector<16x8xbf16>
    %97 = vector.extract_strided_slice %52 {offsets = [8, 0], sizes = [8, 32], strides = [1, 1]} : vector<32x32xbf16> to vector<8x32xbf16>
    %cst_40 = arith.constant dense<0.000000e+00> : vector<16x32xf32>
    %98 = tpu.matmul %96, %97, %cst_40 {dimension_numbers = #tpu.dot_dimension_numbers<[1], [0], [0], [1], [0, 0, 1, 1], [], []>} : vector<16x8xbf16>, vector<8x32xbf16>, vector<16x32xf32> -> vector<16x32xf32>
    %99 = arith.addf %76, %98 : vector<16x32xf32>
    %100 = vector.extract_strided_slice %45 {offsets = [0, 0, 16], sizes = [2, 8, 8], strides = [1, 1, 1]} : vector<2x8x32xbf16> to vector<2x8x8xbf16>
    %101 = vector.extract_strided_slice %47 {offsets = [0, 0, 16], sizes = [2, 8, 8], strides = [1, 1, 1]} : vector<2x8x32xbf16> to vector<2x8x8xbf16>
    "tpu.trace_start"() <{level = 10 : i32, message = "bqd,bkd->bqk"}> : () -> ()
    %cst_41 = arith.constant dense<0.000000e+00> : vector<2x8x8xf32>
    %102 = tpu.matmul %100, %101, %cst_41 {dimension_numbers = #tpu.dot_dimension_numbers<[2], [2], [1], [1], [0, 0, 0, 1, 1, 1], [0], [0]>} : vector<2x8x8xbf16>, vector<2x8x8xbf16>, vector<2x8x8xf32> -> vector<2x8x8xf32>
    "tpu.trace_stop"() : () -> ()
    %103 = vector.broadcast %51 : vector<1x8x8xf32> to vector<2x8x8xf32>
    %104 = arith.addf %102, %103 : vector<2x8x8xf32>
    %cst_42 = arith.constant dense<0xFF800000> : vector<2x8xf32>
    %105 = vector.multi_reduction <maximumf>, %104, %cst_42 [2] : vector<2x8x8xf32> to vector<2x8xf32>
    %106 = vector.shape_cast %105 : vector<2x8xf32> to vector<2x8x1xf32>
    %107 = vector.broadcast %106 : vector<2x8x1xf32> to vector<2x8x8xf32>
    %108 = arith.subf %104, %107 : vector<2x8x8xf32>
    %109 = math.exp %108 : vector<2x8x8xf32>
    %cst_43 = arith.constant dense<0.000000e+00> : vector<2x8xf32>
    %110 = vector.multi_reduction <add>, %109, %cst_43 [2] : vector<2x8x8xf32> to vector<2x8xf32>
    %111 = vector.shape_cast %110 : vector<2x8xf32> to vector<2x8x1xf32>
    %112 = tpu.reciprocal %111 {approx = true} : vector<2x8x1xf32> -> vector<2x8x1xf32>
    %113 = vector.broadcast %112 : vector<2x8x1xf32> to vector<2x8x8xf32>
    %114 = arith.mulf %109, %113 : vector<2x8x8xf32>
    %115 = arith.truncf %114 : vector<2x8x8xf32> to vector<2x8x8xbf16>
    %116 = vector.extract_strided_slice %49 {offsets = [0, 0, 16], sizes = [2, 8, 8], strides = [1, 1, 1]} : vector<2x8x32xbf16> to vector<2x8x8xbf16>
    "tpu.trace_start"() <{level = 10 : i32, message = "bqk,bkd->bqd"}> : () -> ()
    %cst_44 = arith.constant dense<0.000000e+00> : vector<2x8x8xf32>
    %117 = tpu.matmul %115, %116, %cst_44 {dimension_numbers = #tpu.dot_dimension_numbers<[2], [1], [1], [2], [0, 0, 0, 1, 1, 2], [0], [0]>} : vector<2x8x8xbf16>, vector<2x8x8xbf16>, vector<2x8x8xf32> -> vector<2x8x8xf32>
    "tpu.trace_stop"() : () -> ()
    %118 = arith.truncf %117 : vector<2x8x8xf32> to vector<2x8x8xbf16>
    %119 = vector.shape_cast %118 : vector<2x8x8xbf16> to vector<16x8xbf16>
    %120 = vector.extract_strided_slice %52 {offsets = [16, 0], sizes = [8, 32], strides = [1, 1]} : vector<32x32xbf16> to vector<8x32xbf16>
    %cst_45 = arith.constant dense<0.000000e+00> : vector<16x32xf32>
    %121 = tpu.matmul %119, %120, %cst_45 {dimension_numbers = #tpu.dot_dimension_numbers<[1], [0], [0], [1], [0, 0, 1, 1], [], []>} : vector<16x8xbf16>, vector<8x32xbf16>, vector<16x32xf32> -> vector<16x32xf32>
    %122 = arith.addf %99, %121 : vector<16x32xf32>
    %123 = vector.extract_strided_slice %45 {offsets = [0, 0, 24], sizes = [2, 8, 8], strides = [1, 1, 1]} : vector<2x8x32xbf16> to vector<2x8x8xbf16>
    %124 = vector.extract_strided_slice %47 {offsets = [0, 0, 24], sizes = [2, 8, 8], strides = [1, 1, 1]} : vector<2x8x32xbf16> to vector<2x8x8xbf16>
    "tpu.trace_start"() <{level = 10 : i32, message = "bqd,bkd->bqk"}> : () -> ()
    %cst_46 = arith.constant dense<0.000000e+00> : vector<2x8x8xf32>
    %125 = tpu.matmul %123, %124, %cst_46 {dimension_numbers = #tpu.dot_dimension_numbers<[2], [2], [1], [1], [0, 0, 0, 1, 1, 1], [0], [0]>} : vector<2x8x8xbf16>, vector<2x8x8xbf16>, vector<2x8x8xf32> -> vector<2x8x8xf32>
    "tpu.trace_stop"() : () -> ()
    %126 = vector.broadcast %51 : vector<1x8x8xf32> to vector<2x8x8xf32>
    %127 = arith.addf %125, %126 : vector<2x8x8xf32>
    %cst_47 = arith.constant dense<0xFF800000> : vector<2x8xf32>
    %128 = vector.multi_reduction <maximumf>, %127, %cst_47 [2] : vector<2x8x8xf32> to vector<2x8xf32>
    %129 = vector.shape_cast %128 : vector<2x8xf32> to vector<2x8x1xf32>
    %130 = vector.broadcast %129 : vector<2x8x1xf32> to vector<2x8x8xf32>
    %131 = arith.subf %127, %130 : vector<2x8x8xf32>
    %132 = math.exp %131 : vector<2x8x8xf32>
    %cst_48 = arith.constant dense<0.000000e+00> : vector<2x8xf32>
    %133 = vector.multi_reduction <add>, %132, %cst_48 [2] : vector<2x8x8xf32> to vector<2x8xf32>
    %134 = vector.shape_cast %133 : vector<2x8xf32> to vector<2x8x1xf32>
    %135 = tpu.reciprocal %134 {approx = true} : vector<2x8x1xf32> -> vector<2x8x1xf32>
    %136 = vector.broadcast %135 : vector<2x8x1xf32> to vector<2x8x8xf32>
    %137 = arith.mulf %132, %136 : vector<2x8x8xf32>
    %138 = arith.truncf %137 : vector<2x8x8xf32> to vector<2x8x8xbf16>
    %139 = vector.extract_strided_slice %49 {offsets = [0, 0, 24], sizes = [2, 8, 8], strides = [1, 1, 1]} : vector<2x8x32xbf16> to vector<2x8x8xbf16>
    "tpu.trace_start"() <{level = 10 : i32, message = "bqk,bkd->bqd"}> : () -> ()
    %cst_49 = arith.constant dense<0.000000e+00> : vector<2x8x8xf32>
    %140 = tpu.matmul %138, %139, %cst_49 {dimension_numbers = #tpu.dot_dimension_numbers<[2], [1], [1], [2], [0, 0, 0, 1, 1, 2], [0], [0]>} : vector<2x8x8xbf16>, vector<2x8x8xbf16>, vector<2x8x8xf32> -> vector<2x8x8xf32>
    "tpu.trace_stop"() : () -> ()
    %141 = arith.truncf %140 : vector<2x8x8xf32> to vector<2x8x8xbf16>
    %142 = vector.shape_cast %141 : vector<2x8x8xbf16> to vector<16x8xbf16>
    %143 = vector.extract_strided_slice %52 {offsets = [24, 0], sizes = [8, 32], strides = [1, 1]} : vector<32x32xbf16> to vector<8x32xbf16>
    %cst_50 = arith.constant dense<0.000000e+00> : vector<16x32xf32>
    %144 = tpu.matmul %142, %143, %cst_50 {dimension_numbers = #tpu.dot_dimension_numbers<[1], [0], [0], [1], [0, 0, 1, 1], [], []>} : vector<16x8xbf16>, vector<8x32xbf16>, vector<16x32xf32> -> vector<16x32xf32>
    %145 = arith.addf %122, %144 : vector<16x32xf32>
    %c0_51 = arith.constant 0 : index
    %c0_52 = arith.constant 0 : index
    %146 = vector.load %arg12[%c0_51, %c0_52] : memref<1x32xf32, #tpu.memory_space<vmem>>, vector<1x32xf32>
    %147 = vector.broadcast %146 : vector<1x32xf32> to vector<16x32xf32>
    %148 = arith.addf %145, %147 : vector<16x32xf32>
    %149 = arith.addf %148, %1 : vector<16x32xf32>
    %150 = vector.shape_cast %149 : vector<16x32xf32> to vector<2x8x32xf32>
    %c0_53 = arith.constant 0 : index
    %c0_54 = arith.constant 0 : index
    %c0_55 = arith.constant 0 : index
    %151 = vector.load %arg13[%c0_53, %c0_54, %c0_55] : memref<2x8x32xf32, #tpu.memory_space<vmem>>, vector<2x8x32xf32>
    tpu.vector_store %arg13[%c0_53, %c0_54, %c0_55], %150 {strides = array<i32>} : memref<2x8x32xf32, #tpu.memory_space<vmem>>, vector<2x8x32xf32>,
    return
  }
  func.func @transform_0(%arg0: i32) -> (i32, i32, i32) {
    %c0_i32 = arith.constant 0 : i32
    %c0_i32_0 = arith.constant 0 : i32
    %c0_i32_1 = arith.constant 0 : i32
    return %arg0, %c0_i32, %c0_i32_0 : i32, i32, i32
  }
  func.func @transform_1(%arg0: i32) -> (i32, i32) {
    %c0_i32 = arith.constant 0 : i32
    %c0_i32_0 = arith.constant 0 : i32
    %c0_i32_1 = arith.constant 0 : i32
    return %c0_i32, %c0_i32_0 : i32, i32
  }
  func.func @transform_2(%arg0: i32) -> (i32, i32) {
    %c0_i32 = arith.constant 0 : i32
    %c0_i32_0 = arith.constant 0 : i32
    %c0_i32_1 = arith.constant 0 : i32
    return %c0_i32, %c0_i32_0 : i32, i32
  }
  func.func @transform_3(%arg0: i32) -> (i32, i32) {
    %c0_i32 = arith.constant 0 : i32
    %c0_i32_0 = arith.constant 0 : i32
    %c0_i32_1 = arith.constant 0 : i32
    return %c0_i32, %c0_i32_0 : i32, i32
  }
  func.func @transform_4(%arg0: i32) -> (i32, i32) {
    %c0_i32 = arith.constant 0 : i32
    %c0_i32_0 = arith.constant 0 : i32
    %c0_i32_1 = arith.constant 0 : i32
    return %c0_i32, %c0_i32_0 : i32, i32
  }
  func.func @transform_5(%arg0: i32) -> (i32, i32) {
    %c0_i32 = arith.constant 0 : i32
    %c0_i32_0 = arith.constant 0 : i32
    %c0_i32_1 = arith.constant 0 : i32
    return %c0_i32, %c0_i32_0 : i32, i32
  }
  func.func @transform_6(%arg0: i32) -> (i32, i32) {
    %c0_i32 = arith.constant 0 : i32
    %c0_i32_0 = arith.constant 0 : i32
    %c0_i32_1 = arith.constant 0 : i32
    return %c0_i32, %c0_i32_0 : i32, i32
  }
  func.func @transform_7(%arg0: i32) -> (i32, i32) {
    %c0_i32 = arith.constant 0 : i32
    %c0_i32_0 = arith.constant 0 : i32
    %c0_i32_1 = arith.constant 0 : i32
    return %c0_i32, %c0_i32_0 : i32, i32
  }
  func.func @transform_8(%arg0: i32) -> (i32, i32) {
    %c0_i32 = arith.constant 0 : i32
    %c0_i32_0 = arith.constant 0 : i32
    %c0_i32_1 = arith.constant 0 : i32
    return %c0_i32, %c0_i32_0 : i32, i32
  }
  func.func @transform_9(%arg0: i32) -> (i32, i32) {
    %c0_i32 = arith.constant 0 : i32
    %c0_i32_0 = arith.constant 0 : i32
    %c0_i32_1 = arith.constant 0 : i32
    return %c0_i32, %c0_i32_0 : i32, i32
  }
  func.func @transform_10(%arg0: i32) -> (i32, i32) {
    %c0_i32 = arith.constant 0 : i32
    %c0_i32_0 = arith.constant 0 : i32
    %c0_i32_1 = arith.constant 0 : i32
    return %c0_i32, %c0_i32_0 : i32, i32
  }
  func.func @transform_11(%arg0: i32) -> (i32, i32) {
    %c0_i32 = arith.constant 0 : i32
    %c0_i32_0 = arith.constant 0 : i32
    %c0_i32_1 = arith.constant 0 : i32
    return %c0_i32, %c0_i32_0 : i32, i32
  }
  func.func @transform_12(%arg0: i32) -> (i32, i32, i32) {
    %c0_i32 = arith.constant 0 : i32
    %c0_i32_0 = arith.constant 0 : i32
    %c0_i32_1 = arith.constant 0 : i32
    return %arg0, %c0_i32, %c0_i32_0 : i32, i32, i32
  }
}

module attributes {stable_mosaic.version = 11 : i64} {
  func.func @kernel(%arg0: i32, %arg1: memref<2x8x32xf32, #tpu.memory_space<vmem>>, %arg2: memref<8x8xf32, #tpu.memory_space<vmem>>, %arg3: memref<1x32xf32, #tpu.memory_space<vmem>>, %arg4: memref<1x32xf32, #tpu.memory_space<vmem>>, %arg5: memref<32x32xbf16, #tpu.memory_space<vmem>>, %arg6: memref<32x32xbf16, #tpu.memory_space<vmem>>, %arg7: memref<32x32xbf16, #tpu.memory_space<vmem>>, %arg8: memref<1x32xf32, #tpu.memory_space<vmem>>, %arg9: memref<1x32xf32, #tpu.memory_space<vmem>>, %arg10: memref<1x32xf32, #tpu.memory_space<vmem>>, %arg11: memref<32x32xbf16, #tpu.memory_space<vmem>>, %arg12: memref<1x32xf32, #tpu.memory_space<vmem>>, %arg13: memref<2x8x32xf32, #tpu.memory_space<vmem>>) attributes {dimension_semantics = [#tpu.dimension_semantics<parallel>], iteration_bounds = array<i64: 2>, scalar_prefetch = 0 : i64, scratch_operands = 0 : i64, tpu.core_type = #tpu.core_type<tc>, window_params = [{transform_indices = @transform_0, window_bounds = array<i64: 2, 8, 32>}, {pipeline_mode = #tpu.pipeline_mode<synchronous>, transform_indices = @transform_1, window_bounds = array<i64: 8, 8>}, {pipeline_mode = #tpu.pipeline_mode<synchronous>, transform_indices = @transform_2, window_bounds = array<i64: 1, 32>}, {pipeline_mode = #tpu.pipeline_mode<synchronous>, transform_indices = @transform_3, window_bounds = array<i64: 1, 32>}, {pipeline_mode = #tpu.pipeline_mode<synchronous>, transform_indices = @transform_4, window_bounds = array<i64: 32, 32>}, {pipeline_mode = #tpu.pipeline_mode<synchronous>, transform_indices = @transform_5, window_bounds = array<i64: 32, 32>}, {pipeline_mode = #tpu.pipeline_mode<synchronous>, transform_indices = @transform_6, window_bounds = array<i64: 32, 32>}, {pipeline_mode = #tpu.pipeline_mode<synchronous>, transform_indices = @transform_7, window_bounds = array<i64: 1, 32>}, {pipeline_mode = #tpu.pipeline_mode<synchronous>, transform_indices = @transform_8, window_bounds = array<i64: 1, 32>}, {pipeline_mode = #tpu.pipeline_mode<synchronous>, transform_indices = @transform_9, window_bounds = array<i64: 1, 32>}, {pipeline_mode = #tpu.pipeline_mode<synchronous>, transform_indices = @transform_10, window_bounds = array<i64: 32, 32>}, {pipeline_mode = #tpu.pipeline_mode<synchronous>, transform_indices = @transform_11, window_bounds = array<i64: 1, 32>}, {transform_indices = @transform_12, window_bounds = array<i64: 2, 8, 32>}]} {
    %c0 = arith.constant 0 : index
    %c0_0 = arith.constant 0 : index
    %c0_1 = arith.constant 0 : index
    %0 = vector.load %arg1[%c0, %c0_0, %c0_1] : memref<2x8x32xf32, #tpu.memory_space<vmem>>, vector<2x8x32xf32>
    %1 = vector.shape_cast %0 : vector<2x8x32xf32> to vector<16x32xf32>
    %cst = arith.constant dense<0.000000e+00> : vector<16xf32>
    %2 = vector.multi_reduction <add>, %1, %cst [1] : vector<16x32xf32> to vector<16xf32>
    %3 = vector.shape_cast %2 : vector<16xf32> to vector<16x1xf32>
    %cst_2 = arith.constant 3.200000e+01 : f32
    %4 = vector.broadcast %cst_2 : f32 to vector<16x1xf32>
    %5 = arith.divf %3, %4 : vector<16x1xf32>
    %6 = vector.broadcast %5 : vector<16x1xf32> to vector<16x32xf32>
    %7 = arith.subf %1, %6 : vector<16x32xf32>
    %8 = arith.mulf %7, %7 : vector<16x32xf32>
    %cst_3 = arith.constant dense<0.000000e+00> : vector<16xf32>
    %9 = vector.multi_reduction <add>, %8, %cst_3 [1] : vector<16x32xf32> to vector<16xf32>
    %10 = vector.shape_cast %9 : vector<16xf32> to vector<16x1xf32>
    %cst_4 = arith.constant 3.200000e+01 : f32
    %11 = vector.broadcast %cst_4 : f32 to vector<16x1xf32>
    %12 = arith.divf %10, %11 : vector<16x1xf32>
    %13 = vector.broadcast %5 : vector<16x1xf32> to vector<16x32xf32>
    %14 = arith.subf %1, %13 : vector<16x32xf32>
    %cst_5 = arith.constant 9.99999974E-6 : f32
    %15 = vector.broadcast %cst_5 : f32 to vector<16x1xf32>
    %16 = arith.addf %12, %15 : vector<16x1xf32>
    %17 = math.rsqrt %16 : vector<16x1xf32>
    %18 = vector.broadcast %17 : vector<16x1xf32> to vector<16x32xf32>
    %19 = arith.mulf %14, %18 : vector<16x32xf32>
    %c0_6 = arith.constant 0 : index
    %c0_7 = arith.constant 0 : index
    %20 = vector.load %arg3[%c0_6, %c0_7] : memref<1x32xf32, #tpu.memory_space<vmem>>, vector<1x32xf32>
    %21 = vector.broadcast %20 : vector<1x32xf32> to vector<16x32xf32>
    %22 = arith.mulf %19, %21 : vector<16x32xf32>
    %c0_8 = arith.constant 0 : index
    %c0_9 = arith.constant 0 : index
    %23 = vector.load %arg4[%c0_8, %c0_9] : memref<1x32xf32, #tpu.memory_space<vmem>>, vector<1x32xf32>
    %24 = vector.broadcast %23 : vector<1x32xf32> to vector<16x32xf32>
    %25 = arith.addf %22, %24 : vector<16x32xf32>
    %26 = arith.truncf %25 : vector<16x32xf32> to vector<16x32xbf16>
    %c0_10 = arith.constant 0 : index
    %c0_11 = arith.constant 0 : index
    %27 = vector.load %arg5[%c0_10, %c0_11] : memref<32x32xbf16, #tpu.memory_space<vmem>>, vector<32x32xbf16>
    %cst_12 = arith.constant dense<0.000000e+00> : vector<16x32xf32>
    %28 = tpu.matmul %26, %27, %cst_12 {dimension_numbers = #tpu.dot_dimension_numbers<[1], [0], [0], [1], [0, 0, 1, 1], [], []>} : vector<16x32xbf16>, vector<32x32xbf16>, vector<16x32xf32> -> vector<16x32xf32>
    %c0_13 = arith.constant 0 : index
    %c0_14 = arith.constant 0 : index
    %29 = vector.load %arg8[%c0_13, %c0_14] : memref<1x32xf32, #tpu.memory_space<vmem>>, vector<1x32xf32>
    %30 = vector.broadcast %29 : vector<1x32xf32> to vector<16x32xf32>
    %31 = arith.addf %28, %30 : vector<16x32xf32>
    %c0_15 = arith.constant 0 : index
    %c0_16 = arith.constant 0 : index
    %32 = vector.load %arg6[%c0_15, %c0_16] : memref<32x32xbf16, #tpu.memory_space<vmem>>, vector<32x32xbf16>
    %cst_17 = arith.constant dense<0.000000e+00> : vector<16x32xf32>
    %33 = tpu.matmul %26, %32, %cst_17 {dimension_numbers = #tpu.dot_dimension_numbers<[1], [0], [0], [1], [0, 0, 1, 1], [], []>} : vector<16x32xbf16>, vector<32x32xbf16>, vector<16x32xf32> -> vector<16x32xf32>
    %c0_18 = arith.constant 0 : index
    %c0_19 = arith.constant 0 : index
    %34 = vector.load %arg9[%c0_18, %c0_19] : memref<1x32xf32, #tpu.memory_space<vmem>>, vector<1x32xf32>
    %35 = vector.broadcast %34 : vector<1x32xf32> to vector<16x32xf32>
    %36 = arith.addf %33, %35 : vector<16x32xf32>
    %c0_20 = arith.constant 0 : index
    %c0_21 = arith.constant 0 : index
    %37 = vector.load %arg7[%c0_20, %c0_21] : memref<32x32xbf16, #tpu.memory_space<vmem>>, vector<32x32xbf16>
    %cst_22 = arith.constant dense<0.000000e+00> : vector<16x32xf32>
    %38 = tpu.matmul %26, %37, %cst_22 {dimension_numbers = #tpu.dot_dimension_numbers<[1], [0], [0], [1], [0, 0, 1, 1], [], []>} : vector<16x32xbf16>, vector<32x32xbf16>, vector<16x32xf32> -> vector<16x32xf32>
    %c0_23 = arith.constant 0 : index
    %c0_24 = arith.constant 0 : index
    %39 = vector.load %arg10[%c0_23, %c0_24] : memref<1x32xf32, #tpu.memory_space<vmem>>, vector<1x32xf32>
    %40 = vector.broadcast %39 : vector<1x32xf32> to vector<16x32xf32>
    %41 = arith.addf %38, %40 : vector<16x32xf32>
    %cst_25 = arith.constant 0.353553385 : f32
    %42 = vector.broadcast %cst_25 : f32 to vector<16x32xf32>
    %43 = arith.mulf %31, %42 : vector<16x32xf32>
    %44 = arith.truncf %43 : vector<16x32xf32> to vector<16x32xbf16>
    %45 = vector.shape_cast %44 : vector<16x32xbf16> to vector<2x8x32xbf16>
    %46 = arith.truncf %36 : vector<16x32xf32> to vector<16x32xbf16>
    %47 = vector.shape_cast %46 : vector<16x32xbf16> to vector<2x8x32xbf16>
    %48 = arith.truncf %41 : vector<16x32xf32> to vector<16x32xbf16>
    %49 = vector.shape_cast %48 : vector<16x32xbf16> to vector<2x8x32xbf16>
    %c0_26 = arith.constant 0 : index
    %c0_27 = arith.constant 0 : index
    %50 = vector.load %arg2[%c0_26, %c0_27] : memref<8x8xf32, #tpu.memory_space<vmem>>, vector<8x8xf32>
    %51 = vector.shape_cast %50 : vector<8x8xf32> to vector<1x8x8xf32>
    %c0_28 = arith.constant 0 : index
    %c0_29 = arith.constant 0 : index
    %52 = vector.load %arg11[%c0_28, %c0_29] : memref<32x32xbf16, #tpu.memory_space<vmem>>, vector<32x32xbf16>
    %cst_30 = arith.constant 0.000000e+00 : f32
    %53 = vector.broadcast %cst_30 : f32 to vector<16x32xf32>
    %54 = vector.extract_strided_slice %45 {offsets = [0, 0, 0], sizes = [2, 8, 8], strides = [1, 1, 1]} : vector<2x8x32xbf16> to vector<2x8x8xbf16>
    %55 = vector.extract_strided_slice %47 {offsets = [0, 0, 0], sizes = [2, 8, 8], strides = [1, 1, 1]} : vector<2x8x32xbf16> to vector<2x8x8xbf16>
    "tpu.trace_start"() <{level = 10 : i32, message = "bqd,bkd->bqk"}> : () -> ()
    %cst_31 = arith.constant dense<0.000000e+00> : vector<2x8x8xf32>
    %56 = tpu.matmul %54, %55, %cst_31 {dimension_numbers = #tpu.dot_dimension_numbers<[2], [2], [1], [1], [0, 0, 0, 1, 1, 1], [0], [0]>} : vector<2x8x8xbf16>, vector<2x8x8xbf16>, vector<2x8x8xf32> -> vector<2x8x8xf32>
    "tpu.trace_stop"() : () -> ()
    %57 = vector.broadcast %51 : vector<1x8x8xf32> to vector<2x8x8xf32>
    %58 = arith.addf %56, %57 : vector<2x8x8xf32>
    %cst_32 = arith.constant dense<0xFF800000> : vector<2x8xf32>
    %59 = vector.multi_reduction <maximumf>, %58, %cst_32 [2] : vector<2x8x8xf32> to vector<2x8xf32>
    %60 = vector.shape_cast %59 : vector<2x8xf32> to vector<2x8x1xf32>
    %61 = vector.broadcast %60 : vector<2x8x1xf32> to vector<2x8x8xf32>
    %62 = arith.subf %58, %61 : vector<2x8x8xf32>
    %63 = math.exp %62 : vector<2x8x8xf32>
    %cst_33 = arith.constant dense<0.000000e+00> : vector<2x8xf32>
    %64 = vector.multi_reduction <add>, %63, %cst_33 [2] : vector<2x8x8xf32> to vector<2x8xf32>
    %65 = vector.shape_cast %64 : vector<2x8xf32> to vector<2x8x1xf32>
    %66 = tpu.reciprocal %65 {approx = true} : vector<2x8x1xf32> -> vector<2x8x1xf32>
    %67 = vector.broadcast %66 : vector<2x8x1xf32> to vector<2x8x8xf32>
    %68 = arith.mulf %63, %67 : vector<2x8x8xf32>
    %69 = arith.truncf %68 : vector<2x8x8xf32> to vector<2x8x8xbf16>
    %70 = vector.extract_strided_slice %49 {offsets = [0, 0, 0], sizes = [2, 8, 8], strides = [1, 1, 1]} : vector<2x8x32xbf16> to vector<2x8x8xbf16>
    "tpu.trace_start"() <{level = 10 : i32, message = "bqk,bkd->bqd"}> : () -> ()
    %cst_34 = arith.constant dense<0.000000e+00> : vector<2x8x8xf32>
    %71 = tpu.matmul %69, %70, %cst_34 {dimension_numbers = #tpu.dot_dimension_numbers<[2], [1], [1], [2], [0, 0, 0, 1, 1, 2], [0], [0]>} : vector<2x8x8xbf16>, vector<2x8x8xbf16>, vector<2x8x8xf32> -> vector<2x8x8xf32>
    "tpu.trace_stop"() : () -> ()
    %72 = arith.truncf %71 : vector<2x8x8xf32> to vector<2x8x8xbf16>
    %73 = vector.shape_cast %72 : vector<2x8x8xbf16> to vector<16x8xbf16>
    %74 = vector.extract_strided_slice %52 {offsets = [0, 0], sizes = [8, 32], strides = [1, 1]} : vector<32x32xbf16> to vector<8x32xbf16>
    %cst_35 = arith.constant dense<0.000000e+00> : vector<16x32xf32>
    %75 = tpu.matmul %73, %74, %cst_35 {dimension_numbers = #tpu.dot_dimension_numbers<[1], [0], [0], [1], [0, 0, 1, 1], [], []>} : vector<16x8xbf16>, vector<8x32xbf16>, vector<16x32xf32> -> vector<16x32xf32>
    %76 = arith.addf %53, %75 : vector<16x32xf32>
    %77 = vector.extract_strided_slice %45 {offsets = [0, 0, 8], sizes = [2, 8, 8], strides = [1, 1, 1]} : vector<2x8x32xbf16> to vector<2x8x8xbf16>
    %78 = vector.extract_strided_slice %47 {offsets = [0, 0, 8], sizes = [2, 8, 8], strides = [1, 1, 1]} : vector<2x8x32xbf16> to vector<2x8x8xbf16>
    "tpu.trace_start"() <{level = 10 : i32, message = "bqd,bkd->bqk"}> : () -> ()
    %cst_36 = arith.constant dense<0.000000e+00> : vector<2x8x8xf32>
    %79 = tpu.matmul %77, %78, %cst_36 {dimension_numbers = #tpu.dot_dimension_numbers<[2], [2], [1], [1], [0, 0, 0, 1, 1, 1], [0], [0]>} : vector<2x8x8xbf16>, vector<2x8x8xbf16>, vector<2x8x8xf32> -> vector<2x8x8xf32>
    "tpu.trace_stop"() : () -> ()
    %80 = vector.broadcast %51 : vector<1x8x8xf32> to vector<2x8x8xf32>
    %81 = arith.addf %79, %80 : vector<2x8x8xf32>
    %cst_37 = arith.constant dense<0xFF800000> : vector<2x8xf32>
    %82 = vector.multi_reduction <maximumf>, %81, %cst_37 [2] : vector<2x8x8xf32> to vector<2x8xf32>
    %83 = vector.shape_cast %82 : vector<2x8xf32> to vector<2x8x1xf32>
    %84 = vector.broadcast %83 : vector<2x8x1xf32> to vector<2x8x8xf32>
    %85 = arith.subf %81, %84 : vector<2x8x8xf32>
    %86 = math.exp %85 : vector<2x8x8xf32>
    %cst_38 = arith.constant dense<0.000000e+00> : vector<2x8xf32>
    %87 = vector.multi_reduction <add>, %86, %cst_38 [2] : vector<2x8x8xf32> to vector<2x8xf32>
    %88 = vector.shape_cast %87 : vector<2x8xf32> to vector<2x8x1xf32>
    %89 = tpu.reciprocal %88 {approx = true} : vector<2x8x1xf32> -> vector<2x8x1xf32>
    %90 = vector.broadcast %89 : vector<2x8x1xf32> to vector<2x8x8xf32>
    %91 = arith.mulf %86, %90 : vector<2x8x8xf32>
    %92 = arith.truncf %91 : vector<2x8x8xf32> to vector<2x8x8xbf16>
    %93 = vector.extract_strided_slice %49 {offsets = [0, 0, 8], sizes = [2, 8, 8], strides = [1, 1, 1]} : vector<2x8x32xbf16> to vector<2x8x8xbf16>
    "tpu.trace_start"() <{level = 10 : i32, message = "bqk,bkd->bqd"}> : () -> ()
    %cst_39 = arith.constant dense<0.000000e+00> : vector<2x8x8xf32>
    %94 = tpu.matmul %92, %93, %cst_39 {dimension_numbers = #tpu.dot_dimension_numbers<[2], [1], [1], [2], [0, 0, 0, 1, 1, 2], [0], [0]>} : vector<2x8x8xbf16>, vector<2x8x8xbf16>, vector<2x8x8xf32> -> vector<2x8x8xf32>
    "tpu.trace_stop"() : () -> ()
    %95 = arith.truncf %94 : vector<2x8x8xf32> to vector<2x8x8xbf16>
    %96 = vector.shape_cast %95 : vector<2x8x8xbf16> to vector<16x8xbf16>
    %97 = vector.extract_strided_slice %52 {offsets = [8, 0], sizes = [8, 32], strides = [1, 1]} : vector<32x32xbf16> to vector<8x32xbf16>
    %cst_40 = arith.constant dense<0.000000e+00> : vector<16x32xf32>
    %98 = tpu.matmul %96, %97, %cst_40 {dimension_numbers = #tpu.dot_dimension_numbers<[1], [0], [0], [1], [0, 0, 1, 1], [], []>} : vector<16x8xbf16>, vector<8x32xbf16>, vector<16x32xf32> -> vector<16x32xf32>
    %99 = arith.addf %76, %98 : vector<16x32xf32>
    %100 = vector.extract_strided_slice %45 {offsets = [0, 0, 16], sizes = [2, 8, 8], strides = [1, 1, 1]} : vector<2x8x32xbf16> to vector<2x8x8xbf16>
    %101 = vector.extract_strided_slice %47 {offsets = [0, 0, 16], sizes = [2, 8, 8], strides = [1, 1, 1]} : vector<2x8x32xbf16> to vector<2x8x8xbf16>
    "tpu.trace_start"() <{level = 10 : i32, message = "bqd,bkd->bqk"}> : () -> ()
    %cst_41 = arith.constant dense<0.000000e+00> : vector<2x8x8xf32>
    %102 = tpu.matmul %100, %101, %cst_41 {dimension_numbers = #tpu.dot_dimension_numbers<[2], [2], [1], [1], [0, 0, 0, 1, 1, 1], [0], [0]>} : vector<2x8x8xbf16>, vector<2x8x8xbf16>, vector<2x8x8xf32> -> vector<2x8x8xf32>
    "tpu.trace_stop"() : () -> ()
    %103 = vector.broadcast %51 : vector<1x8x8xf32> to vector<2x8x8xf32>
    %104 = arith.addf %102, %103 : vector<2x8x8xf32>
    %cst_42 = arith.constant dense<0xFF800000> : vector<2x8xf32>
    %105 = vector.multi_reduction <maximumf>, %104, %cst_42 [2] : vector<2x8x8xf32> to vector<2x8xf32>
    %106 = vector.shape_cast %105 : vector<2x8xf32> to vector<2x8x1xf32>
    %107 = vector.broadcast %106 : vector<2x8x1xf32> to vector<2x8x8xf32>
    %108 = arith.subf %104, %107 : vector<2x8x8xf32>
    %109 = math.exp %108 : vector<2x8x8xf32>
    %cst_43 = arith.constant dense<0.000000e+00> : vector<2x8xf32>
    %110 = vector.multi_reduction <add>, %109, %cst_43 [2] : vector<2x8x8xf32> to vector<2x8xf32>
    %111 = vector.shape_cast %110 : vector<2x8xf32> to vector<2x8x1xf32>
    %112 = tpu.reciprocal %111 {approx = true} : vector<2x8x1xf32> -> vector<2x8x1xf32>
    %113 = vector.broadcast %112 : vector<2x8x1xf32> to vector<2x8x8xf32>
    %114 = arith.mulf %109, %113 : vector<2x8x8xf32>
    %115 = arith.truncf %114 : vector<2x8x8xf32> to vector<2x8x8xbf16>
    %116 = vector.extract_strided_slice %49 {offsets = [0, 0, 16], sizes = [2, 8, 8], strides = [1, 1, 1]} : vector<2x8x32xbf16> to vector<2x8x8xbf16>
    "tpu.trace_start"() <{level = 10 : i32, message = "bqk,bkd->bqd"}> : () -> ()
    %cst_44 = arith.constant dense<0.000000e+00> : vector<2x8x8xf32>
    %117 = tpu.matmul %115, %116, %cst_44 {dimension_numbers = #tpu.dot_dimension_numbers<[2], [1], [1], [2], [0, 0, 0, 1, 1, 2], [0], [0]>} : vector<2x8x8xbf16>, vector<2x8x8xbf16>, vector<2x8x8xf32> -> vector<2x8x8xf32>
    "tpu.trace_stop"() : () -> ()
    %118 = arith.truncf %117 : vector<2x8x8xf32> to vector<2x8x8xbf16>
    %119 = vector.shape_cast %118 : vector<2x8x8xbf16> to vector<16x8xbf16>
    %120 = vector.extract_strided_slice %52 {offsets = [16, 0], sizes = [8, 32], strides = [1, 1]} : vector<32x32xbf16> to vector<8x32xbf16>
    %cst_45 = arith.constant dense<0.000000e+00> : vector<16x32xf32>
    %121 = tpu.matmul %119, %120, %cst_45 {dimension_numbers = #tpu.dot_dimension_numbers<[1], [0], [0], [1], [0, 0, 1, 1], [], []>} : vector<16x8xbf16>, vector<8x32xbf16>, vector<16x32xf32> -> vector<16x32xf32>
    %122 = arith.addf %99, %121 : vector<16x32xf32>
    %123 = vector.extract_strided_slice %45 {offsets = [0, 0, 24], sizes = [2, 8, 8], strides = [1, 1, 1]} : vector<2x8x32xbf16> to vector<2x8x8xbf16>
    %124 = vector.extract_strided_slice %47 {offsets = [0, 0, 24], sizes = [2, 8, 8], strides = [1, 1, 1]} : vector<2x8x32xbf16> to vector<2x8x8xbf16>
    "tpu.trace_start"() <{level = 10 : i32, message = "bqd,bkd->bqk"}> : () -> ()
    %cst_46 = arith.constant dense<0.000000e+00> : vector<2x8x8xf32>
    %125 = tpu.matmul %123, %124, %cst_46 {dimension_numbers = #tpu.dot_dimension_numbers<[2], [2], [1], [1], [0, 0, 0, 1, 1, 1], [0], [0]>} : vector<2x8x8xbf16>, vector<2x8x8xbf16>, vector<2x8x8xf32> -> vector<2x8x8xf32>
    "tpu.trace_stop"() : () -> ()
    %126 = vector.broadcast %51 : vector<1x8x8xf32> to vector<2x8x8xf32>
    %127 = arith.addf %125, %126 : vector<2x8x8xf32>
    %cst_47 = arith.constant dense<0xFF800000> : vector<2x8xf32>
    %128 = vector.multi_reduction <maximumf>, %127, %cst_47 [2] : vector<2x8x8xf32> to vector<2x8xf32>
    %129 = vector.shape_cast %128 : vector<2x8xf32> to vector<2x8x1xf32>
    %130 = vector.broadcast %129 : vector<2x8x1xf32> to vector<2x8x8xf32>
    %131 = arith.subf %127, %130 : vector<2x8x8xf32>
    %132 = math.exp %131 : vector<2x8x8xf32>
    %cst_48 = arith.constant dense<0.000000e+00> : vector<2x8xf32>
    %133 = vector.multi_reduction <add>, %132, %cst_48 [2] : vector<2x8x8xf32> to vector<2x8xf32>
    %134 = vector.shape_cast %133 : vector<2x8xf32> to vector<2x8x1xf32>
    %135 = tpu.reciprocal %134 {approx = true} : vector<2x8x1xf32> -> vector<2x8x1xf32>
    %136 = vector.broadcast %135 : vector<2x8x1xf32> to vector<2x8x8xf32>
    %137 = arith.mulf %132, %136 : vector<2x8x8xf32>
    %138 = arith.truncf %137 : vector<2x8x8xf32> to vector<2x8x8xbf16>
    %139 = vector.extract_strided_slice %49 {offsets = [0, 0, 24], sizes = [2, 8, 8], strides = [1, 1, 1]} : vector<2x8x32xbf16> to vector<2x8x8xbf16>
    "tpu.trace_start"() <{level = 10 : i32, message = "bqk,bkd->bqd"}> : () -> ()
    %cst_49 = arith.constant dense<0.000000e+00> : vector<2x8x8xf32>
    %140 = tpu.matmul %138, %139, %cst_49 {dimension_numbers = #tpu.dot_dimension_numbers<[2], [1], [1], [2], [0, 0, 0, 1, 1, 2], [0], [0]>} : vector<2x8x8xbf16>, vector<2x8x8xbf16>, vector<2x8x8xf32> -> vector<2x8x8xf32>
    "tpu.trace_stop"() : () -> ()
    %141 = arith.truncf %140 : vector<2x8x8xf32> to vector<2x8x8xbf16>
    %142 = vector.shape_cast %141 : vector<2x8x8xbf16> to vector<16x8xbf16>
    %143 = vector.extract_strided_slice %52 {offsets = [24, 0], sizes = [8, 32], strides = [1, 1]} : vector<32x32xbf16> to vector<8x32xbf16>
    %cst_50 = arith.constant dense<0.000000e+00> : vector<16x32xf32>
    %144 = tpu.matmul %142, %143, %cst_50 {dimension_numbers = #tpu.dot_dimension_numbers<[1], [0], [0], [1], [0, 0, 1, 1], [], []>} : vector<16x8xbf16>, vector<8x32xbf16>, vector<16x32xf32> -> vector<16x32xf32>
    %145 = arith.addf %122, %144 : vector<16x32xf32>
    %c0_51 = arith.constant 0 : index
    %c0_52 = arith.constant 0 : index
    %146 = vector.load %arg12[%c0_51, %c0_52] : memref<1x32xf32, #tpu.memory_space<vmem>>, vector<1x32xf32>
    %147 = vector.broadcast %146 : vector<1x32xf32> to vector<16x32xf32>
    %148 = arith.addf %145, %147 : vector<16x32xf32>
    %149 = arith.addf %148, %1 : vector<16x32xf32>
    %150 = vector.shape_cast %149 : vector<16x32xf32> to vector<2x8x32xf32>
    %c0_53 = arith.constant 0 : index
    %c0_54 = arith.constant 0 : index
    %c0_55 = arith.constant 0 : index
    %151 = vector.load %arg13[%c0_53, %c0_54, %c0_55] : memref<2x8x32xf32, #tpu.memory_space<vmem>>, vector<2x8x32xf32>
    tpu.vector_store %arg13[%c0_53, %c0_54, %c0_55], %150 {strides = array<i32>} : memref<2x8x32xf32, #tpu.memory_space<vmem>>, vector<2x8x32xf32>,
    return
  }
  func.func @transform_0(%arg0: i32) -> (i32, i32, i32) {
    %c0_i32 = arith.constant 0 : i32
    %c0_i32_0 = arith.constant 0 : i32
    %c0_i32_1 = arith.constant 0 : i32
    return %arg0, %c0_i32, %c0_i32_0 : i32, i32, i32
  }
  func.func @transform_1(%arg0: i32) -> (i32, i32) {
    %c0_i32 = arith.constant 0 : i32
    %c0_i32_0 = arith.constant 0 : i32
    %c0_i32_1 = arith.constant 0 : i32
    return %c0_i32, %c0_i32_0 : i32, i32
  }
  func.func @transform_2(%arg0: i32) -> (i32, i32) {
    %c0_i32 = arith.constant 0 : i32
    %c0_i32_0 = arith.constant 0 : i32
    %c0_i32_1 = arith.constant 0 : i32
    return %c0_i32, %c0_i32_0 : i32, i32
  }
  func.func @transform_3(%arg0: i32) -> (i32, i32) {
    %c0_i32 = arith.constant 0 : i32
    %c0_i32_0 = arith.constant 0 : i32
    %c0_i32_1 = arith.constant 0 : i32
    return %c0_i32, %c0_i32_0 : i32, i32
  }
  func.func @transform_4(%arg0: i32) -> (i32, i32) {
    %c0_i32 = arith.constant 0 : i32
    %c0_i32_0 = arith.constant 0 : i32
    %c0_i32_1 = arith.constant 0 : i32
    return %c0_i32, %c0_i32_0 : i32, i32
  }
  func.func @transform_5(%arg0: i32) -> (i32, i32) {
    %c0_i32 = arith.constant 0 : i32
    %c0_i32_0 = arith.constant 0 : i32
    %c0_i32_1 = arith.constant 0 : i32
    return %c0_i32, %c0_i32_0 : i32, i32
  }
  func.func @transform_6(%arg0: i32) -> (i32, i32) {
    %c0_i32 = arith.constant 0 : i32
    %c0_i32_0 = arith.constant 0 : i32
    %c0_i32_1 = arith.constant 0 : i32
    return %c0_i32, %c0_i32_0 : i32, i32
  }
  func.func @transform_7(%arg0: i32) -> (i32, i32) {
    %c0_i32 = arith.constant 0 : i32
    %c0_i32_0 = arith.constant 0 : i32
    %c0_i32_1 = arith.constant 0 : i32
    return %c0_i32, %c0_i32_0 : i32, i32
  }
  func.func @transform_8(%arg0: i32) -> (i32, i32) {
    %c0_i32 = arith.constant 0 : i32
    %c0_i32_0 = arith.constant 0 : i32
    %c0_i32_1 = arith.constant 0 : i32
    return %c0_i32, %c0_i32_0 : i32, i32
  }
  func.func @transform_9(%arg0: i32) -> (i32, i32) {
    %c0_i32 = arith.constant 0 : i32
    %c0_i32_0 = arith.constant 0 : i32
    %c0_i32_1 = arith.constant 0 : i32
    return %c0_i32, %c0_i32_0 : i32, i32
  }
  func.func @transform_10(%arg0: i32) -> (i32, i32) {
    %c0_i32 = arith.constant 0 : i32
    %c0_i32_0 = arith.constant 0 : i32
    %c0_i32_1 = arith.constant 0 : i32
    return %c0_i32, %c0_i32_0 : i32, i32
  }
  func.func @transform_11(%arg0: i32) -> (i32, i32) {
    %c0_i32 = arith.constant 0 : i32
    %c0_i32_0 = arith.constant 0 : i32
    %c0_i32_1 = arith.constant 0 : i32
    return %c0_i32, %c0_i32_0 : i32, i32
  }
  func.func @transform_12(%arg0: i32) -> (i32, i32, i32) {
    %c0_i32 = arith.constant 0 : i32
    %c0_i32_0 = arith.constant 0 : i32
    %c0_i32_1 = arith.constant 0 : i32
    return %arg0, %c0_i32, %c0_i32_0 : i32, i32, i32
  }
}

</mosaic_0001>

<bundles_post_ra>
// kernel: tpu_custom_call.1
= control target key start
LH: loop header
LB: loop body
LE: loop exit
PB: predicated region body
PF: predicated region fallthrough
CT: control target
= control target key end

     0   :  { %s3410_s0 = inlined_call_operand.hbm [shape: f32[4,8,32], index: 0, kind: input, shape index: {}]   ;;  %s3411_s1 = inlined_call_operand.hbm [shape: f32[8,8], index: 1, kind: input, shape index: {}]   ;;  %s3412_s2 = inlined_call_operand.vmem [shape: f32[1,32], index: 2, kind: input, shape index: {}]   ;;  %s3413_s3 = inlined_call_operand.vmem [shape: f32[1,32], index: 3, kind: input, shape index: {}]   ;;  %s3414_s4 = inlined_call_operand.hbm [shape: bf16[32,32], index: 4, kind: input, shape index: {}]   ;;  %s3415_s5 = inlined_call_operand.vmem [shape: bf16[32,32], index: 5, kind: input, shape index: {}]   ;;  %s3416_s6 = inlined_call_operand.hbm [shape: bf16[32,32], index: 6, kind: input, shape index: {}]   ;;  %s3417_s7 = inlined_call_operand.hbm [shape: f32[1,32], index: 7, kind: input, shape index: {}]   ;;  %s3418_s8 = inlined_call_operand.hbm [shape: f32[1,32], index: 8, kind: input, shape index: {}]   ;;  %s3419_s9 = inlined_call_operand.hbm [shape: f32[1,32], index: 9, kind: input, shape index: {}]   ;;  %s3420_s10 = inlined_call_operand.vmem [shape: bf16[32,32], index: 10, kind: input, shape index: {}]   ;;  %s3421_s11 = inlined_call_operand.vmem [shape: f32[1,32], index: 11, kind: input, shape index: {}]   ;;  %s3422_s12 = inlined_call_operand.hbm [shape: f32[4,8,32], index: 12, kind: output, shape index: {}]  }
   0x1   :  { %3429 = sst [smem:[#allocation20_spill]] %s3411_s1 }
   0x2   :  { %3430 = sst [smem:[#allocation21_spill]] %s3414_s4 }
   0x3   :  { %3431 = sst [smem:[#allocation22_spill]] %s3421_s11 }
   0x4   :  { %3432 = sst [smem:[#allocation23_spill]] %s3422_s12 }
   0x5   :  { %17 = vsyncpa [#allocation3], 0 }
   0x6   :  { %19 = vsyncpa [#allocation3 + $0x1], 0 }
   0x7   :  { %20 = vsyncpa [#allocation6], 0 }
   0x8   :  { %21 = vsyncpa [#allocation9], 0 }
   0x9   :  { %22 = vsyncpa [#allocation12], 0 }
   0xa   :  { %23 = vsyncpa [#allocation4], 0 }
   0xb   :  { %25 = vsyncpa [#allocation4 + $0x1], 0  ;;  %s2828_s21 = smov 0   ;;  %s2830_s22 = smov 0  }
   0xc   :  { %s2832_s23 = smov 0   ;;  %s2834_s24 = smov 0  }
   0xd LB: > { %s2744_s25 = smov [#allocation5]   ;;  %s2849_s27 = sadd.s32 4294967295, %s2742_s24   ;;  %s2742_s24 = sphi %s2834_s24, %s3461_s24   ;;  %s2738_s23 = sphi %s2832_s23, %s3460_s23   ;;  %s2734_s22 = sphi %s2830_s22, %s3459_s22   ;;  %s2730_s21 = sphi %s2828_s21, %s3458_s21  }
   0xe   : > { %s332_s26 = sshll.u32 %s2744_s25, 4  ;;  %p2031_p0 = scmp.ge.s32.totalorder %s2742_s24, 1  ;;  %s333_s26 = int_to_ptr.vmem [resolvable:$true] %s332_s26 }
   0xf   : > { %p3423_p1 = scmp.eq.s32.totalorder %s2849_s27, 0  ;;  %p319_p2 = scmp.lt.s32.totalorder %s2742_s24, 3 }
  0x10   : > { %s2745_s29 = smov [#allocation8]   ;;  %s2746_s14 = smov [#allocation11]  }
  0x11   : > { %p2854_p3 = pnand %p2031_p0, %p319_p2  ;;  %s364_s30 = sshll.u32 %s2745_s29, 4  ;;  %s2867_s30 = int_to_ptr.vmem [resolvable:$true] %s364_s30 }
  0x12   : > { %s389_s15 = sshll.u32 %s2746_s14, 4  ;;  %s3435_s1 = sld [smem:[#allocation20_spill]]  ;;  %s2869_s15 = int_to_ptr.vmem [resolvable:$true] %s389_s15 }
  0x13   : > { %s3433_s28 = scalar_select %p2854_p3, 1, 0 }
  0x14   : > { %p2334_p5 = pneg %p2854_p3 }
  0x16   : > { %p2863_p6 = pnand %p2334_p5, %p3423_p1 }
  0x18   : > { %s2466_s18 = scalar_lea.hbm %s3435_s1, 128  ;;  %p2879_p8 = pneg %p2863_p6 }
  0x19   : > { %p2467_p7 = scmp.ne.s32.totalorder %s3435_s1, %s2466_s18  ;;  %p2473_p11 = scmp.lt.u32.totalorder %s2466_s18, %s3435_s1 }
  0x1b   : > { %p2469_p9 = pnand %p2879_p8, %p2467_p7 }
  0x1d   : > { %p2470_p10 = pneg %p2469_p9 }
  0x1f   : > { %p2475_p12 = pnand %p2473_p11, %p2470_p10 }
  0x21   : > { %2478 = shalt.err (!%p2475_p12)
}
  0x22   : > { %s2479_s16 = scalar_lea.vmem %s333_s26, 128  ;;  %p2487_p5 = scmp.lt.s32.totalorder %s333_s26, %s333_s26 }
  0x23   : > { %p2480_p13 = scmp.ne.s32.totalorder %s333_s26, %s2479_s16  ;;  %p2488_p4 = scmp.lt.s32.totalorder %s2479_s16, %s2479_s16 }
  0x25   : > { %p2482_p0 = pnand %p2480_p13, %p2879_p8  ;;  %p2489_p1 = por %p2488_p4, %p2487_p5 }
  0x27   : > { %p2483_p2 = pneg %p2482_p0 }
  0x29   : > { %p2490_p3 = pnand %p2489_p1, %p2483_p2 }
  0x2b   : > { %2493 = shalt.err (!%p2490_p3)
}
  0x2c   : > { %2337 = dma.hbm_to_vmem [thread:$0]  (!%p2863_p6), %s3435_s1, 128, %s333_s26, [#allocation6]  }
  0x2d   : > { %s2494_s29 = scalar_lea.hbm %s3416_s6, 256 }
  0x2e   : > { %p2495_p7 = scmp.ne.s32.totalorder %s3416_s6, %s2494_s29  ;;  %p2501_p1 = scmp.lt.u32.totalorder %s2494_s29, %s3416_s6 }
  0x30   : > { %p2497_p9 = pnand %p2495_p7, %p2879_p8 }
  0x32   : > { %p2498_p4 = pneg %p2497_p9 }
  0x34   : > { %p2503_p3 = pnand %p2501_p1, %p2498_p4 }
  0x36   : > { %2506 = shalt.err (!%p2503_p3)
}
  0x37   : > { %s2507_s26 = scalar_lea.vmem %s2867_s30, 256  ;;  %p2515_p13 = scmp.lt.s32.totalorder %s2867_s30, %s2867_s30 }
  0x38   : > { %p2508_p10 = scmp.ne.s32.totalorder %s2867_s30, %s2507_s26  ;;  %p2516_p0 = scmp.lt.s32.totalorder %s2507_s26, %s2507_s26 }
  0x3a   : > { %p2510_p11 = pnand %p2508_p10, %p2879_p8  ;;  %p2517_p2 = por %p2516_p0, %p2515_p13 }
  0x3c   : > { %p2511_p12 = pneg %p2510_p11 }
  0x3e   : > { %p2518_p5 = pnand %p2517_p2, %p2511_p12 }
  0x40   : > { %2521 = shalt.err (!%p2518_p5)
}
  0x41   : > { %s3426_s12 = smov 64   ;;  %s3427_s11 = smov 4  }
  0x42   : > { %2343 = dma.hbm_to_vmem [thread:$0]  (!%p2863_p6), %s3416_s6, 256, %s2867_s30, [#allocation9], %s3426_s12, %s3426_s12, %s3427_s11  }
  0x43   : > { %s2522_s29 = scalar_lea.hbm %s3418_s8, 16 }
  0x44   : > { %p2523_p7 = scmp.ne.s32.totalorder %s3418_s8, %s2522_s29  ;;  %p2529_p1 = scmp.lt.u32.totalorder %s2522_s29, %s3418_s8 }
  0x46   : > { %p2525_p9 = pnand %p2523_p7, %p2879_p8 }
  0x48   : > { %p2526_p4 = pneg %p2525_p9 }
  0x4a   : > { %p2531_p3 = pnand %p2529_p1, %p2526_p4 }
  0x4c   : > { %2534 = shalt.err (!%p2531_p3)
}
  0x4d   : > { %s2535_s30 = scalar_lea.vmem %s2869_s15, 16  ;;  %s2542_s17 = scalar_lea.vmem %s2869_s15, 32 }
  0x4e   : > { %p2536_p10 = scmp.ne.s32.totalorder %s2869_s15, %s2535_s30  ;;  %p2543_p13 = scmp.lt.s32.totalorder %s2869_s15, %s2869_s15 }
  0x4f   : > { %p2544_p0 = scmp.lt.s32.totalorder %s2542_s17, %s2535_s30 }
  0x50   : > { %p2538_p11 = pnand %p2536_p10, %p2879_p8 }
  0x51   : > { %p2545_p2 = por %p2544_p0, %p2543_p13 }
  0x52   : > { %p2539_p12 = pneg %p2538_p11 }
  0x54   : > { %p2546_p5 = pnand %p2545_p2, %p2539_p12 }
  0x56   : > { %2549 = shalt.err (!%p2546_p5)
}
  0x57   : > { %2349 = dma.hbm_to_vmem [thread:$0]  (!%p2863_p6), %s3418_s8, 16, %s2869_s15, [#allocation12]  }
  0x58   : > { %s2749_s18 = smov [#allocation7]   ;;  %s2750_s29 = smov [#allocation10]  }
  0x59   : > { %s348_s20 = sshll.u32 %s2749_s18, 4  ;;  %s378_s14 = sshll.u32 %s2750_s29, 4  ;;  %s349_s20 = int_to_ptr.vmem [resolvable:$true] %s348_s20  ;;  %s379_s14 = int_to_ptr.vmem [resolvable:$true] %s378_s14 }
  0x5a   : > { %s3437_s4 = sld [smem:[#allocation21_spill]] }
  0x60   : > { %s2550_s30 = scalar_lea.hbm %s3437_s4, 256 }
  0x61   : > { %p2551_p7 = scmp.ne.s32.totalorder %s3437_s4, %s2550_s30  ;;  %p2557_p1 = scmp.lt.u32.totalorder %s2550_s30, %s3437_s4 }
  0x63   : > { %p2553_p9 = pnand %p2551_p7, %p2879_p8 }
  0x65   : > { %p2554_p4 = pneg %p2553_p9 }
  0x67   : > { %p2559_p3 = pnand %p2557_p1, %p2554_p4 }
  0x69   : > { %2562 = shalt.err (!%p2559_p3)
}
  0x6a   : > { %s2563_s15 = scalar_lea.vmem %s349_s20, 256  ;;  %p2571_p13 = scmp.lt.s32.totalorder %s349_s20, %s349_s20 }
  0x6b   : > { %p2564_p10 = scmp.ne.s32.totalorder %s349_s20, %s2563_s15  ;;  %p2572_p0 = scmp.lt.s32.totalorder %s2563_s15, %s2563_s15 }
  0x6d   : > { %p2566_p11 = pnand %p2564_p10, %p2879_p8  ;;  %p2573_p2 = por %p2572_p0, %p2571_p13 }
  0x6f   : > { %p2567_p12 = pneg %p2566_p11 }
  0x71   : > { %p2574_p5 = pnand %p2573_p2, %p2567_p12 }
  0x73   : > { %2577 = shalt.err (!%p2574_p5)
}
  0x74   : > { %s3438_s12 = smov 4   ;;  %s3439_s19 = smov 64  }
  0x75   : > { %2340 = dma.hbm_to_vmem [thread:$0]  (!%p2863_p6), %s3437_s4, 256, %s349_s20, [#allocation6], %s3439_s19, %s3439_s19, %s3438_s12  }
  0x76   : > { %s2578_s26 = scalar_lea.hbm %s3417_s7, 16 }
  0x77   : > { %p2579_p7 = scmp.ne.s32.totalorder %s3417_s7, %s2578_s26  ;;  %p2585_p1 = scmp.lt.u32.totalorder %s2578_s26, %s3417_s7 }
  0x79   : > { %p2581_p9 = pnand %p2579_p7, %p2879_p8 }
  0x7b   : > { %p2582_p4 = pneg %p2581_p9 }
  0x7d   : > { %p2587_p3 = pnand %p2585_p1, %p2582_p4 }
  0x7f   : > { %2590 = shalt.err (!%p2587_p3)
}
  0x80   : > { %s2591_s11 = scalar_lea.vmem %s379_s14, 16  ;;  %s2598_s20 = scalar_lea.vmem %s379_s14, 32 }
  0x81   : > { %p2592_p10 = scmp.ne.s32.totalorder %s379_s14, %s2591_s11  ;;  %p2599_p13 = scmp.lt.s32.totalorder %s379_s14, %s379_s14 }
  0x82   : > { %p2600_p0 = scmp.lt.s32.totalorder %s2598_s20, %s2591_s11 }
  0x83   : > { %p2594_p11 = pnand %p2592_p10, %p2879_p8 }
  0x84   : > { %p2601_p2 = por %p2600_p0, %p2599_p13 }
  0x85   : > { %p2595_p12 = pneg %p2594_p11 }
  0x87   : > { %p2602_p5 = pnand %p2601_p2, %p2595_p12 }
  0x89   : > { %2605 = shalt.err (!%p2602_p5)
}
  0x8a   : > { %2346 = dma.hbm_to_vmem [thread:$0]  (!%p2863_p6), %s3417_s7, 16, %s379_s14, [#allocation9]  }
  0x8b   : > { %s2751_s18 = smov [#allocation13]   ;;  %s2606_s30 = scalar_lea.hbm %s3419_s9, 16 }
  0x8c   : > { %s400_s29 = sshll.u32 %s2751_s18, 4  ;;  %p2607_p7 = scmp.ne.s32.totalorder %s3419_s9, %s2606_s30  ;;  %s401_s29 = int_to_ptr.vmem [resolvable:$true] %s400_s29 }
  0x8d   : > { %p2613_p1 = scmp.lt.u32.totalorder %s2606_s30, %s3419_s9 }
  0x8e   : > { %p2609_p9 = pnand %p2607_p7, %p2879_p8 }
  0x90   : > { %p2610_p4 = pneg %p2609_p9 }
  0x92   : > { %p2615_p3 = pnand %p2613_p1, %p2610_p4 }
  0x94   : > { %2618 = shalt.err (!%p2615_p3)
}
  0x95   : > { %s2619_s14 = scalar_lea.vmem %s401_s29, 16  ;;  %s2626_s20 = scalar_lea.vmem %s401_s29, 32 }
  0x96   : > { %p2620_p10 = scmp.ne.s32.totalorder %s401_s29, %s2619_s14  ;;  %p2627_p13 = scmp.lt.s32.totalorder %s401_s29, %s401_s29 }
  0x97   : > { %p2628_p0 = scmp.lt.s32.totalorder %s2626_s20, %s2619_s14 }
  0x98   : > { %p2622_p11 = pnand %p2620_p10, %p2879_p8 }
  0x99   : > { %p2629_p2 = por %p2628_p0, %p2627_p13 }
  0x9a   : > { %p2623_p12 = pneg %p2622_p11 }
  0x9c   : > { %p2630_p5 = pnand %p2629_p2, %p2623_p12 }
  0x9e   : > { %2633 = shalt.err (!%p2630_p5)
}
  0x9f   : > { %2352 = dma.hbm_to_vmem [thread:$0]  (!%p2863_p6), %s3419_s9, 16, %s401_s29, [#allocation12]  }
  0xa0   : > { %s2030_s25 = sadd.s32 4294967294, %s2742_s24   ;;  %s3004_s13 = sadd.s32 1, %s2742_s24  }
  0xa1   : > { %s35_s18 = ssub.s32 %s2742_s24, %s3004_s13  ;;  %s38_s16 = sadd.s32 1, %s2738_s23 }
  0xa2   : > { %p36_p8 = scmp.eq.s32.totalorder %s35_s18, 0  ;;  %p45_p7 = scmp.ne.s32.totalorder %s2738_s23, %s2734_s22 }
  0xa3   : > { %p46_p9 = scmp.eq.s32.totalorder %s2742_s24, 0  ;;  %p51_p4 = scmp.ne.s32.totalorder %s2734_s22, %s2730_s21 }
  0xa4   : > { %s3015_s26 = scalar_select %p36_p8, %s2738_s23, %s38_s16  }
  0xa5   : > { %p3017_p1 = por %p46_p9, %p45_p7  ;;  %p3441_p3 = scmp.eq.s32.totalorder %s2849_s27, 0 }
  0xa6   : > { %p306_p10 = scmp.eq.s32.totalorder %s2849_s27, 1  ;;  %p312_p11 = scmp.eq.s32.totalorder %s2030_s25, 1 }
  0xa7   : > { %p3023_p6 = por %p3441_p3, %p51_p4  ;;  %p2367_p12 = scmp.lt.s32.totalorder %s2742_s24, 2 }
  0xa8   : > { %s417_s17 = sand.u32 1, %s2738_s23   ;;  %p3030_p13 = por %p306_p10, %p45_p7 }
  0xa9   : > { %p3034_p0 = por %p312_p11, %p51_p4  ;;  %s2039_s11 = sshll.u32 %s417_s17, 4 }
  0xaa   : > { %s3443_s1 = scalar_select %p3030_p13, 1, 0 }
  0xab   : > { %s3444_s15 = scalar_select %p3034_p0, 1, 0 }
  0xac   : > { %s2101_s14 = sshll.u32 %s2742_s24, 8  ;;  %s421_s25 = scalar_lea.vmem [#allocation2], %s2039_s11 }
  0xad   : > { %s3042_s19 = scalar_lea.hbm %s3410_s0, %s2101_s14  ;;  %s428_s18 = sshll.u32 %s421_s25, 4  ;;  %s3044_s18 = int_to_ptr.vmem [resolvable:$true] %s428_s18 }
  0xae   : > { %p3048_p2 = pnand %p2367_p12, %p3017_p1  ;;  %s3052_s4 = scalar_lea.sflag [#allocation3], %s417_s17 }
  0xaf   : > { %s2634_s20 = scalar_lea.hbm %s3042_s19, 256  ;;  %s2639_s30 = scalar_lea.hbm %s3410_s0, 512 }
  0xb0   : > { %p2635_p5 = scmp.ne.s32.totalorder %s3042_s19, %s2634_s20  ;;  %p2636_p8 = pneg %p3048_p2 }
  0xb1   : > { %p2640_p4 = scmp.lt.u32.totalorder %s3042_s19, %s3410_s0  ;;  %p2641_p1 = scmp.lt.u32.totalorder %s2639_s30, %s2634_s20 }
  0xb2   : > { %p2637_p7 = pnand %p2636_p8, %p2635_p5  ;;  %p2643_p10 = scmp.lt.u32.totalorder %s2634_s20, %s3042_s19 }
  0xb3   : > { %p2642_p3 = por %p2641_p1, %p2640_p4 }
  0xb4   : > { %p2638_p9 = pneg %p2637_p7 }
  0xb5   : > { %p2644_p11 = por %p2643_p10, %p2642_p3 }
  0xb7   : > { %p2645_p12 = pnand %p2644_p11, %p2638_p9 }
  0xb9   : > { %2648 = shalt.err (!%p2645_p12)
}
  0xba   : > { %s2649_s17 = scalar_lea.vmem %s3044_s18, 256  ;;  %s2752_s11 = smov [#allocation2]  }
  0xbb   : > { %p2650_p5 = scmp.ne.s32.totalorder %s3044_s18, %s2649_s17  ;;  %s2654_s14 = sshll.u32 %s2752_s11, 4  ;;  %s2655_s14 = int_to_ptr.vmem [resolvable:$false] %s2654_s14 }
  0xbc   : > { %s2656_s12 = scalar_lea.vmem %s2655_s14, 512  ;;  %p2657_p13 = scmp.lt.s32.totalorder %s3044_s18, %s2655_s14 }
  0xbd   : > { %p2652_p7 = pnand %p2650_p5, %p2636_p8  ;;  %p2658_p4 = scmp.lt.s32.totalorder %s2656_s12, %s2649_s17 }
  0xbf   : > { %p2653_p0 = pneg %p2652_p7  ;;  %p2659_p1 = por %p2658_p4, %p2657_p13 }
  0xc1   : > { %p2660_p3 = pnand %p2659_p1, %p2653_p0 }
  0xc3   : > { %2663 = shalt.err (!%p2660_p3)
}
  0xc4   : > { %s2753_s20 = smov 128   ;;  %s2754_s30 = smov 8  }
  0xc5   : > { %2356 = dma.hbm_to_vmem [thread:$0]  (!%p3048_p2), %s3042_s19, 256, %s3044_s18, %s3052_s4, %s2753_s20, %s2753_s20, %s2754_s30  }
  0xc6   : > { %p3446_p8 = scmp.ne.s32.totalorder %s3433_s28, 0 }
  0xc7   : > { %s3083_s25 = sand.u32 (!%p3446_p8), 1, %s2734_s22  }
  0xc8   : > { %440 = sbr.rel (%p3446_p8) target bundleno = 3787 (0xecb), region = 68  ;;  %s2043_s17 = sshll.u32 (!%p3446_p8), %s3083_s25, 4 }
  0xc9   : > { %s443_s11 = scalar_lea.sflag (!%p3446_p8), [#allocation3], %s3083_s25  ;;  %s446_s14 = scalar_lea.vmem (!%p3446_p8), [#allocation2], %s2043_s17 }
  0xcf   : > { %2709 = dma.done.wait (%p3023_p6), %s443_s11, 256  }
  0xd0   : > { %2711 = vsyncadd (%p3023_p6), %s443_s11, 4294967040  ;;  %p3447_p13 = scmp.eq.s32.totalorder %s2849_s27, 0 }
  0xd2   : > { %2713 = dma.done.wait (%p3447_p13), [#allocation6], 384   ;;  %p3448_p0 = pmov %p3447_p13 }
  0xd4   : > { %2715 = vsyncadd (%p3448_p0), [#allocation6], 4294966912  ;;  %p3449_p2 = pmov %p3448_p0 }
  0xd5   : > { %p3450_p9 = pmov %p3448_p0 }
  0xd6   : > { %2717 = dma.done.wait (%p3449_p2), [#allocation9], 272  }
  0xd7   : > { %2719 = vsyncadd (%p3450_p9), [#allocation9], 4294967024  ;;  %p3451_p10 = pmov %p3448_p0 }
  0xd8   : > { %p3452_p11 = pmov %p3448_p0 }
  0xd9   : > { %2721 = dma.done.wait (%p3451_p10), [#allocation12], 32  }
  0xda   : > { %2723 = vsyncadd (%p3452_p11), [#allocation12], 4294967264  ;;  %vm516_vm0 = vcmask 261120   ;;  %v3105_v0 = vld [vmem:[%s446_s14] sm:$0xff]  ;;  %v3107_v1 = vld [vmem:[%s446_s14 + $0x8] sm:$0xff]  ;;  %v2755_v16 = vmov 0.0  }
  0xdb   : > { %v517_v2 = vsel %vm516_vm0, %v3105_v0, 0.0  ;;  %v520_v3 = vsel %vm516_vm0, %v3107_v1, 0.0  ;;  %v2424_v14 = vld [vmem:[#allocation7] sm:$0xff]   ;;  %v2425_v15 = vld [vmem:[%s3415_s5] sm:$0xff]   ;;  %2162 = vmatprep.subr.bf16.mxu0 %v2755_v16  ;;  %2170 = vmatprep.subr.bf16.mxu1 %v2755_v16  ;;  %v2426_v17 = vld [vmem:[#allocation7 + $0x8] sm:$0xff]   ;;  %vm2756_vm1 = vmmov 0  }
  0xdc   : > { %518 = vadd.xlane.f32.xlu0 %v517_v2  ;;  %2163 = vmatpush3.bf16.msra.mxu0 %v2424_v14  ;;  %v2427_v18 = vld [vmem:[%s3415_s5 + $0x8] sm:$0xff]   ;;  %v2051_v27 = vld [vmem:[%s3412_s2] ss:$0 sm:$0xff]  ;;  %v2428_v35 = vld [vmem:[#allocation8] sm:$0xff]   ;;  %vm783_vm2 = vcmask 64512   ;;  %vm903_vm3 = vcmask 1043456  }
  0xdd   : > { %2171 = vmatpush3.bf16.msra.mxu1 %v2425_v15  ;;  %2164 = vmatprep.subr.bf16.mxu0 %v2755_v16  ;;  %v2052_v31 = vld [vmem:[%s3413_s3] ss:$0 sm:$0xff]  ;;  %v2057_v38 = vld [vmem:[#allocation11] ss:$0 sm:$0xff]  ;;  %v2053_v39 = vld [vmem:[#allocation10] ss:$0 sm:$0xff] }
  0xde   : > { %2172 = vmatprep.subr.bf16.mxu1 %v2755_v16  ;;  %2166 = vmatprep.mubr.msk.bf16.mxu0 %vm2756_vm1, %v2755_v16  ;;  %v2429_v37 = vld [vmem:[#allocation8 + $0x8] sm:$0xff]   ;;  %v2061_v55 = vld [vmem:[#allocation13] ss:$0 sm:$0xff]  ;;  %s2757_s30 = smov 120   ;;  %s2758_s11 = smov 112  }
  0xdf   : > { %2174 = vmatprep.mubr.msk.bf16.mxu1 %vm2756_vm1, %v2755_v16  ;;  %s2759_s19 = smov 104   ;;  %s3453_s14 = sld [smem:[#allocation22_spill]] }
  0xe0   : > { %521 = vadd.xlane.f32.xlu0 %v520_v3  ;;  %2165 = vmatpush3.bf16.msra.mxu0 %v2426_v17  ;;  %s2112_s4 = sshll.u32 %s2849_s27, 8  ;;  %s510_s28 = scalar_lea.vmem [#allocation14], %s2043_s17 }
  0xe1   : > { %2173 = vmatpush3.bf16.msra.mxu1 %v2427_v18  ;;  %2178 = vmatprep.subr.bf16.mxu0 %v2755_v16  ;;  %s1900_s29 = sshll.u32 %s510_s28, 4  ;;  %s3454_s16 = sld [smem:[#allocation23_spill]]  ;;  %s3363_s29 = int_to_ptr.vmem [resolvable:$true] %s1900_s29 }
  0xe2   : > { %2186 = vmatprep.subr.bf16.mxu1 %v2755_v16  ;;  %s1887_s27 = scalar_lea.sflag [#allocation4], %s3083_s25  ;;  %s2664_s17 = scalar_lea.vmem %s3363_s29, 256 }
  0xe3   : > { %p2665_p6 = scmp.ne.s32.totalorder %s3363_s29, %s2664_s17  ;;  %p3455_p12 = scmp.ne.s32.totalorder %s3443_s1, 0 }
  0xe4   : > { %s2760_s20 = smov [#allocation14]  }
  0xe5   : > { %p2666_p5 = pnand %p2665_p6, %p3455_p12 }
  0xe7   : > { %s3361_s12 = scalar_lea.hbm %s3454_s16, %s2112_s4  ;;  %p2667_p7 = pneg %p2666_p5 }
 0x169   : > { %v519_v4 = vpop.xlane.xlu0 %518 }
 0x16a   : > { %v524_v5 = vmul.f32 0.03125, %v519_v4 }
 0x16c   : > { %v526_v6 = vsub.f32 %v3105_v0, %v524_v5 }
 0x16d   : > { %v522_v7 = vpop.xlane.xlu0 %521 }
 0x16e   : > { %v525_v8 = vmul.f32 0.03125, %v522_v7  ;;  %v528_v9 = vmul.f32 %v526_v6, %v526_v6 }
 0x170   : > { %v527_v10 = vsub.f32 %v3107_v1, %v525_v8  ;;  %v530_v11 = vsel %vm516_vm0, %v528_v9, 0.0  ;;  %v3182_v9 = vld [vmem:[#allocation5] sm:$0xff] }
 0x171   : > { %531 = vadd.xlane.f32.xlu1 %v530_v11 }
 0x172   : > { %v529_v12 = vmul.f32 %v527_v10, %v527_v10 }
 0x174   : > { %v533_v13 = vsel %vm516_vm0, %v529_v12, 0.0 }
 0x175   : > { %534 = vadd.xlane.f32.xlu1 %v533_v13 }
 0x1fe   : > { %v532_v19 = vpop.xlane.xlu1 %531 }
 0x1ff   : > { %v536_v20 = vmul.f32 0.03125, %v532_v19 }
 0x201   : > { %v538_v21 = vadd.f32 1e-05, %v536_v20 }
 0x202   : > { %v535_v22 = vpop.xlane.xlu1 %534 }
 0x203   : > { %2430 = vrsqrt.f32 %v538_v21  ;;  %v537_v23 = vmul.f32 0.03125, %v535_v22 }
 0x205   : > { %v539_v24 = vadd.f32 1e-05, %v537_v23 }
 0x207   : > { %2432 = vrsqrt.f32 %v539_v24 }
 0x20d   : > { %v2431_v25 = vpop.eup %2430 }
 0x20e   : > { %v542_v26 = vmul.f32 %v2431_v25, %v526_v6 }
 0x210   : > { %v551_v30 = vmul.f32 %v2051_v27, %v542_v26 }
 0x211   : > { %v2433_v28 = vpop.eup %2432 }
 0x212   : > { %v543_v29 = vmul.f32 %v2433_v28, %v527_v10  ;;  %v560_v33 = vadd.f32 %v2052_v31, %v551_v30 }
 0x214   : > { %v552_v32 = vmul.f32 %v2051_v27, %v543_v29 }
 0x216   : > { %v561_v34 = vadd.f32 %v2052_v31, %v552_v32 }
 0x218   : > { %v562_v36 = vpack.c.bf16 %v561_v34, %v560_v33 }
 0x21a   : > { %2167 = vmatmul.mubr.msk.bf16.vlgmr.msra.gmra.mrb[0].mxu0 %vm516_vm0, %v562_v36  ;;  %2175 = vmatmul.mubr.msk.bf16.vlgmr.msra.gmra.mrb[0].mxu1 %vm516_vm0, %v562_v36 }
 0x21b   : > { %2179 = vmatpush3.bf16.msra.mxu0 %v2428_v35  ;;  %2182 = vmatprep.mubr.msk.bf16.mxu0 %vm2756_vm1, %v2755_v16 }
 0x21c   : > { %2180 = vmatprep.subr.bf16.mxu0 %v2755_v16  ;;  %2188 = vmatprep.mubr.msk.bf16.mxu1 %vm2756_vm1, %v2755_v16 }
 0x21f   : > { %2181 = vmatpush3.bf16.msra.mxu0 %v2429_v37 }
 0x220   : > { %2192 = vmatprep.subr.bf16.mxu0 %v2755_v16 }
 0x222   : > { %2183 = vmatmul.mubr.msk.bf16.vlgmr.msra.gmra.mrb[4].mxu0 %vm516_vm0, %v562_v36 }
 0x223   : > { %2194 = vmatprep.mubr.msk.bf16.mxu0 %vm2756_vm1, %v2755_v16 }
 0x2ed   : > { %v623_v40 = vpop.f32.mrb[0].mxu0  ;;  %v687_v41 = vpop.f32.mrb[0].mxu1 }
 0x2ee   : > { %v688_v42 = vadd.f32 %v2057_v38, %v687_v41  ;;  %v2168_v43 = vpop.f32.mrb[1].mxu0  ;;  %v2176_v44 = vpop.f32.mrb[1].mxu1  ;;  %v624_v47 = vadd.f32 %v2053_v39, %v623_v40 }
 0x2ef   : > { %v626_v45 = vpop.f32.mrb[2].mxu0  ;;  %v690_v46 = vpop.f32.mrb[2].mxu1 }
 0x2f0   : > { %v3150_v48 = vpack.c.bf16 %v688_v42, %v688_v42  ;;  %v691_v49 = vadd.f32 %v2057_v38, %v690_v46  ;;  %v2169_v50 = vpop.f32.mrb[3].mxu0  ;;  %v2177_v51 = vpop.f32.mrb[3].mxu1  ;;  %v627_v52 = vadd.f32 %v2053_v39, %v626_v45  ;;  %v758_v56 = vmul.f32 0.35355338, %v624_v47 }
 0x2f2   : > { %v3152_v53 = vpack.c.bf16 %v691_v49, %v691_v49  ;;  %v788_v54 = vsel %vm783_vm2, %v3150_v48, 0  ;;  %v759_v59 = vmul.f32 0.35355338, %v627_v52  ;;  %v3160_v63 = vpack.c.bf16 %v758_v56, %v758_v56 }
 0x2f3   : > { %2187 = vmatpush3.bf16.xpose.msra.mxu1 %v788_v54 }
 0x2f4   : > { %v834_v57 = vsel %vm783_vm2, %v3152_v53, 0  ;;  %2198 = vmatprep.subr.bf16.mxu1 %v2755_v16  ;;  %v3164_v5 = vpack.c.bf16 %v759_v59, %v759_v59 }
 0x2f5   : > { %v751_v58 = vpop.f32.mrb[4].mxu0  ;;  %2193 = vmatpush3.bf16.xpose.msra.mxu0 %v834_v57 }
 0x2f6   : > { %v752_v60 = vadd.f32 %v2061_v55, %v751_v58  ;;  %v2184_v61 = vpop.f32.mrb[5].mxu0  ;;  %2204 = vmatprep.subr.bf16.mxu0 %v2755_v16 }
 0x2f7   : > { %v754_v62 = vpop.f32.mrb[6].mxu0 }
 0x2f8   : > { %v3162_v2 = vpack.c.bf16 %v752_v60, %v752_v60  ;;  %v755_v3 = vadd.f32 %v2061_v55, %v754_v62  ;;  %v2185_v4 = vpop.f32.mrb[7].mxu0 }
 0x2fa   : > { %v3166_v6 = vpack.c.bf16 %v755_v3, %v755_v3  ;;  %2189 = vmatmul.mubr.msk.bf16.vlgmr.msra.gmra.mrb[4].mxu1 %vm783_vm2, %v3160_v63  ;;  %v905_v7 = vsel %vm903_vm3, %v3162_v2, 0 }
 0x2fb   : > { %2199 = vmatpush3.bf16.msra.mxu1 %v905_v7  ;;  %2200 = vmatprep.mubr.msk.bf16.mxu1 %vm2756_vm1, %v2755_v16 }
 0x2fc   : > { %2195 = vmatmul.mubr.msk.bf16.vlgmr.msra.gmra.mrb[8].mxu0 %vm783_vm2, %v3164_v5  ;;  %v951_v8 = vsel %vm903_vm3, %v3166_v6, 0  ;;  %2210 = vmatprep.subr.bf16.mxu1 %v2755_v16 }
 0x2fd   : > { %2205 = vmatpush3.bf16.msra.mxu0 %v951_v8  ;;  %2206 = vmatprep.mubr.msk.bf16.mxu0 %vm2756_vm1, %v2755_v16 }
 0x2fe   : > { %2216 = vmatprep.subr.bf16.mxu0 %v2755_v16 }
 0x3cd   : > { %v824_v10 = vpop.f32.mrb[4].mxu1 }
 0x3ce   : > { %v825_v11 = vadd.f32 %v824_v10, %v3182_v9  ;;  %v2190_v12 = vpop.f32.mrb[5].mxu1 }
 0x3cf   : > { %v827_v13 = vpop.f32.mrb[6].mxu1  ;;  %v870_v14 = vpop.f32.mrb[8].mxu0 }
 0x3d0   : > { %v871_v15 = vadd.f32 %v870_v14, %v3182_v9  ;;  %v2191_v17 = vpop.f32.mrb[7].mxu1  ;;  %v2196_v18 = vpop.f32.mrb[9].mxu0  ;;  %v876_v19 = vsel %vm783_vm2, %v825_v11, -inf }
 0x3d1   : > { %877 = vmax.xlane.f32.xlu0 %v876_v19  ;;  %v873_v20 = vpop.f32.mrb[10].mxu0 }
 0x3d2   : > { %v2197_v21 = vpop.f32.mrb[11].mxu0  ;;  %v879_v22 = vsel %vm783_vm2, %v871_v15, -inf }
 0x3d3   : > { %880 = vmax.xlane.f32.xlu1 %v879_v22 }
 0x3e4   : > { %1047 = vrot.lane.b32.xlu1 %v3152_v53, %s2757_s30 }
 0x45e   : > { %v878_v23 = vpop.xlane.xlu0 %877 }
 0x45f   : > { %v882_v24 = vsub.f32 %v825_v11, %v878_v23 }
 0x460   : > { %v881_v25 = vpop.xlane.xlu1 %880 }
 0x461   : > { %v884_v26 = vmul.f32 1.442695, %v882_v24  ;;  %v883_v27 = vsub.f32 %v871_v15, %v881_v25 }
 0x463   : > { %2434 = vpow2.f32 %v884_v26  ;;  %v886_v28 = vmul.f32 1.442695, %v883_v27 }
 0x464   : > { %v1048_v33 = vpop.permute.xlu1 %1047 }
 0x465   : > { %2436 = vpow2.f32 %v886_v28  ;;  %v1053_v44 = vsel %vm783_vm2, %v1048_v33, 0 }
 0x46d   : > { %v2435_v29 = vpop.eup %2434 }
 0x46e   : > { %v888_v30 = vsel %vm783_vm2, %v2435_v29, 0.0 }
 0x46f   : > { %v2437_v31 = vpop.eup %2436  ;;  %889 = vadd.xlane.f32.xlu0 %v888_v30 }
 0x470   : > { %v891_v32 = vsel %vm783_vm2, %v2437_v31, 0.0 }
 0x471   : > { %892 = vadd.xlane.f32.xlu1 %v891_v32 }
 0x482   : > { %995 = vrot.lane.b32.xlu1 %v3160_v63, %s2757_s30 }
 0x485   : > { %997 = vrot.lane.b32.xlu0 %v3150_v48, %s2757_s30 }
 0x486   : > { %1045 = vrot.lane.b32.xlu1 %v3164_v5, %s2757_s30 }
 0x4fc   : > { %v890_v34 = vpop.xlane.xlu0 %889 }
 0x4fd   : > { %2438 = vrcp.f32 %v890_v34 }
 0x4fe   : > { %v893_v35 = vpop.xlane.xlu1 %892 }
 0x4ff   : > { %2440 = vrcp.f32 %v893_v35 }
 0x500   : > { %v998_v39 = vpop.permute.xlu0 %997 }
 0x501   : > { %v1003_v42 = vsel %vm783_vm2, %v998_v39, 0 }
 0x502   : > { %v996_v45 = vpop.permute.xlu1 %995 }
 0x506   : > { %v1046_v46 = vpop.permute.xlu1 %1045 }
 0x507   : > { %v2439_v36 = vpop.eup %2438 }
 0x508   : > { %v896_v37 = vmul.f32 %v2439_v36, %v2435_v29  ;;  %v779_v36 = vld [vmem:[%s3420_s10] sm:$0xf] }
 0x509   : > { %v2441_v38 = vpop.eup %2440  ;;  %v1278_v39 = vsel %vm903_vm3, %v779_v36, 0 }
 0x50a   : > { %v897_v40 = vmul.f32 %v2441_v38, %v2437_v31  ;;  %v898_v41 = vpack.c.bf16 %v896_v37, %v896_v37  ;;  %v780_v31 = vld [vmem:[%s3420_s10 + $0x4] sm:$0xf] }
 0x50b   : > { %v1226_v34 = vsel %vm903_vm3, %v780_v31, 0 }
 0x50c   : > { %2201 = vmatmul.mubr.msk.bf16.vlgmr.msra.gmra.mrb[8].mxu1 %vm783_vm2, %v898_v41  ;;  %v899_v43 = vpack.c.bf16 %v897_v40, %v897_v40 }
 0x50d   : > { %2211 = vmatpush3.bf16.xpose.msra.mxu1 %v1003_v42  ;;  %2212 = vmatprep.mubr.msk.bf16.mxu1 %vm2756_vm1, %v2755_v16 }
 0x50e   : > { %2207 = vmatmul.mubr.msk.bf16.vlgmr.msra.gmra.mrb[12].mxu0 %vm783_vm2, %v899_v43  ;;  %2222 = vmatprep.subr.bf16.mxu1 %v2755_v16 }
 0x50f   : > { %2217 = vmatpush3.bf16.xpose.msra.mxu0 %v1053_v44  ;;  %2218 = vmatprep.mubr.msk.bf16.mxu0 %vm2756_vm1, %v2755_v16 }
 0x510   : > { %2228 = vmatprep.subr.bf16.mxu0 %v2755_v16 }
 0x514   : > { %2213 = vmatmul.mubr.msk.bf16.vlgmr.msra.gmra.mrb[12].mxu1 %vm783_vm2, %v996_v45 }
 0x515   : > { %2224 = vmatprep.mubr.msk.bf16.mxu1 %vm2756_vm1, %v2755_v16 }
 0x516   : > { %2219 = vmatmul.mubr.msk.bf16.vlgmr.msra.gmra.mrb[16].mxu0 %vm783_vm2, %v1046_v46 }
 0x517   : > { %2230 = vmatprep.mubr.msk.bf16.mxu0 %vm2756_vm1, %v2755_v16 }
 0x5df   : > { %v3214_v47 = vpop.f32.mrb[8].mxu1 }
 0x5e0   : > { %v2202_v49 = vpop.f32.mrb[9].mxu1 }
 0x5e1   : > { %v944_v50 = vpop.f32.mrb[10].mxu1  ;;  %v3216_v51 = vpop.f32.mrb[12].mxu0 }
 0x5e2   : > { %v2109_v52 = vpack.c.bf16 %v3216_v51, %v3214_v47  ;;  %v2203_v54 = vpop.f32.mrb[11].mxu1  ;;  %v2208_v55 = vpop.f32.mrb[13].mxu0 }
 0x5e3   : > { %v990_v56 = vpop.f32.mrb[14].mxu0 }
 0x5e4   : > { %v2209_v57 = vpop.f32.mrb[15].mxu0 }
 0x5e7   : > { %v1039_v58 = vpop.f32.mrb[12].mxu1 }
 0x5e8   : > { %v1040_v59 = vadd.f32 %v1039_v58, %v3182_v9  ;;  %v2214_v60 = vpop.f32.mrb[13].mxu1 }
 0x5e9   : > { %v1042_v61 = vpop.f32.mrb[14].mxu1  ;;  %v1089_v62 = vpop.f32.mrb[16].mxu0 }
 0x5ea   : > { %v1090_v3 = vadd.f32 %v1089_v62, %v3182_v9  ;;  %v2215_v4 = vpop.f32.mrb[15].mxu1  ;;  %v2220_v7 = vpop.f32.mrb[17].mxu0  ;;  %v1095_v8 = vsel %vm783_vm2, %v1040_v59, -inf }
 0x5eb   : > { %1096 = vmax.xlane.f32.xlu0 %v1095_v8  ;;  %v1092_v10 = vpop.f32.mrb[18].mxu0 }
 0x5ec   : > { %v2221_v11 = vpop.f32.mrb[19].mxu0  ;;  %v1098_v12 = vsel %vm783_vm2, %v1090_v3, -inf }
 0x5ed   : > { %1099 = vmax.xlane.f32.xlu1 %v1098_v12 }
 0x5fe   : > { %1167 = vrot.lane.b32.xlu1 %v3166_v6, %s2757_s30 }
 0x602   : > { %1323 = vrot.lane.b32.xlu1 %v3150_v48, %s2758_s11 }
 0x606   : > { %1373 = vrot.lane.b32.xlu1 %v3152_v53, %s2758_s11 }
 0x60a   : > { %1371 = vrot.lane.b32.xlu1 %v3164_v5, %s2758_s11 }
 0x678   : > { %v1097_v13 = vpop.xlane.xlu0 %1096 }
 0x679   : > { %v1101_v14 = vsub.f32 %v1040_v59, %v1097_v13 }
 0x67a   : > { %v1100_v15 = vpop.xlane.xlu1 %1099 }
 0x67b   : > { %v1103_v17 = vmul.f32 1.442695, %v1101_v14  ;;  %v1102_v18 = vsub.f32 %v1090_v3, %v1100_v15 }
 0x67d   : > { %2442 = vpow2.f32 %v1103_v17  ;;  %v1105_v19 = vmul.f32 1.442695, %v1102_v18 }
 0x67e   : > { %v1168_v20 = vpop.permute.xlu1 %1167 }
 0x67f   : > { %2444 = vpow2.f32 %v1105_v19  ;;  %v1173_v21 = vsel %vm903_vm3, %v1168_v20, 0 }
 0x680   : > { %2229 = vmatpush3.bf16.msra.mxu0 %v1173_v21 }
 0x681   : > { %2240 = vmatprep.subr.bf16.mxu0 %v2755_v16 }
 0x682   : > { %v1324_v40 = vpop.permute.xlu1 %1323 }
 0x683   : > { %v1329_v54 = vsel %vm783_vm2, %v1324_v40, 0 }
 0x686   : > { %v1374_v41 = vpop.permute.xlu1 %1373 }
 0x687   : > { %v2443_v22 = vpop.eup %2442  ;;  %v1379_v42 = vsel %vm783_vm2, %v1374_v41, 0 }
 0x688   : > { %v1107_v23 = vsel %vm783_vm2, %v2443_v22, 0.0 }
 0x689   : > { %v2445_v24 = vpop.eup %2444  ;;  %1108 = vadd.xlane.f32.xlu0 %v1107_v23 }
 0x68a   : > { %v1110_v25 = vsel %vm783_vm2, %v2445_v24, 0.0  ;;  %v1372_v43 = vpop.permute.xlu1 %1371 }
 0x68d   : > { %1111 = vadd.xlane.f32.xlu0 %v1110_v25 }
 0x6a3   : > { %1119 = vrot.lane.b32.xlu0 %v3162_v2, %s2757_s30  ;;  %s2668_s30 = sshll.u32 %s2760_s20, 4  ;;  %s2669_s30 = int_to_ptr.vmem [resolvable:$false] %s2668_s30 }
 0x6a4   : > { %p2671_p4 = scmp.lt.s32.totalorder %s3363_s29, %s2669_s30 }
 0x6a7   : > { %1321 = vrot.lane.b32.xlu0 %v3160_v63, %s2758_s11 }
 0x716   : > { %v1109_v26 = vpop.xlane.xlu0 %1108 }
 0x717   : > { %2446 = vrcp.f32 %v1109_v26 }
 0x71a   : > { %v1112_v27 = vpop.xlane.xlu0 %1111 }
 0x71b   : > { %2448 = vrcp.f32 %v1112_v27 }
 0x71e   : > { %v1120_v28 = vpop.permute.xlu0 %1119 }
 0x71f   : > { %v1125_v29 = vsel %vm903_vm3, %v1120_v28, 0 }
 0x720   : > { %2223 = vmatpush3.bf16.msra.mxu1 %v1125_v29 }
 0x721   : > { %v2447_v30 = vpop.eup %2446  ;;  %2234 = vmatprep.subr.bf16.mxu1 %v2755_v16 }
 0x722   : > { %v1115_v32 = vmul.f32 %v2447_v30, %v2443_v22  ;;  %v1322_v58 = vpop.permute.xlu0 %1321 }
 0x724   : > { %v1117_v33 = vpack.c.bf16 %v1115_v32, %v1115_v32 }
 0x725   : > { %v2449_v35 = vpop.eup %2448 }
 0x726   : > { %v1116_v37 = vmul.f32 %v2449_v35, %v2445_v24  ;;  %2225 = vmatmul.mubr.msk.bf16.vlgmr.msra.gmra.mrb[16].mxu1 %vm783_vm2, %v1117_v33 }
 0x727   : > { %2235 = vmatpush3.bf16.msra.mxu1 %v1226_v34  ;;  %2236 = vmatprep.mubr.msk.bf16.mxu1 %vm2756_vm1, %v2755_v16 }
 0x728   : > { %v1118_v38 = vpack.c.bf16 %v1116_v37, %v1116_v37  ;;  %2246 = vmatprep.subr.bf16.mxu1 %v2755_v16 }
 0x72a   : > { %2231 = vmatmul.mubr.msk.bf16.vlgmr.msra.gmra.mrb[20].mxu0 %vm783_vm2, %v1118_v38 }
 0x72b   : > { %2241 = vmatpush3.bf16.msra.mxu0 %v1278_v39  ;;  %2242 = vmatprep.mubr.msk.bf16.mxu0 %vm2756_vm1, %v2755_v16 }
 0x72c   : > { %2252 = vmatprep.subr.bf16.mxu0 %v2755_v16 }
 0x732   : > { %2243 = vmatmul.mubr.msk.bf16.vlgmr.msra.gmra.mrb[24].mxu0 %vm783_vm2, %v2109_v52 }
 0x733   : > { %2254 = vmatprep.mubr.msk.bf16.mxu0 %vm2756_vm1, %v2755_v16 }
 0x734   : > { %2253 = vmatpush3.bf16.xpose.msra.mxu0 %v1379_v42 }
 0x735   : > { %2264 = vmatprep.subr.bf16.mxu0 %v2755_v16 }
 0x73b   : > { %2255 = vmatmul.mubr.msk.bf16.vlgmr.msra.gmra.mrb[28].mxu0 %vm783_vm2, %v1372_v43 }
 0x73c   : > { %2266 = vmatprep.mubr.msk.bf16.mxu0 %vm2756_vm1, %v2755_v16 }
 0x7f9   : > { %v1161_v44 = vpop.f32.mrb[16].mxu1 }
 0x7fa   : > { %v2226_v45 = vpop.f32.mrb[17].mxu1 }
 0x7fb   : > { %v1164_v46 = vpop.f32.mrb[18].mxu1 }
 0x7fc   : > { %v2227_v47 = vpop.f32.mrb[19].mxu1 }
 0x7fd   : > { %v1209_v49 = vpop.f32.mrb[20].mxu0 }
 0x7fe   : > { %v2108_v50 = vpack.c.bf16 %v1209_v49, %v1161_v44  ;;  %v2232_v51 = vpop.f32.mrb[21].mxu0  ;;  %v781_v49 = vld [vmem:[%s3420_s10 + $0x8] sm:$0xf] }
 0x7ff   : > { %v1212_v52 = vpop.f32.mrb[22].mxu0 }
 0x800   : > { %v2233_v55 = vpop.f32.mrb[23].mxu0  ;;  %2237 = vmatmul.mubr.msk.bf16.vlgmr.msra.gmra.mrb[20].mxu1 %vm783_vm2, %v2108_v50  ;;  %v1552_v50 = vsel %vm903_vm3, %v781_v49, 0  ;;  %v2095_v49 = vld [vmem:[%s3453_s14] ss:$0 sm:$0xff] }
 0x801   : > { %2247 = vmatpush3.bf16.xpose.msra.mxu1 %v1329_v54  ;;  %2248 = vmatprep.mubr.msk.bf16.mxu1 %vm2756_vm1, %v2755_v16 }
 0x802   : > { %2258 = vmatprep.subr.bf16.mxu1 %v2755_v16 }
 0x805   : > { %v1314_v56 = vpop.f32.mrb[24].mxu0 }
 0x806   : > { %v2244_v57 = vpop.f32.mrb[25].mxu0 }
 0x807   : > { %v1317_v59 = vpop.f32.mrb[26].mxu0 }
 0x808   : > { %v2245_v60 = vpop.f32.mrb[27].mxu0  ;;  %2249 = vmatmul.mubr.msk.bf16.vlgmr.msra.gmra.mrb[24].mxu1 %vm783_vm2, %v1322_v58 }
 0x809   : > { %2260 = vmatprep.mubr.msk.bf16.mxu1 %vm2756_vm1, %v2755_v16 }
 0x80e   : > { %v1415_v61 = vpop.f32.mrb[28].mxu0 }
 0x80f   : > { %v1416_v62 = vadd.f32 %v1415_v61, %v3182_v9  ;;  %v2256_v3 = vpop.f32.mrb[29].mxu0 }
 0x810   : > { %v1418_v4 = vpop.f32.mrb[30].mxu0 }
 0x811   : > { %v2257_v7 = vpop.f32.mrb[31].mxu0  ;;  %v1424_v8 = vsel %vm783_vm2, %v1416_v62, -inf }
 0x812   : > { %1425 = vmax.xlane.f32.xlu1 %v1424_v8 }
 0x823   : > { %1493 = vrot.lane.b32.xlu1 %v3166_v6, %s2758_s11 }
 0x827   : > { %1599 = vrot.lane.b32.xlu1 %v3150_v48, %s2759_s19 }
 0x82b   : > { %1649 = vrot.lane.b32.xlu1 %v3152_v53, %s2759_s19 }
 0x82f   : > { %1647 = vrot.lane.b32.xlu1 %v3164_v5, %s2759_s19 }
 0x89f   : > { %v1426_v10 = vpop.xlane.xlu1 %1425 }
 0x8a0   : > { %v1428_v13 = vsub.f32 %v1416_v62, %v1426_v10 }
 0x8a2   : > { %v1431_v14 = vmul.f32 1.442695, %v1428_v13 }
 0x8a3   : > { %v1494_v11 = vpop.permute.xlu1 %1493 }
 0x8a4   : > { %v1499_v12 = vsel %vm903_vm3, %v1494_v11, 0  ;;  %2450 = vpow2.f32 %v1431_v14 }
 0x8a5   : > { %2265 = vmatpush3.bf16.msra.mxu0 %v1499_v12 }
 0x8a6   : > { %2276 = vmatprep.subr.bf16.mxu0 %v2755_v16 }
 0x8a7   : > { %v1600_v35 = vpop.permute.xlu1 %1599 }
 0x8a8   : > { %v1605_v37 = vsel %vm783_vm2, %v1600_v35, 0 }
 0x8ab   : > { %v1650_v58 = vpop.permute.xlu1 %1649 }
 0x8ac   : > { %v1655_v3 = vsel %vm783_vm2, %v1650_v58, 0 }
 0x8ae   : > { %v2451_v25 = vpop.eup %2450 }
 0x8af   : > { %v1436_v26 = vsel %vm783_vm2, %v2451_v25, 0.0  ;;  %v1648_v7 = vpop.permute.xlu1 %1647 }
 0x8d3   : > { %v1262_v15 = vpop.f32.mrb[20].mxu1 }
 0x8d4   : > { %v3289_v17 = vadd.f32 %v1314_v56, %v1262_v15  ;;  %v2238_v18 = vpop.f32.mrb[21].mxu1 }
 0x8d5   : > { %v1265_v48 = vpop.f32.mrb[22].mxu1 }
 0x8d6   : > { %v3291_v19 = vadd.f32 %v1317_v59, %v1265_v48  ;;  %v2239_v53 = vpop.f32.mrb[23].mxu1 }
 0x8db   : > { %v1365_v20 = vpop.f32.mrb[24].mxu1 }
 0x8dc   : > { %v1366_v5 = vadd.f32 %v1365_v20, %v3182_v9  ;;  %v2250_v21 = vpop.f32.mrb[25].mxu1 }
 0x8dd   : > { %v1368_v22 = vpop.f32.mrb[26].mxu1 }
 0x8de   : > { %v2251_v23 = vpop.f32.mrb[27].mxu1  ;;  %v1421_v24 = vsel %vm783_vm2, %v1366_v5, -inf }
 0x8df   : > { %1422 = vmax.xlane.f32.xlu0 %v1421_v24 }
 0x8e3   : > { %1437 = vadd.xlane.f32.xlu0 %v1436_v26 }
 0x96c   : > { %v1423_v27 = vpop.xlane.xlu0 %1422 }
 0x96d   : > { %v1427_v28 = vsub.f32 %v1366_v5, %v1423_v27 }
 0x96f   : > { %v1429_v29 = vmul.f32 1.442695, %v1427_v28 }
 0x970   : > { %v1438_v30 = vpop.xlane.xlu0 %1437 }
 0x971   : > { %2452 = vpow2.f32 %v1429_v29 }
 0x972   : > { %2454 = vrcp.f32 %v1438_v30 }
 0x97b   : > { %v2453_v31 = vpop.eup %2452 }
 0x97c   : > { %v2455_v32 = vpop.eup %2454  ;;  %v1433_v33 = vsel %vm783_vm2, %v2453_v31, 0.0 }
 0x97d   : > { %v1442_v34 = vmul.f32 %v2455_v32, %v2451_v25  ;;  %1434 = vadd.xlane.f32.xlu0 %v1433_v33 }
 0x97f   : > { %v1444_v36 = vpack.c.bf16 %v1442_v34, %v1442_v34 }
 0x981   : > { %2267 = vmatmul.mubr.msk.bf16.vlgmr.msra.gmra.mrb[32].mxu0 %vm783_vm2, %v1444_v36 }
 0x982   : > { %2277 = vmatpush3.bf16.xpose.msra.mxu0 %v1605_v37  ;;  %2278 = vmatprep.mubr.msk.bf16.mxu0 %vm2756_vm1, %v2755_v16 }
 0x983   : > { %2288 = vmatprep.subr.bf16.mxu0 %v2755_v16 }
 0x993   : > { %1445 = vrot.lane.b32.xlu0 %v3162_v2, %s2758_s11  ;;  %s2670_s11 = scalar_lea.vmem %s2669_s30, 512 }
 0x994   : > { %p2672_p1 = scmp.lt.s32.totalorder %s2670_s11, %s2664_s17 }
 0x996   : > { %p2673_p3 = por %p2672_p1, %p2671_p4 }
 0x997   : > { %1597 = vrot.lane.b32.xlu0 %v3160_v63, %s2759_s19 }
 0x998   : > { %p2674_p8 = pnand %p2673_p3, %p2667_p7 }
 0xa0a   : > { %v1435_v38 = vpop.xlane.xlu0 %1434 }
 0xa0b   : > { %2456 = vrcp.f32 %v1435_v38  ;;  %v782_v38 = vld [vmem:[%s3420_s10 + $0xc] sm:$0xf] }
 0xa0e   : > { %v1446_v39 = vpop.permute.xlu0 %1445 }
 0xa0f   : > { %v1451_v40 = vsel %vm903_vm3, %v1446_v39, 0  ;;  %v1828_v39 = vsel %vm903_vm3, %v782_v38, 0 }
 0xa10   : > { %2259 = vmatpush3.bf16.msra.mxu1 %v1451_v40 }
 0xa11   : > { %2270 = vmatprep.subr.bf16.mxu1 %v2755_v16 }
 0xa12   : > { %v1598_v41 = vpop.permute.xlu0 %1597 }
 0xa13   : > { %2279 = vmatmul.mubr.msk.bf16.vlgmr.msra.gmra.mrb[36].mxu0 %vm783_vm2, %v1598_v41 }
 0xa14   : > { %2290 = vmatprep.mubr.msk.bf16.mxu0 %vm2756_vm1, %v2755_v16 }
 0xa15   : > { %v2457_v42 = vpop.eup %2456 }
 0xa16   : > { %v1441_v43 = vmul.f32 %v2457_v42, %v2453_v31 }
 0xa18   : > { %v1443_v44 = vpack.c.bf16 %v1441_v43, %v1441_v43 }
 0xa1a   : > { %2261 = vmatmul.mubr.msk.bf16.vlgmr.msra.gmra.mrb[28].mxu1 %vm783_vm2, %v1443_v44 }
 0xa1b   : > { %2272 = vmatprep.mubr.msk.bf16.mxu1 %vm2756_vm1, %v2755_v16  ;;  %2271 = vmatpush3.bf16.msra.mxu1 %v1552_v50 }
 0xa1c   : > { %2282 = vmatprep.subr.bf16.mxu1 %v2755_v16 }
 0xa54   : > { %v1535_v63 = vpop.f32.mrb[32].mxu0 }
 0xa55   : > { %v2268_v45 = vpop.f32.mrb[33].mxu0 }
 0xa56   : > { %v1538_v46 = vpop.f32.mrb[34].mxu0 }
 0xa57   : > { %v2269_v47 = vpop.f32.mrb[35].mxu0 }
 0xae6   : > { %v1641_v51 = vpop.f32.mrb[36].mxu0 }
 0xae7   : > { %v1642_v52 = vadd.f32 %v1641_v51, %v3182_v9  ;;  %v2280_v54 = vpop.f32.mrb[37].mxu0 }
 0xae8   : > { %v1644_v55 = vpop.f32.mrb[38].mxu0 }
 0xae9   : > { %v2281_v56 = vpop.f32.mrb[39].mxu0  ;;  %v1697_v57 = vsel %vm783_vm2, %v1642_v52, -inf }
 0xaea   : > { %1698 = vmax.xlane.f32.xlu0 %v1697_v57 }
 0xaed   : > { %v1487_v59 = vpop.f32.mrb[28].mxu1 }
 0xaee   : > { %v2110_v60 = vpack.c.bf16 %v1535_v63, %v1487_v59  ;;  %v2262_v61 = vpop.f32.mrb[29].mxu1 }
 0xaef   : > { %v1490_v62 = vpop.f32.mrb[30].mxu1 }
 0xaf0   : > { %v2263_v4 = vpop.f32.mrb[31].mxu1  ;;  %2273 = vmatmul.mubr.msk.bf16.vlgmr.msra.gmra.mrb[32].mxu1 %vm783_vm2, %v2110_v60 }
 0xaf1   : > { %2283 = vmatpush3.bf16.xpose.msra.mxu1 %v1655_v3  ;;  %2284 = vmatprep.mubr.msk.bf16.mxu1 %vm2756_vm1, %v2755_v16 }
 0xaf2   : > { %2294 = vmatprep.subr.bf16.mxu1 %v2755_v16 }
 0xaf8   : > { %2285 = vmatmul.mubr.msk.bf16.vlgmr.msra.gmra.mrb[36].mxu1 %vm783_vm2, %v1648_v7 }
 0xaf9   : > { %2296 = vmatprep.mubr.msk.bf16.mxu1 %vm2756_vm1, %v2755_v16 }
 0xb77   : > { %v1699_v8 = vpop.xlane.xlu0 %1698 }
 0xb78   : > { %v1703_v10 = vsub.f32 %v1642_v52, %v1699_v8 }
 0xb7a   : > { %v1705_v11 = vmul.f32 1.442695, %v1703_v10 }
 0xb7c   : > { %2458 = vpow2.f32 %v1705_v11 }
 0xb86   : > { %v2459_v12 = vpop.eup %2458 }
 0xb87   : > { %v1709_v13 = vsel %vm783_vm2, %v2459_v12, 0.0 }
 0xb88   : > { %1710 = vadd.xlane.f32.xlu0 %v1709_v13 }
 0xbc3   : > { %v1588_v14 = vpop.f32.mrb[32].mxu1 }
 0xbc4   : > { %v1595_v15 = vadd.f32 %v1588_v14, %v3289_v17  ;;  %v2274_v18 = vpop.f32.mrb[33].mxu1 }
 0xbc5   : > { %v1591_v48 = vpop.f32.mrb[34].mxu1 }
 0xbc6   : > { %v1596_v53 = vadd.f32 %v1591_v48, %v3291_v19  ;;  %v2275_v20 = vpop.f32.mrb[35].mxu1 }
 0xbcb   : > { %v1691_v5 = vpop.f32.mrb[36].mxu1 }
 0xbcc   : > { %v1692_v21 = vadd.f32 %v1691_v5, %v3182_v9  ;;  %v2286_v22 = vpop.f32.mrb[37].mxu1 }
 0xbcd   : > { %v1694_v23 = vpop.f32.mrb[38].mxu1 }
 0xbce   : > { %v2287_v24 = vpop.f32.mrb[39].mxu1  ;;  %v1700_v25 = vsel %vm783_vm2, %v1692_v21, -inf }
 0xbcf   : > { %1701 = vmax.xlane.f32.xlu1 %v1700_v25 }
 0xbe0   : > { %1769 = vrot.lane.b32.xlu1 %v3166_v6, %s2759_s19 }
 0xc15   : > { %v1711_v30 = vpop.xlane.xlu0 %1710 }
 0xc5c   : > { %v1702_v26 = vpop.xlane.xlu1 %1701 }
 0xc5d   : > { %v1704_v27 = vsub.f32 %v1692_v21, %v1702_v26 }
 0xc5f   : > { %v1707_v17 = vmul.f32 1.442695, %v1704_v27 }
 0xc60   : > { %v1770_v28 = vpop.permute.xlu1 %1769 }
 0xc61   : > { %2460 = vpow2.f32 %v1707_v17  ;;  %v1775_v19 = vsel %vm903_vm3, %v1770_v28, 0 }
 0xc62   : > { %2295 = vmatpush3.bf16.msra.mxu1 %v1775_v19  ;;  %2462 = vrcp.f32 %v1711_v30 }
 0xc6b   : > { %v2461_v29 = vpop.eup %2460 }
 0xc6c   : > { %v1712_v9 = vsel %vm783_vm2, %v2461_v29, 0.0  ;;  %v2463_v31 = vpop.eup %2462 }
 0xc6d   : > { %1713 = vadd.xlane.f32.xlu0 %v1712_v9  ;;  %v1717_v6 = vmul.f32 %v2463_v31, %v2459_v12 }
 0xc6f   : > { %v1719_v35 = vpack.c.bf16 %v1717_v6, %v1717_v6 }
 0xc83   : > { %1721 = vrot.lane.b32.xlu0 %v3162_v2, %s2759_s19 }
 0xcfa   : > { %v1714_v32 = vpop.xlane.xlu0 %1713 }
 0xcfb   : > { %2464 = vrcp.f32 %v1714_v32 }
 0xcfe   : > { %v1722_v33 = vpop.permute.xlu0 %1721 }
 0xcff   : > { %v1727_v34 = vsel %vm903_vm3, %v1722_v33, 0 }
 0xd00   : > { %2289 = vmatpush3.bf16.msra.mxu0 %v1727_v34 }
 0xd01   : > { %2300 = vmatprep.subr.bf16.mxu0 %v2755_v16 }
 0xd03   : > { %2291 = vmatmul.mubr.msk.bf16.vlgmr.msra.gmra.mrb[40].mxu0 %vm783_vm2, %v1719_v35 }
 0xd04   : > { %2302 = vmatprep.mubr.msk.bf16.mxu0 %vm2756_vm1, %v2755_v16  ;;  %2301 = vmatpush3.bf16.msra.mxu0 %v1828_v39 }
 0xd05   : > { %v2465_v36 = vpop.eup %2464 }
 0xd06   : > { %v1718_v2 = vmul.f32 %v2465_v36, %v2461_v29 }
 0xd08   : > { %v1720_v37 = vpack.c.bf16 %v1718_v2, %v1718_v2 }
 0xd0a   : > { %2297 = vmatmul.mubr.msk.bf16.vlgmr.msra.gmra.mrb[40].mxu1 %vm783_vm2, %v1720_v37 }
 0xdd6   : > { %v1763_v40 = vpop.f32.mrb[40].mxu0 }
 0xdd7   : > { %v2292_v41 = vpop.f32.mrb[41].mxu0 }
 0xdd8   : > { %v1766_v42 = vpop.f32.mrb[42].mxu0 }
 0xdd9   : > { %v2293_v43 = vpop.f32.mrb[43].mxu0 }
 0xddd   : > { %v1811_v44 = vpop.f32.mrb[40].mxu1 }
 0xdde   : > { %v2111_v16 = vpack.c.bf16 %v1811_v44, %v1763_v40  ;;  %v2298_v63 = vpop.f32.mrb[41].mxu1 }
 0xddf   : > { %v1814_v45 = vpop.f32.mrb[42].mxu1 }
 0xde0   : > { %v2299_v46 = vpop.f32.mrb[43].mxu1  ;;  %2303 = vmatmul.mubr.msk.bf16.vlgmr.msra.gmra.mrb[44].mxu0 %vm783_vm2, %v2111_v16 }
 0xeb3   : > { %v1864_v47 = vpop.f32.mrb[44].mxu0 }
 0xeb4   : > { %v1871_v50 = vadd.f32 %v1864_v47, %v1595_v15  ;;  %v2304_v51 = vpop.f32.mrb[45].mxu0 }
 0xeb5   : > { %v1867_v52 = vpop.f32.mrb[46].mxu0 }
 0xeb6   : > { %v1880_v54 = vadd.f32 %v2095_v49, %v1871_v50  ;;  %v1872_v55 = vadd.f32 %v1867_v52, %v1596_v53  ;;  %v2305_v56 = vpop.f32.mrb[47].mxu0 }
 0xeb8   : > { %v1882_v57 = vadd.f32 %v1880_v54, %v3105_v0  ;;  %v1881_v58 = vadd.f32 %v2095_v49, %v1872_v55 }
 0xeba   : > { %1884 = vst.msk [vmem:[%s510_s28] sm:$0xff] %vm516_vm0, %v1882_v57  ;;  %v1883_v59 = vadd.f32 %v1881_v58, %v3107_v1 }
 0xebc   : > { %1885 = vst.msk [vmem:[%s510_s28 + $0x8] sm:$0xff] %vm516_vm0, %v1883_v59 }
 0xebd   : > { %2677 = shalt.err (!%p2674_p8)
}
 0xebe   : > { %s2678_s14 = scalar_lea.hbm %s3361_s12, 256  ;;  %s2682_s19 = scalar_lea.hbm %s3454_s16, 512 }
 0xebf   : > { %p2679_p13 = scmp.ne.s32.totalorder %s3361_s12, %s2678_s14  ;;  %p2683_p9 = scmp.lt.u32.totalorder %s3361_s12, %s3454_s16 }
 0xec0   : > { %p2684_p10 = scmp.lt.u32.totalorder %s2682_s19, %s2678_s14  ;;  %p2686_p6 = scmp.lt.u32.totalorder %s2678_s14, %s3361_s12 }
 0xec1   : > { %p2680_p0 = pnand %p2679_p13, %p3455_p12 }
 0xec2   : > { %p2685_p11 = por %p2684_p10, %p2683_p9 }
 0xec3   : > { %p2681_p2 = pneg %p2680_p0 }
 0xec4   : > { %p2687_p5 = por %p2686_p6, %p2685_p11 }
 0xec6   : > { %p2688_p7 = pnand %p2687_p5, %p2681_p2 }
 0xec8   : > { %2691 = shalt.err (!%p2688_p7)
}
 0xec9   : > { %s2761_s17 = smov 128   ;;  %s2762_s30 = smov 8  }
 0xeca   : > { %2332 = dma.vmem_to_hbm [thread:$0]  (%p3455_p12), %s3363_s29, 256, %s3361_s12, %s1887_s27, %s2761_s17, %s2761_s17, %s2762_s30  }
 0xecb PF: > { %s1915_s11 = sand.u32 1, %s2730_s21   ;;  %p3456_p4 = scmp.ne.s32.totalorder %s3444_s15, 0 }
 0xecc   : > { %p3457_p1 = scmp.ge.s32.totalorder %s2742_s24, 2  ;;  %s1916_s14 = scalar_lea.sflag [#allocation4], %s1915_s11 }
 0xece   : > { %p2358_p3 = pnand %p3457_p1, %p3456_p4 }
 0xed0   : > { %2725 = dma.done.wait (!%p2358_p3), %s1916_s14, 256  }
 0xed1   : > { %2727 = vsyncadd (!%p2358_p3), %s1916_s14, 4294967040  ;;  %p28_p8 = scmp.ge.s32.totalorder %s3004_s13, 4   ;;  %s3458_s21 = smov %s2734_s22 }
 0xed2   : > { %s3459_s22 = smov %s2738_s23  ;;  %s3460_s23 = smov %s3015_s26 }
 0xed3   : > { %s3461_s24 = smov %s3004_s13  ;;  %30 = sbr.rel (!%p28_p8) target bundleno = 13 (0xd), region = 137 }
 0xeda   :  { %1921 = vsyncpa [#allocation3], 1 }
 0xedb   :  { %1923 = vsyncpa [#allocation3 + $0x1], 1 }
 0xedc   :  { %1924 = vsyncpa [#allocation6], 1 }
 0xedd   :  { %1925 = vsyncpa [#allocation9], 1 }
 0xede   :  { %1926 = vsyncpa [#allocation12], 1 }
 0xedf   :  { %1927 = vsyncpa [#allocation4], 1 }
 0xee0   :  { %1929 = vsyncpa [#allocation4 + $0x1], 1 }

// kernel: tpu_custom_call.1
= control target key start
LH: loop header
LB: loop body
LE: loop exit
PB: predicated region body
PF: predicated region fallthrough
CT: control target
= control target key end

     0   :  { %s3410_s0 = inlined_call_operand.hbm [shape: f32[4,8,32], index: 0, kind: input, shape index: {}]   ;;  %s3411_s1 = inlined_call_operand.hbm [shape: f32[8,8], index: 1, kind: input, shape index: {}]   ;;  %s3412_s2 = inlined_call_operand.vmem [shape: f32[1,32], index: 2, kind: input, shape index: {}]   ;;  %s3413_s3 = inlined_call_operand.vmem [shape: f32[1,32], index: 3, kind: input, shape index: {}]   ;;  %s3414_s4 = inlined_call_operand.hbm [shape: bf16[32,32], index: 4, kind: input, shape index: {}]   ;;  %s3415_s5 = inlined_call_operand.vmem [shape: bf16[32,32], index: 5, kind: input, shape index: {}]   ;;  %s3416_s6 = inlined_call_operand.hbm [shape: bf16[32,32], index: 6, kind: input, shape index: {}]   ;;  %s3417_s7 = inlined_call_operand.hbm [shape: f32[1,32], index: 7, kind: input, shape index: {}]   ;;  %s3418_s8 = inlined_call_operand.hbm [shape: f32[1,32], index: 8, kind: input, shape index: {}]   ;;  %s3419_s9 = inlined_call_operand.hbm [shape: f32[1,32], index: 9, kind: input, shape index: {}]   ;;  %s3420_s10 = inlined_call_operand.vmem [shape: bf16[32,32], index: 10, kind: input, shape index: {}]   ;;  %s3421_s11 = inlined_call_operand.vmem [shape: f32[1,32], index: 11, kind: input, shape index: {}]   ;;  %s3422_s12 = inlined_call_operand.hbm [shape: f32[4,8,32], index: 12, kind: output, shape index: {}]  }
   0x1   :  { %3429 = sst [smem:[#allocation20_spill]] %s3411_s1 }
   0x2   :  { %3430 = sst [smem:[#allocation21_spill]] %s3414_s4 }
   0x3   :  { %3431 = sst [smem:[#allocation22_spill]] %s3421_s11 }
   0x4   :  { %3432 = sst [smem:[#allocation23_spill]] %s3422_s12 }
   0x5   :  { %17 = vsyncpa [#allocation3], 0 }
   0x6   :  { %19 = vsyncpa [#allocation3 + $0x1], 0 }
   0x7   :  { %20 = vsyncpa [#allocation6], 0 }
   0x8   :  { %21 = vsyncpa [#allocation9], 0 }
   0x9   :  { %22 = vsyncpa [#allocation12], 0 }
   0xa   :  { %23 = vsyncpa [#allocation4], 0 }
   0xb   :  { %25 = vsyncpa [#allocation4 + $0x1], 0  ;;  %s2828_s21 = smov 0   ;;  %s2830_s22 = smov 0  }
   0xc   :  { %s2832_s23 = smov 0   ;;  %s2834_s24 = smov 0  }
   0xd LB: > { %s2744_s25 = smov [#allocation5]   ;;  %s2849_s27 = sadd.s32 4294967295, %s2742_s24   ;;  %s2742_s24 = sphi %s2834_s24, %s3461_s24   ;;  %s2738_s23 = sphi %s2832_s23, %s3460_s23   ;;  %s2734_s22 = sphi %s2830_s22, %s3459_s22   ;;  %s2730_s21 = sphi %s2828_s21, %s3458_s21  }
   0xe   : > { %s332_s26 = sshll.u32 %s2744_s25, 4  ;;  %p2031_p0 = scmp.ge.s32.totalorder %s2742_s24, 1  ;;  %s333_s26 = int_to_ptr.vmem [resolvable:$true] %s332_s26 }
   0xf   : > { %p3423_p1 = scmp.eq.s32.totalorder %s2849_s27, 0  ;;  %p319_p2 = scmp.lt.s32.totalorder %s2742_s24, 3 }
  0x10   : > { %s2745_s29 = smov [#allocation8]   ;;  %s2746_s14 = smov [#allocation11]  }
  0x11   : > { %p2854_p3 = pnand %p2031_p0, %p319_p2  ;;  %s364_s30 = sshll.u32 %s2745_s29, 4  ;;  %s2867_s30 = int_to_ptr.vmem [resolvable:$true] %s364_s30 }
  0x12   : > { %s389_s15 = sshll.u32 %s2746_s14, 4  ;;  %s3435_s1 = sld [smem:[#allocation20_spill]]  ;;  %s2869_s15 = int_to_ptr.vmem [resolvable:$true] %s389_s15 }
  0x13   : > { %s3433_s28 = scalar_select %p2854_p3, 1, 0 }
  0x14   : > { %p2334_p5 = pneg %p2854_p3 }
  0x16   : > { %p2863_p6 = pnand %p2334_p5, %p3423_p1 }
  0x18   : > { %s2466_s18 = scalar_lea.hbm %s3435_s1, 128  ;;  %p2879_p8 = pneg %p2863_p6 }
  0x19   : > { %p2467_p7 = scmp.ne.s32.totalorder %s3435_s1, %s2466_s18  ;;  %p2473_p11 = scmp.lt.u32.totalorder %s2466_s18, %s3435_s1 }
  0x1b   : > { %p2469_p9 = pnand %p2879_p8, %p2467_p7 }
  0x1d   : > { %p2470_p10 = pneg %p2469_p9 }
  0x1f   : > { %p2475_p12 = pnand %p2473_p11, %p2470_p10 }
  0x21   : > { %2478 = shalt.err (!%p2475_p12)
}
  0x22   : > { %s2479_s16 = scalar_lea.vmem %s333_s26, 128  ;;  %p2487_p5 = scmp.lt.s32.totalorder %s333_s26, %s333_s26 }
  0x23   : > { %p2480_p13 = scmp.ne.s32.totalorder %s333_s26, %s2479_s16  ;;  %p2488_p4 = scmp.lt.s32.totalorder %s2479_s16, %s2479_s16 }
  0x25   : > { %p2482_p0 = pnand %p2480_p13, %p2879_p8  ;;  %p2489_p1 = por %p2488_p4, %p2487_p5 }
  0x27   : > { %p2483_p2 = pneg %p2482_p0 }
  0x29   : > { %p2490_p3 = pnand %p2489_p1, %p2483_p2 }
  0x2b   : > { %2493 = shalt.err (!%p2490_p3)
}
  0x2c   : > { %2337 = dma.hbm_to_vmem [thread:$0]  (!%p2863_p6), %s3435_s1, 128, %s333_s26, [#allocation6]  }
  0x2d   : > { %s2494_s29 = scalar_lea.hbm %s3416_s6, 256 }
  0x2e   : > { %p2495_p7 = scmp.ne.s32.totalorder %s3416_s6, %s2494_s29  ;;  %p2501_p1 = scmp.lt.u32.totalorder %s2494_s29, %s3416_s6 }
  0x30   : > { %p2497_p9 = pnand %p2495_p7, %p2879_p8 }
  0x32   : > { %p2498_p4 = pneg %p2497_p9 }
  0x34   : > { %p2503_p3 = pnand %p2501_p1, %p2498_p4 }
  0x36   : > { %2506 = shalt.err (!%p2503_p3)
}
  0x37   : > { %s2507_s26 = scalar_lea.vmem %s2867_s30, 256  ;;  %p2515_p13 = scmp.lt.s32.totalorder %s2867_s30, %s2867_s30 }
  0x38   : > { %p2508_p10 = scmp.ne.s32.totalorder %s2867_s30, %s2507_s26  ;;  %p2516_p0 = scmp.lt.s32.totalorder %s2507_s26, %s2507_s26 }
  0x3a   : > { %p2510_p11 = pnand %p2508_p10, %p2879_p8  ;;  %p2517_p2 = por %p2516_p0, %p2515_p13 }
  0x3c   : > { %p2511_p12 = pneg %p2510_p11 }
  0x3e   : > { %p2518_p5 = pnand %p2517_p2, %p2511_p12 }
  0x40   : > { %2521 = shalt.err (!%p2518_p5)
}
  0x41   : > { %s3426_s12 = smov 64   ;;  %s3427_s11 = smov 4  }
  0x42   : > { %2343 = dma.hbm_to_vmem [thread:$0]  (!%p2863_p6), %s3416_s6, 256, %s2867_s30, [#allocation9], %s3426_s12, %s3426_s12, %s3427_s11  }
  0x43   : > { %s2522_s29 = scalar_lea.hbm %s3418_s8, 16 }
  0x44   : > { %p2523_p7 = scmp.ne.s32.totalorder %s3418_s8, %s2522_s29  ;;  %p2529_p1 = scmp.lt.u32.totalorder %s2522_s29, %s3418_s8 }
  0x46   : > { %p2525_p9 = pnand %p2523_p7, %p2879_p8 }
  0x48   : > { %p2526_p4 = pneg %p2525_p9 }
  0x4a   : > { %p2531_p3 = pnand %p2529_p1, %p2526_p4 }
  0x4c   : > { %2534 = shalt.err (!%p2531_p3)
}
  0x4d   : > { %s2535_s30 = scalar_lea.vmem %s2869_s15, 16  ;;  %s2542_s17 = scalar_lea.vmem %s2869_s15, 32 }
  0x4e   : > { %p2536_p10 = scmp.ne.s32.totalorder %s2869_s15, %s2535_s30  ;;  %p2543_p13 = scmp.lt.s32.totalorder %s2869_s15, %s2869_s15 }
  0x4f   : > { %p2544_p0 = scmp.lt.s32.totalorder %s2542_s17, %s2535_s30 }
  0x50   : > { %p2538_p11 = pnand %p2536_p10, %p2879_p8 }
  0x51   : > { %p2545_p2 = por %p2544_p0, %p2543_p13 }
  0x52   : > { %p2539_p12 = pneg %p2538_p11 }
  0x54   : > { %p2546_p5 = pnand %p2545_p2, %p2539_p12 }
  0x56   : > { %2549 = shalt.err (!%p2546_p5)
}
  0x57   : > { %2349 = dma.hbm_to_vmem [thread:$0]  (!%p2863_p6), %s3418_s8, 16, %s2869_s15, [#allocation12]  }
  0x58   : > { %s2749_s18 = smov [#allocation7]   ;;  %s2750_s29 = smov [#allocation10]  }
  0x59   : > { %s348_s20 = sshll.u32 %s2749_s18, 4  ;;  %s378_s14 = sshll.u32 %s2750_s29, 4  ;;  %s349_s20 = int_to_ptr.vmem [resolvable:$true] %s348_s20  ;;  %s379_s14 = int_to_ptr.vmem [resolvable:$true] %s378_s14 }
  0x5a   : > { %s3437_s4 = sld [smem:[#allocation21_spill]] }
  0x60   : > { %s2550_s30 = scalar_lea.hbm %s3437_s4, 256 }
  0x61   : > { %p2551_p7 = scmp.ne.s32.totalorder %s3437_s4, %s2550_s30  ;;  %p2557_p1 = scmp.lt.u32.totalorder %s2550_s30, %s3437_s4 }
  0x63   : > { %p2553_p9 = pnand %p2551_p7, %p2879_p8 }
  0x65   : > { %p2554_p4 = pneg %p2553_p9 }
  0x67   : > { %p2559_p3 = pnand %p2557_p1, %p2554_p4 }
  0x69   : > { %2562 = shalt.err (!%p2559_p3)
}
  0x6a   : > { %s2563_s15 = scalar_lea.vmem %s349_s20, 256  ;;  %p2571_p13 = scmp.lt.s32.totalorder %s349_s20, %s349_s20 }
  0x6b   : > { %p2564_p10 = scmp.ne.s32.totalorder %s349_s20, %s2563_s15  ;;  %p2572_p0 = scmp.lt.s32.totalorder %s2563_s15, %s2563_s15 }
  0x6d   : > { %p2566_p11 = pnand %p2564_p10, %p2879_p8  ;;  %p2573_p2 = por %p2572_p0, %p2571_p13 }
  0x6f   : > { %p2567_p12 = pneg %p2566_p11 }
  0x71   : > { %p2574_p5 = pnand %p2573_p2, %p2567_p12 }
  0x73   : > { %2577 = shalt.err (!%p2574_p5)
}
  0x74   : > { %s3438_s12 = smov 4   ;;  %s3439_s19 = smov 64  }
  0x75   : > { %2340 = dma.hbm_to_vmem [thread:$0]  (!%p2863_p6), %s3437_s4, 256, %s349_s20, [#allocation6], %s3439_s19, %s3439_s19, %s3438_s12  }
  0x76   : > { %s2578_s26 = scalar_lea.hbm %s3417_s7, 16 }
  0x77   : > { %p2579_p7 = scmp.ne.s32.totalorder %s3417_s7, %s2578_s26  ;;  %p2585_p1 = scmp.lt.u32.totalorder %s2578_s26, %s3417_s7 }
  0x79   : > { %p2581_p9 = pnand %p2579_p7, %p2879_p8 }
  0x7b   : > { %p2582_p4 = pneg %p2581_p9 }
  0x7d   : > { %p2587_p3 = pnand %p2585_p1, %p2582_p4 }
  0x7f   : > { %2590 = shalt.err (!%p2587_p3)
}
  0x80   : > { %s2591_s11 = scalar_lea.vmem %s379_s14, 16  ;;  %s2598_s20 = scalar_lea.vmem %s379_s14, 32 }
  0x81   : > { %p2592_p10 = scmp.ne.s32.totalorder %s379_s14, %s2591_s11  ;;  %p2599_p13 = scmp.lt.s32.totalorder %s379_s14, %s379_s14 }
  0x82   : > { %p2600_p0 = scmp.lt.s32.totalorder %s2598_s20, %s2591_s11 }
  0x83   : > { %p2594_p11 = pnand %p2592_p10, %p2879_p8 }
  0x84   : > { %p2601_p2 = por %p2600_p0, %p2599_p13 }
  0x85   : > { %p2595_p12 = pneg %p2594_p11 }
  0x87   : > { %p2602_p5 = pnand %p2601_p2, %p2595_p12 }
  0x89   : > { %2605 = shalt.err (!%p2602_p5)
}
  0x8a   : > { %2346 = dma.hbm_to_vmem [thread:$0]  (!%p2863_p6), %s3417_s7, 16, %s379_s14, [#allocation9]  }
  0x8b   : > { %s2751_s18 = smov [#allocation13]   ;;  %s2606_s30 = scalar_lea.hbm %s3419_s9, 16 }
  0x8c   : > { %s400_s29 = sshll.u32 %s2751_s18, 4  ;;  %p2607_p7 = scmp.ne.s32.totalorder %s3419_s9, %s2606_s30  ;;  %s401_s29 = int_to_ptr.vmem [resolvable:$true] %s400_s29 }
  0x8d   : > { %p2613_p1 = scmp.lt.u32.totalorder %s2606_s30, %s3419_s9 }
  0x8e   : > { %p2609_p9 = pnand %p2607_p7, %p2879_p8 }
  0x90   : > { %p2610_p4 = pneg %p2609_p9 }
  0x92   : > { %p2615_p3 = pnand %p2613_p1, %p2610_p4 }
  0x94   : > { %2618 = shalt.err (!%p2615_p3)
}
  0x95   : > { %s2619_s14 = scalar_lea.vmem %s401_s29, 16  ;;  %s2626_s20 = scalar_lea.vmem %s401_s29, 32 }
  0x96   : > { %p2620_p10 = scmp.ne.s32.totalorder %s401_s29, %s2619_s14  ;;  %p2627_p13 = scmp.lt.s32.totalorder %s401_s29, %s401_s29 }
  0x97   : > { %p2628_p0 = scmp.lt.s32.totalorder %s2626_s20, %s2619_s14 }
  0x98   : > { %p2622_p11 = pnand %p2620_p10, %p2879_p8 }
  0x99   : > { %p2629_p2 = por %p2628_p0, %p2627_p13 }
  0x9a   : > { %p2623_p12 = pneg %p2622_p11 }
  0x9c   : > { %p2630_p5 = pnand %p2629_p2, %p2623_p12 }
  0x9e   : > { %2633 = shalt.err (!%p2630_p5)
}
  0x9f   : > { %2352 = dma.hbm_to_vmem [thread:$0]  (!%p2863_p6), %s3419_s9, 16, %s401_s29, [#allocation12]  }
  0xa0   : > { %s2030_s25 = sadd.s32 4294967294, %s2742_s24   ;;  %s3004_s13 = sadd.s32 1, %s2742_s24  }
  0xa1   : > { %s35_s18 = ssub.s32 %s2742_s24, %s3004_s13  ;;  %s38_s16 = sadd.s32 1, %s2738_s23 }
  0xa2   : > { %p36_p8 = scmp.eq.s32.totalorder %s35_s18, 0  ;;  %p45_p7 = scmp.ne.s32.totalorder %s2738_s23, %s2734_s22 }
  0xa3   : > { %p46_p9 = scmp.eq.s32.totalorder %s2742_s24, 0  ;;  %p51_p4 = scmp.ne.s32.totalorder %s2734_s22, %s2730_s21 }
  0xa4   : > { %s3015_s26 = scalar_select %p36_p8, %s2738_s23, %s38_s16  }
  0xa5   : > { %p3017_p1 = por %p46_p9, %p45_p7  ;;  %p3441_p3 = scmp.eq.s32.totalorder %s2849_s27, 0 }
  0xa6   : > { %p306_p10 = scmp.eq.s32.totalorder %s2849_s27, 1  ;;  %p312_p11 = scmp.eq.s32.totalorder %s2030_s25, 1 }
  0xa7   : > { %p3023_p6 = por %p3441_p3, %p51_p4  ;;  %p2367_p12 = scmp.lt.s32.totalorder %s2742_s24, 2 }
  0xa8   : > { %s417_s17 = sand.u32 1, %s2738_s23   ;;  %p3030_p13 = por %p306_p10, %p45_p7 }
  0xa9   : > { %p3034_p0 = por %p312_p11, %p51_p4  ;;  %s2039_s11 = sshll.u32 %s417_s17, 4 }
  0xaa   : > { %s3443_s1 = scalar_select %p3030_p13, 1, 0 }
  0xab   : > { %s3444_s15 = scalar_select %p3034_p0, 1, 0 }
  0xac   : > { %s2101_s14 = sshll.u32 %s2742_s24, 8  ;;  %s421_s25 = scalar_lea.vmem [#allocation2], %s2039_s11 }
  0xad   : > { %s3042_s19 = scalar_lea.hbm %s3410_s0, %s2101_s14  ;;  %s428_s18 = sshll.u32 %s421_s25, 4  ;;  %s3044_s18 = int_to_ptr.vmem [resolvable:$true] %s428_s18 }
  0xae   : > { %p3048_p2 = pnand %p2367_p12, %p3017_p1  ;;  %s3052_s4 = scalar_lea.sflag [#allocation3], %s417_s17 }
  0xaf   : > { %s2634_s20 = scalar_lea.hbm %s3042_s19, 256  ;;  %s2639_s30 = scalar_lea.hbm %s3410_s0, 512 }
  0xb0   : > { %p2635_p5 = scmp.ne.s32.totalorder %s3042_s19, %s2634_s20  ;;  %p2636_p8 = pneg %p3048_p2 }
  0xb1   : > { %p2640_p4 = scmp.lt.u32.totalorder %s3042_s19, %s3410_s0  ;;  %p2641_p1 = scmp.lt.u32.totalorder %s2639_s30, %s2634_s20 }
  0xb2   : > { %p2637_p7 = pnand %p2636_p8, %p2635_p5  ;;  %p2643_p10 = scmp.lt.u32.totalorder %s2634_s20, %s3042_s19 }
  0xb3   : > { %p2642_p3 = por %p2641_p1, %p2640_p4 }
  0xb4   : > { %p2638_p9 = pneg %p2637_p7 }
  0xb5   : > { %p2644_p11 = por %p2643_p10, %p2642_p3 }
  0xb7   : > { %p2645_p12 = pnand %p2644_p11, %p2638_p9 }
  0xb9   : > { %2648 = shalt.err (!%p2645_p12)
}
  0xba   : > { %s2649_s17 = scalar_lea.vmem %s3044_s18, 256  ;;  %s2752_s11 = smov [#allocation2]  }
  0xbb   : > { %p2650_p5 = scmp.ne.s32.totalorder %s3044_s18, %s2649_s17  ;;  %s2654_s14 = sshll.u32 %s2752_s11, 4  ;;  %s2655_s14 = int_to_ptr.vmem [resolvable:$false] %s2654_s14 }
  0xbc   : > { %s2656_s12 = scalar_lea.vmem %s2655_s14, 512  ;;  %p2657_p13 = scmp.lt.s32.totalorder %s3044_s18, %s2655_s14 }
  0xbd   : > { %p2652_p7 = pnand %p2650_p5, %p2636_p8  ;;  %p2658_p4 = scmp.lt.s32.totalorder %s2656_s12, %s2649_s17 }
  0xbf   : > { %p2653_p0 = pneg %p2652_p7  ;;  %p2659_p1 = por %p2658_p4, %p2657_p13 }
  0xc1   : > { %p2660_p3 = pnand %p2659_p1, %p2653_p0 }
  0xc3   : > { %2663 = shalt.err (!%p2660_p3)
}
  0xc4   : > { %s2753_s20 = smov 128   ;;  %s2754_s30 = smov 8  }
  0xc5   : > { %2356 = dma.hbm_to_vmem [thread:$0]  (!%p3048_p2), %s3042_s19, 256, %s3044_s18, %s3052_s4, %s2753_s20, %s2753_s20, %s2754_s30  }
  0xc6   : > { %p3446_p8 = scmp.ne.s32.totalorder %s3433_s28, 0 }
  0xc7   : > { %s3083_s25 = sand.u32 (!%p3446_p8), 1, %s2734_s22  }
  0xc8   : > { %440 = sbr.rel (%p3446_p8) target bundleno = 3787 (0xecb), region = 68  ;;  %s2043_s17 = sshll.u32 (!%p3446_p8), %s3083_s25, 4 }
  0xc9   : > { %s443_s11 = scalar_lea.sflag (!%p3446_p8), [#allocation3], %s3083_s25  ;;  %s446_s14 = scalar_lea.vmem (!%p3446_p8), [#allocation2], %s2043_s17 }
  0xcf   : > { %2709 = dma.done.wait (%p3023_p6), %s443_s11, 256  }
  0xd0   : > { %2711 = vsyncadd (%p3023_p6), %s443_s11, 4294967040  ;;  %p3447_p13 = scmp.eq.s32.totalorder %s2849_s27, 0 }
  0xd2   : > { %2713 = dma.done.wait (%p3447_p13), [#allocation6], 384   ;;  %p3448_p0 = pmov %p3447_p13 }
  0xd4   : > { %2715 = vsyncadd (%p3448_p0), [#allocation6], 4294966912  ;;  %p3449_p2 = pmov %p3448_p0 }
  0xd5   : > { %p3450_p9 = pmov %p3448_p0 }
  0xd6   : > { %2717 = dma.done.wait (%p3449_p2), [#allocation9], 272  }
  0xd7   : > { %2719 = vsyncadd (%p3450_p9), [#allocation9], 4294967024  ;;  %p3451_p10 = pmov %p3448_p0 }
  0xd8   : > { %p3452_p11 = pmov %p3448_p0 }
  0xd9   : > { %2721 = dma.done.wait (%p3451_p10), [#allocation12], 32  }
  0xda   : > { %2723 = vsyncadd (%p3452_p11), [#allocation12], 4294967264  ;;  %vm516_vm0 = vcmask 261120   ;;  %v3105_v0 = vld [vmem:[%s446_s14] sm:$0xff]  ;;  %v3107_v1 = vld [vmem:[%s446_s14 + $0x8] sm:$0xff]  ;;  %v2755_v16 = vmov 0.0  }
  0xdb   : > { %v517_v2 = vsel %vm516_vm0, %v3105_v0, 0.0  ;;  %v520_v3 = vsel %vm516_vm0, %v3107_v1, 0.0  ;;  %v2424_v14 = vld [vmem:[#allocation7] sm:$0xff]   ;;  %v2425_v15 = vld [vmem:[%s3415_s5] sm:$0xff]   ;;  %2162 = vmatprep.subr.bf16.mxu0 %v2755_v16  ;;  %2170 = vmatprep.subr.bf16.mxu1 %v2755_v16  ;;  %v2426_v17 = vld [vmem:[#allocation7 + $0x8] sm:$0xff]   ;;  %vm2756_vm1 = vmmov 0  }
  0xdc   : > { %518 = vadd.xlane.f32.xlu0 %v517_v2  ;;  %2163 = vmatpush3.bf16.msra.mxu0 %v2424_v14  ;;  %v2427_v18 = vld [vmem:[%s3415_s5 + $0x8] sm:$0xff]   ;;  %v2051_v27 = vld [vmem:[%s3412_s2] ss:$0 sm:$0xff]  ;;  %v2428_v35 = vld [vmem:[#allocation8] sm:$0xff]   ;;  %vm783_vm2 = vcmask 64512   ;;  %vm903_vm3 = vcmask 1043456  }
  0xdd   : > { %2171 = vmatpush3.bf16.msra.mxu1 %v2425_v15  ;;  %2164 = vmatprep.subr.bf16.mxu0 %v2755_v16  ;;  %v2052_v31 = vld [vmem:[%s3413_s3] ss:$0 sm:$0xff]  ;;  %v2057_v38 = vld [vmem:[#allocation11] ss:$0 sm:$0xff]  ;;  %v2053_v39 = vld [vmem:[#allocation10] ss:$0 sm:$0xff] }
  0xde   : > { %2172 = vmatprep.subr.bf16.mxu1 %v2755_v16  ;;  %2166 = vmatprep.mubr.msk.bf16.mxu0 %vm2756_vm1, %v2755_v16  ;;  %v2429_v37 = vld [vmem:[#allocation8 + $0x8] sm:$0xff]   ;;  %v2061_v55 = vld [vmem:[#allocation13] ss:$0 sm:$0xff]  ;;  %s2757_s30 = smov 120   ;;  %s2758_s11 = smov 112  }
  0xdf   : > { %2174 = vmatprep.mubr.msk.bf16.mxu1 %vm2756_vm1, %v2755_v16  ;;  %s2759_s19 = smov 104   ;;  %s3453_s14 = sld [smem:[#allocation22_spill]] }
  0xe0   : > { %521 = vadd.xlane.f32.xlu0 %v520_v3  ;;  %2165 = vmatpush3.bf16.msra.mxu0 %v2426_v17  ;;  %s2112_s4 = sshll.u32 %s2849_s27, 8  ;;  %s510_s28 = scalar_lea.vmem [#allocation14], %s2043_s17 }
  0xe1   : > { %2173 = vmatpush3.bf16.msra.mxu1 %v2427_v18  ;;  %2178 = vmatprep.subr.bf16.mxu0 %v2755_v16  ;;  %s1900_s29 = sshll.u32 %s510_s28, 4  ;;  %s3454_s16 = sld [smem:[#allocation23_spill]]  ;;  %s3363_s29 = int_to_ptr.vmem [resolvable:$true] %s1900_s29 }
  0xe2   : > { %2186 = vmatprep.subr.bf16.mxu1 %v2755_v16  ;;  %s1887_s27 = scalar_lea.sflag [#allocation4], %s3083_s25  ;;  %s2664_s17 = scalar_lea.vmem %s3363_s29, 256 }
  0xe3   : > { %p2665_p6 = scmp.ne.s32.totalorder %s3363_s29, %s2664_s17  ;;  %p3455_p12 = scmp.ne.s32.totalorder %s3443_s1, 0 }
  0xe4   : > { %s2760_s20 = smov [#allocation14]  }
  0xe5   : > { %p2666_p5 = pnand %p2665_p6, %p3455_p12 }
  0xe7   : > { %s3361_s12 = scalar_lea.hbm %s3454_s16, %s2112_s4  ;;  %p2667_p7 = pneg %p2666_p5 }
 0x169   : > { %v519_v4 = vpop.xlane.xlu0 %518 }
 0x16a   : > { %v524_v5 = vmul.f32 0.03125, %v519_v4 }
 0x16c   : > { %v526_v6 = vsub.f32 %v3105_v0, %v524_v5 }
 0x16d   : > { %v522_v7 = vpop.xlane.xlu0 %521 }
 0x16e   : > { %v525_v8 = vmul.f32 0.03125, %v522_v7  ;;  %v528_v9 = vmul.f32 %v526_v6, %v526_v6 }
 0x170   : > { %v527_v10 = vsub.f32 %v3107_v1, %v525_v8  ;;  %v530_v11 = vsel %vm516_vm0, %v528_v9, 0.0  ;;  %v3182_v9 = vld [vmem:[#allocation5] sm:$0xff] }
 0x171   : > { %531 = vadd.xlane.f32.xlu1 %v530_v11 }
 0x172   : > { %v529_v12 = vmul.f32 %v527_v10, %v527_v10 }
 0x174   : > { %v533_v13 = vsel %vm516_vm0, %v529_v12, 0.0 }
 0x175   : > { %534 = vadd.xlane.f32.xlu1 %v533_v13 }
 0x1fe   : > { %v532_v19 = vpop.xlane.xlu1 %531 }
 0x1ff   : > { %v536_v20 = vmul.f32 0.03125, %v532_v19 }
 0x201   : > { %v538_v21 = vadd.f32 1e-05, %v536_v20 }
 0x202   : > { %v535_v22 = vpop.xlane.xlu1 %534 }
 0x203   : > { %2430 = vrsqrt.f32 %v538_v21  ;;  %v537_v23 = vmul.f32 0.03125, %v535_v22 }
 0x205   : > { %v539_v24 = vadd.f32 1e-05, %v537_v23 }
 0x207   : > { %2432 = vrsqrt.f32 %v539_v24 }
 0x20d   : > { %v2431_v25 = vpop.eup %2430 }
 0x20e   : > { %v542_v26 = vmul.f32 %v2431_v25, %v526_v6 }
 0x210   : > { %v551_v30 = vmul.f32 %v2051_v27, %v542_v26 }
 0x211   : > { %v2433_v28 = vpop.eup %2432 }
 0x212   : > { %v543_v29 = vmul.f32 %v2433_v28, %v527_v10  ;;  %v560_v33 = vadd.f32 %v2052_v31, %v551_v30 }
 0x214   : > { %v552_v32 = vmul.f32 %v2051_v27, %v543_v29 }
 0x216   : > { %v561_v34 = vadd.f32 %v2052_v31, %v552_v32 }
 0x218   : > { %v562_v36 = vpack.c.bf16 %v561_v34, %v560_v33 }
 0x21a   : > { %2167 = vmatmul.mubr.msk.bf16.vlgmr.msra.gmra.mrb[0].mxu0 %vm516_vm0, %v562_v36  ;;  %2175 = vmatmul.mubr.msk.bf16.vlgmr.msra.gmra.mrb[0].mxu1 %vm516_vm0, %v562_v36 }
 0x21b   : > { %2179 = vmatpush3.bf16.msra.mxu0 %v2428_v35  ;;  %2182 = vmatprep.mubr.msk.bf16.mxu0 %vm2756_vm1, %v2755_v16 }
 0x21c   : > { %2180 = vmatprep.subr.bf16.mxu0 %v2755_v16  ;;  %2188 = vmatprep.mubr.msk.bf16.mxu1 %vm2756_vm1, %v2755_v16 }
 0x21f   : > { %2181 = vmatpush3.bf16.msra.mxu0 %v2429_v37 }
 0x220   : > { %2192 = vmatprep.subr.bf16.mxu0 %v2755_v16 }
 0x222   : > { %2183 = vmatmul.mubr.msk.bf16.vlgmr.msra.gmra.mrb[4].mxu0 %vm516_vm0, %v562_v36 }
 0x223   : > { %2194 = vmatprep.mubr.msk.bf16.mxu0 %vm2756_vm1, %v2755_v16 }
 0x2ed   : > { %v623_v40 = vpop.f32.mrb[0].mxu0  ;;  %v687_v41 = vpop.f32.mrb[0].mxu1 }
 0x2ee   : > { %v688_v42 = vadd.f32 %v2057_v38, %v687_v41  ;;  %v2168_v43 = vpop.f32.mrb[1].mxu0  ;;  %v2176_v44 = vpop.f32.mrb[1].mxu1  ;;  %v624_v47 = vadd.f32 %v2053_v39, %v623_v40 }
 0x2ef   : > { %v626_v45 = vpop.f32.mrb[2].mxu0  ;;  %v690_v46 = vpop.f32.mrb[2].mxu1 }
 0x2f0   : > { %v3150_v48 = vpack.c.bf16 %v688_v42, %v688_v42  ;;  %v691_v49 = vadd.f32 %v2057_v38, %v690_v46  ;;  %v2169_v50 = vpop.f32.mrb[3].mxu0  ;;  %v2177_v51 = vpop.f32.mrb[3].mxu1  ;;  %v627_v52 = vadd.f32 %v2053_v39, %v626_v45  ;;  %v758_v56 = vmul.f32 0.35355338, %v624_v47 }
 0x2f2   : > { %v3152_v53 = vpack.c.bf16 %v691_v49, %v691_v49  ;;  %v788_v54 = vsel %vm783_vm2, %v3150_v48, 0  ;;  %v759_v59 = vmul.f32 0.35355338, %v627_v52  ;;  %v3160_v63 = vpack.c.bf16 %v758_v56, %v758_v56 }
 0x2f3   : > { %2187 = vmatpush3.bf16.xpose.msra.mxu1 %v788_v54 }
 0x2f4   : > { %v834_v57 = vsel %vm783_vm2, %v3152_v53, 0  ;;  %2198 = vmatprep.subr.bf16.mxu1 %v2755_v16  ;;  %v3164_v5 = vpack.c.bf16 %v759_v59, %v759_v59 }
 0x2f5   : > { %v751_v58 = vpop.f32.mrb[4].mxu0  ;;  %2193 = vmatpush3.bf16.xpose.msra.mxu0 %v834_v57 }
 0x2f6   : > { %v752_v60 = vadd.f32 %v2061_v55, %v751_v58  ;;  %v2184_v61 = vpop.f32.mrb[5].mxu0  ;;  %2204 = vmatprep.subr.bf16.mxu0 %v2755_v16 }
 0x2f7   : > { %v754_v62 = vpop.f32.mrb[6].mxu0 }
 0x2f8   : > { %v3162_v2 = vpack.c.bf16 %v752_v60, %v752_v60  ;;  %v755_v3 = vadd.f32 %v2061_v55, %v754_v62  ;;  %v2185_v4 = vpop.f32.mrb[7].mxu0 }
 0x2fa   : > { %v3166_v6 = vpack.c.bf16 %v755_v3, %v755_v3  ;;  %2189 = vmatmul.mubr.msk.bf16.vlgmr.msra.gmra.mrb[4].mxu1 %vm783_vm2, %v3160_v63  ;;  %v905_v7 = vsel %vm903_vm3, %v3162_v2, 0 }
 0x2fb   : > { %2199 = vmatpush3.bf16.msra.mxu1 %v905_v7  ;;  %2200 = vmatprep.mubr.msk.bf16.mxu1 %vm2756_vm1, %v2755_v16 }
 0x2fc   : > { %2195 = vmatmul.mubr.msk.bf16.vlgmr.msra.gmra.mrb[8].mxu0 %vm783_vm2, %v3164_v5  ;;  %v951_v8 = vsel %vm903_vm3, %v3166_v6, 0  ;;  %2210 = vmatprep.subr.bf16.mxu1 %v2755_v16 }
 0x2fd   : > { %2205 = vmatpush3.bf16.msra.mxu0 %v951_v8  ;;  %2206 = vmatprep.mubr.msk.bf16.mxu0 %vm2756_vm1, %v2755_v16 }
 0x2fe   : > { %2216 = vmatprep.subr.bf16.mxu0 %v2755_v16 }
 0x3cd   : > { %v824_v10 = vpop.f32.mrb[4].mxu1 }
 0x3ce   : > { %v825_v11 = vadd.f32 %v824_v10, %v3182_v9  ;;  %v2190_v12 = vpop.f32.mrb[5].mxu1 }
 0x3cf   : > { %v827_v13 = vpop.f32.mrb[6].mxu1  ;;  %v870_v14 = vpop.f32.mrb[8].mxu0 }
 0x3d0   : > { %v871_v15 = vadd.f32 %v870_v14, %v3182_v9  ;;  %v2191_v17 = vpop.f32.mrb[7].mxu1  ;;  %v2196_v18 = vpop.f32.mrb[9].mxu0  ;;  %v876_v19 = vsel %vm783_vm2, %v825_v11, -inf }
 0x3d1   : > { %877 = vmax.xlane.f32.xlu0 %v876_v19  ;;  %v873_v20 = vpop.f32.mrb[10].mxu0 }
 0x3d2   : > { %v2197_v21 = vpop.f32.mrb[11].mxu0  ;;  %v879_v22 = vsel %vm783_vm2, %v871_v15, -inf }
 0x3d3   : > { %880 = vmax.xlane.f32.xlu1 %v879_v22 }
 0x3e4   : > { %1047 = vrot.lane.b32.xlu1 %v3152_v53, %s2757_s30 }
 0x45e   : > { %v878_v23 = vpop.xlane.xlu0 %877 }
 0x45f   : > { %v882_v24 = vsub.f32 %v825_v11, %v878_v23 }
 0x460   : > { %v881_v25 = vpop.xlane.xlu1 %880 }
 0x461   : > { %v884_v26 = vmul.f32 1.442695, %v882_v24  ;;  %v883_v27 = vsub.f32 %v871_v15, %v881_v25 }
 0x463   : > { %2434 = vpow2.f32 %v884_v26  ;;  %v886_v28 = vmul.f32 1.442695, %v883_v27 }
 0x464   : > { %v1048_v33 = vpop.permute.xlu1 %1047 }
 0x465   : > { %2436 = vpow2.f32 %v886_v28  ;;  %v1053_v44 = vsel %vm783_vm2, %v1048_v33, 0 }
 0x46d   : > { %v2435_v29 = vpop.eup %2434 }
 0x46e   : > { %v888_v30 = vsel %vm783_vm2, %v2435_v29, 0.0 }
 0x46f   : > { %v2437_v31 = vpop.eup %2436  ;;  %889 = vadd.xlane.f32.xlu0 %v888_v30 }
 0x470   : > { %v891_v32 = vsel %vm783_vm2, %v2437_v31, 0.0 }
 0x471   : > { %892 = vadd.xlane.f32.xlu1 %v891_v32 }
 0x482   : > { %995 = vrot.lane.b32.xlu1 %v3160_v63, %s2757_s30 }
 0x485   : > { %997 = vrot.lane.b32.xlu0 %v3150_v48, %s2757_s30 }
 0x486   : > { %1045 = vrot.lane.b32.xlu1 %v3164_v5, %s2757_s30 }
 0x4fc   : > { %v890_v34 = vpop.xlane.xlu0 %889 }
 0x4fd   : > { %2438 = vrcp.f32 %v890_v34 }
 0x4fe   : > { %v893_v35 = vpop.xlane.xlu1 %892 }
 0x4ff   : > { %2440 = vrcp.f32 %v893_v35 }
 0x500   : > { %v998_v39 = vpop.permute.xlu0 %997 }
 0x501   : > { %v1003_v42 = vsel %vm783_vm2, %v998_v39, 0 }
 0x502   : > { %v996_v45 = vpop.permute.xlu1 %995 }
 0x506   : > { %v1046_v46 = vpop.permute.xlu1 %1045 }
 0x507   : > { %v2439_v36 = vpop.eup %2438 }
 0x508   : > { %v896_v37 = vmul.f32 %v2439_v36, %v2435_v29  ;;  %v779_v36 = vld [vmem:[%s3420_s10] sm:$0xf] }
 0x509   : > { %v2441_v38 = vpop.eup %2440  ;;  %v1278_v39 = vsel %vm903_vm3, %v779_v36, 0 }
 0x50a   : > { %v897_v40 = vmul.f32 %v2441_v38, %v2437_v31  ;;  %v898_v41 = vpack.c.bf16 %v896_v37, %v896_v37  ;;  %v780_v31 = vld [vmem:[%s3420_s10 + $0x4] sm:$0xf] }
 0x50b   : > { %v1226_v34 = vsel %vm903_vm3, %v780_v31, 0 }
 0x50c   : > { %2201 = vmatmul.mubr.msk.bf16.vlgmr.msra.gmra.mrb[8].mxu1 %vm783_vm2, %v898_v41  ;;  %v899_v43 = vpack.c.bf16 %v897_v40, %v897_v40 }
 0x50d   : > { %2211 = vmatpush3.bf16.xpose.msra.mxu1 %v1003_v42  ;;  %2212 = vmatprep.mubr.msk.bf16.mxu1 %vm2756_vm1, %v2755_v16 }
 0x50e   : > { %2207 = vmatmul.mubr.msk.bf16.vlgmr.msra.gmra.mrb[12].mxu0 %vm783_vm2, %v899_v43  ;;  %2222 = vmatprep.subr.bf16.mxu1 %v2755_v16 }
 0x50f   : > { %2217 = vmatpush3.bf16.xpose.msra.mxu0 %v1053_v44  ;;  %2218 = vmatprep.mubr.msk.bf16.mxu0 %vm2756_vm1, %v2755_v16 }
 0x510   : > { %2228 = vmatprep.subr.bf16.mxu0 %v2755_v16 }
 0x514   : > { %2213 = vmatmul.mubr.msk.bf16.vlgmr.msra.gmra.mrb[12].mxu1 %vm783_vm2, %v996_v45 }
 0x515   : > { %2224 = vmatprep.mubr.msk.bf16.mxu1 %vm2756_vm1, %v2755_v16 }
 0x516   : > { %2219 = vmatmul.mubr.msk.bf16.vlgmr.msra.gmra.mrb[16].mxu0 %vm783_vm2, %v1046_v46 }
 0x517   : > { %2230 = vmatprep.mubr.msk.bf16.mxu0 %vm2756_vm1, %v2755_v16 }
 0x5df   : > { %v3214_v47 = vpop.f32.mrb[8].mxu1 }
 0x5e0   : > { %v2202_v49 = vpop.f32.mrb[9].mxu1 }
 0x5e1   : > { %v944_v50 = vpop.f32.mrb[10].mxu1  ;;  %v3216_v51 = vpop.f32.mrb[12].mxu0 }
 0x5e2   : > { %v2109_v52 = vpack.c.bf16 %v3216_v51, %v3214_v47  ;;  %v2203_v54 = vpop.f32.mrb[11].mxu1  ;;  %v2208_v55 = vpop.f32.mrb[13].mxu0 }
 0x5e3   : > { %v990_v56 = vpop.f32.mrb[14].mxu0 }
 0x5e4   : > { %v2209_v57 = vpop.f32.mrb[15].mxu0 }
 0x5e7   : > { %v1039_v58 = vpop.f32.mrb[12].mxu1 }
 0x5e8   : > { %v1040_v59 = vadd.f32 %v1039_v58, %v3182_v9  ;;  %v2214_v60 = vpop.f32.mrb[13].mxu1 }
 0x5e9   : > { %v1042_v61 = vpop.f32.mrb[14].mxu1  ;;  %v1089_v62 = vpop.f32.mrb[16].mxu0 }
 0x5ea   : > { %v1090_v3 = vadd.f32 %v1089_v62, %v3182_v9  ;;  %v2215_v4 = vpop.f32.mrb[15].mxu1  ;;  %v2220_v7 = vpop.f32.mrb[17].mxu0  ;;  %v1095_v8 = vsel %vm783_vm2, %v1040_v59, -inf }
 0x5eb   : > { %1096 = vmax.xlane.f32.xlu0 %v1095_v8  ;;  %v1092_v10 = vpop.f32.mrb[18].mxu0 }
 0x5ec   : > { %v2221_v11 = vpop.f32.mrb[19].mxu0  ;;  %v1098_v12 = vsel %vm783_vm2, %v1090_v3, -inf }
 0x5ed   : > { %1099 = vmax.xlane.f32.xlu1 %v1098_v12 }
 0x5fe   : > { %1167 = vrot.lane.b32.xlu1 %v3166_v6, %s2757_s30 }
 0x602   : > { %1323 = vrot.lane.b32.xlu1 %v3150_v48, %s2758_s11 }
 0x606   : > { %1373 = vrot.lane.b32.xlu1 %v3152_v53, %s2758_s11 }
 0x60a   : > { %1371 = vrot.lane.b32.xlu1 %v3164_v5, %s2758_s11 }
 0x678   : > { %v1097_v13 = vpop.xlane.xlu0 %1096 }
 0x679   : > { %v1101_v14 = vsub.f32 %v1040_v59, %v1097_v13 }
 0x67a   : > { %v1100_v15 = vpop.xlane.xlu1 %1099 }
 0x67b   : > { %v1103_v17 = vmul.f32 1.442695, %v1101_v14  ;;  %v1102_v18 = vsub.f32 %v1090_v3, %v1100_v15 }
 0x67d   : > { %2442 = vpow2.f32 %v1103_v17  ;;  %v1105_v19 = vmul.f32 1.442695, %v1102_v18 }
 0x67e   : > { %v1168_v20 = vpop.permute.xlu1 %1167 }
 0x67f   : > { %2444 = vpow2.f32 %v1105_v19  ;;  %v1173_v21 = vsel %vm903_vm3, %v1168_v20, 0 }
 0x680   : > { %2229 = vmatpush3.bf16.msra.mxu0 %v1173_v21 }
 0x681   : > { %2240 = vmatprep.subr.bf16.mxu0 %v2755_v16 }
 0x682   : > { %v1324_v40 = vpop.permute.xlu1 %1323 }
 0x683   : > { %v1329_v54 = vsel %vm783_vm2, %v1324_v40, 0 }
 0x686   : > { %v1374_v41 = vpop.permute.xlu1 %1373 }
 0x687   : > { %v2443_v22 = vpop.eup %2442  ;;  %v1379_v42 = vsel %vm783_vm2, %v1374_v41, 0 }
 0x688   : > { %v1107_v23 = vsel %vm783_vm2, %v2443_v22, 0.0 }
 0x689   : > { %v2445_v24 = vpop.eup %2444  ;;  %1108 = vadd.xlane.f32.xlu0 %v1107_v23 }
 0x68a   : > { %v1110_v25 = vsel %vm783_vm2, %v2445_v24, 0.0  ;;  %v1372_v43 = vpop.permute.xlu1 %1371 }
 0x68d   : > { %1111 = vadd.xlane.f32.xlu0 %v1110_v25 }
 0x6a3   : > { %1119 = vrot.lane.b32.xlu0 %v3162_v2, %s2757_s30  ;;  %s2668_s30 = sshll.u32 %s2760_s20, 4  ;;  %s2669_s30 = int_to_ptr.vmem [resolvable:$false] %s2668_s30 }
 0x6a4   : > { %p2671_p4 = scmp.lt.s32.totalorder %s3363_s29, %s2669_s30 }
 0x6a7   : > { %1321 = vrot.lane.b32.xlu0 %v3160_v63, %s2758_s11 }
 0x716   : > { %v1109_v26 = vpop.xlane.xlu0 %1108 }
 0x717   : > { %2446 = vrcp.f32 %v1109_v26 }
 0x71a   : > { %v1112_v27 = vpop.xlane.xlu0 %1111 }
 0x71b   : > { %2448 = vrcp.f32 %v1112_v27 }
 0x71e   : > { %v1120_v28 = vpop.permute.xlu0 %1119 }
 0x71f   : > { %v1125_v29 = vsel %vm903_vm3, %v1120_v28, 0 }
 0x720   : > { %2223 = vmatpush3.bf16.msra.mxu1 %v1125_v29 }
 0x721   : > { %v2447_v30 = vpop.eup %2446  ;;  %2234 = vmatprep.subr.bf16.mxu1 %v2755_v16 }
 0x722   : > { %v1115_v32 = vmul.f32 %v2447_v30, %v2443_v22  ;;  %v1322_v58 = vpop.permute.xlu0 %1321 }
 0x724   : > { %v1117_v33 = vpack.c.bf16 %v1115_v32, %v1115_v32 }
 0x725   : > { %v2449_v35 = vpop.eup %2448 }
 0x726   : > { %v1116_v37 = vmul.f32 %v2449_v35, %v2445_v24  ;;  %2225 = vmatmul.mubr.msk.bf16.vlgmr.msra.gmra.mrb[16].mxu1 %vm783_vm2, %v1117_v33 }
 0x727   : > { %2235 = vmatpush3.bf16.msra.mxu1 %v1226_v34  ;;  %2236 = vmatprep.mubr.msk.bf16.mxu1 %vm2756_vm1, %v2755_v16 }
 0x728   : > { %v1118_v38 = vpack.c.bf16 %v1116_v37, %v1116_v37  ;;  %2246 = vmatprep.subr.bf16.mxu1 %v2755_v16 }
 0x72a   : > { %2231 = vmatmul.mubr.msk.bf16.vlgmr.msra.gmra.mrb[20].mxu0 %vm783_vm2, %v1118_v38 }
 0x72b   : > { %2241 = vmatpush3.bf16.msra.mxu0 %v1278_v39  ;;  %2242 = vmatprep.mubr.msk.bf16.mxu0 %vm2756_vm1, %v2755_v16 }
 0x72c   : > { %2252 = vmatprep.subr.bf16.mxu0 %v2755_v16 }
 0x732   : > { %2243 = vmatmul.mubr.msk.bf16.vlgmr.msra.gmra.mrb[24].mxu0 %vm783_vm2, %v2109_v52 }
 0x733   : > { %2254 = vmatprep.mubr.msk.bf16.mxu0 %vm2756_vm1, %v2755_v16 }
 0x734   : > { %2253 = vmatpush3.bf16.xpose.msra.mxu0 %v1379_v42 }
 0x735   : > { %2264 = vmatprep.subr.bf16.mxu0 %v2755_v16 }
 0x73b   : > { %2255 = vmatmul.mubr.msk.bf16.vlgmr.msra.gmra.mrb[28].mxu0 %vm783_vm2, %v1372_v43 }
 0x73c   : > { %2266 = vmatprep.mubr.msk.bf16.mxu0 %vm2756_vm1, %v2755_v16 }
 0x7f9   : > { %v1161_v44 = vpop.f32.mrb[16].mxu1 }
 0x7fa   : > { %v2226_v45 = vpop.f32.mrb[17].mxu1 }
 0x7fb   : > { %v1164_v46 = vpop.f32.mrb[18].mxu1 }
 0x7fc   : > { %v2227_v47 = vpop.f32.mrb[19].mxu1 }
 0x7fd   : > { %v1209_v49 = vpop.f32.mrb[20].mxu0 }
 0x7fe   : > { %v2108_v50 = vpack.c.bf16 %v1209_v49, %v1161_v44  ;;  %v2232_v51 = vpop.f32.mrb[21].mxu0  ;;  %v781_v49 = vld [vmem:[%s3420_s10 + $0x8] sm:$0xf] }
 0x7ff   : > { %v1212_v52 = vpop.f32.mrb[22].mxu0 }
 0x800   : > { %v2233_v55 = vpop.f32.mrb[23].mxu0  ;;  %2237 = vmatmul.mubr.msk.bf16.vlgmr.msra.gmra.mrb[20].mxu1 %vm783_vm2, %v2108_v50  ;;  %v1552_v50 = vsel %vm903_vm3, %v781_v49, 0  ;;  %v2095_v49 = vld [vmem:[%s3453_s14] ss:$0 sm:$0xff] }
 0x801   : > { %2247 = vmatpush3.bf16.xpose.msra.mxu1 %v1329_v54  ;;  %2248 = vmatprep.mubr.msk.bf16.mxu1 %vm2756_vm1, %v2755_v16 }
 0x802   : > { %2258 = vmatprep.subr.bf16.mxu1 %v2755_v16 }
 0x805   : > { %v1314_v56 = vpop.f32.mrb[24].mxu0 }
 0x806   : > { %v2244_v57 = vpop.f32.mrb[25].mxu0 }
 0x807   : > { %v1317_v59 = vpop.f32.mrb[26].mxu0 }
 0x808   : > { %v2245_v60 = vpop.f32.mrb[27].mxu0  ;;  %2249 = vmatmul.mubr.msk.bf16.vlgmr.msra.gmra.mrb[24].mxu1 %vm783_vm2, %v1322_v58 }
 0x809   : > { %2260 = vmatprep.mubr.msk.bf16.mxu1 %vm2756_vm1, %v2755_v16 }
 0x80e   : > { %v1415_v61 = vpop.f32.mrb[28].mxu0 }
 0x80f   : > { %v1416_v62 = vadd.f32 %v1415_v61, %v3182_v9  ;;  %v2256_v3 = vpop.f32.mrb[29].mxu0 }
 0x810   : > { %v1418_v4 = vpop.f32.mrb[30].mxu0 }
 0x811   : > { %v2257_v7 = vpop.f32.mrb[31].mxu0  ;;  %v1424_v8 = vsel %vm783_vm2, %v1416_v62, -inf }
 0x812   : > { %1425 = vmax.xlane.f32.xlu1 %v1424_v8 }
 0x823   : > { %1493 = vrot.lane.b32.xlu1 %v3166_v6, %s2758_s11 }
 0x827   : > { %1599 = vrot.lane.b32.xlu1 %v3150_v48, %s2759_s19 }
 0x82b   : > { %1649 = vrot.lane.b32.xlu1 %v3152_v53, %s2759_s19 }
 0x82f   : > { %1647 = vrot.lane.b32.xlu1 %v3164_v5, %s2759_s19 }
 0x89f   : > { %v1426_v10 = vpop.xlane.xlu1 %1425 }
 0x8a0   : > { %v1428_v13 = vsub.f32 %v1416_v62, %v1426_v10 }
 0x8a2   : > { %v1431_v14 = vmul.f32 1.442695, %v1428_v13 }
 0x8a3   : > { %v1494_v11 = vpop.permute.xlu1 %1493 }
 0x8a4   : > { %v1499_v12 = vsel %vm903_vm3, %v1494_v11, 0  ;;  %2450 = vpow2.f32 %v1431_v14 }
 0x8a5   : > { %2265 = vmatpush3.bf16.msra.mxu0 %v1499_v12 }
 0x8a6   : > { %2276 = vmatprep.subr.bf16.mxu0 %v2755_v16 }
 0x8a7   : > { %v1600_v35 = vpop.permute.xlu1 %1599 }
 0x8a8   : > { %v1605_v37 = vsel %vm783_vm2, %v1600_v35, 0 }
 0x8ab   : > { %v1650_v58 = vpop.permute.xlu1 %1649 }
 0x8ac   : > { %v1655_v3 = vsel %vm783_vm2, %v1650_v58, 0 }
 0x8ae   : > { %v2451_v25 = vpop.eup %2450 }
 0x8af   : > { %v1436_v26 = vsel %vm783_vm2, %v2451_v25, 0.0  ;;  %v1648_v7 = vpop.permute.xlu1 %1647 }
 0x8d3   : > { %v1262_v15 = vpop.f32.mrb[20].mxu1 }
 0x8d4   : > { %v3289_v17 = vadd.f32 %v1314_v56, %v1262_v15  ;;  %v2238_v18 = vpop.f32.mrb[21].mxu1 }
 0x8d5   : > { %v1265_v48 = vpop.f32.mrb[22].mxu1 }
 0x8d6   : > { %v3291_v19 = vadd.f32 %v1317_v59, %v1265_v48  ;;  %v2239_v53 = vpop.f32.mrb[23].mxu1 }
 0x8db   : > { %v1365_v20 = vpop.f32.mrb[24].mxu1 }
 0x8dc   : > { %v1366_v5 = vadd.f32 %v1365_v20, %v3182_v9  ;;  %v2250_v21 = vpop.f32.mrb[25].mxu1 }
 0x8dd   : > { %v1368_v22 = vpop.f32.mrb[26].mxu1 }
 0x8de   : > { %v2251_v23 = vpop.f32.mrb[27].mxu1  ;;  %v1421_v24 = vsel %vm783_vm2, %v1366_v5, -inf }
 0x8df   : > { %1422 = vmax.xlane.f32.xlu0 %v1421_v24 }
 0x8e3   : > { %1437 = vadd.xlane.f32.xlu0 %v1436_v26 }
 0x96c   : > { %v1423_v27 = vpop.xlane.xlu0 %1422 }
 0x96d   : > { %v1427_v28 = vsub.f32 %v1366_v5, %v1423_v27 }
 0x96f   : > { %v1429_v29 = vmul.f32 1.442695, %v1427_v28 }
 0x970   : > { %v1438_v30 = vpop.xlane.xlu0 %1437 }
 0x971   : > { %2452 = vpow2.f32 %v1429_v29 }
 0x972   : > { %2454 = vrcp.f32 %v1438_v30 }
 0x97b   : > { %v2453_v31 = vpop.eup %2452 }
 0x97c   : > { %v2455_v32 = vpop.eup %2454  ;;  %v1433_v33 = vsel %vm783_vm2, %v2453_v31, 0.0 }
 0x97d   : > { %v1442_v34 = vmul.f32 %v2455_v32, %v2451_v25  ;;  %1434 = vadd.xlane.f32.xlu0 %v1433_v33 }
 0x97f   : > { %v1444_v36 = vpack.c.bf16 %v1442_v34, %v1442_v34 }
 0x981   : > { %2267 = vmatmul.mubr.msk.bf16.vlgmr.msra.gmra.mrb[32].mxu0 %vm783_vm2, %v1444_v36 }
 0x982   : > { %2277 = vmatpush3.bf16.xpose.msra.mxu0 %v1605_v37  ;;  %2278 = vmatprep.mubr.msk.bf16.mxu0 %vm2756_vm1, %v2755_v16 }
 0x983   : > { %2288 = vmatprep.subr.bf16.mxu0 %v2755_v16 }
 0x993   : > { %1445 = vrot.lane.b32.xlu0 %v3162_v2, %s2758_s11  ;;  %s2670_s11 = scalar_lea.vmem %s2669_s30, 512 }
 0x994   : > { %p2672_p1 = scmp.lt.s32.totalorder %s2670_s11, %s2664_s17 }
 0x996   : > { %p2673_p3 = por %p2672_p1, %p2671_p4 }
 0x997   : > { %1597 = vrot.lane.b32.xlu0 %v3160_v63, %s2759_s19 }
 0x998   : > { %p2674_p8 = pnand %p2673_p3, %p2667_p7 }
 0xa0a   : > { %v1435_v38 = vpop.xlane.xlu0 %1434 }
 0xa0b   : > { %2456 = vrcp.f32 %v1435_v38  ;;  %v782_v38 = vld [vmem:[%s3420_s10 + $0xc] sm:$0xf] }
 0xa0e   : > { %v1446_v39 = vpop.permute.xlu0 %1445 }
 0xa0f   : > { %v1451_v40 = vsel %vm903_vm3, %v1446_v39, 0  ;;  %v1828_v39 = vsel %vm903_vm3, %v782_v38, 0 }
 0xa10   : > { %2259 = vmatpush3.bf16.msra.mxu1 %v1451_v40 }
 0xa11   : > { %2270 = vmatprep.subr.bf16.mxu1 %v2755_v16 }
 0xa12   : > { %v1598_v41 = vpop.permute.xlu0 %1597 }
 0xa13   : > { %2279 = vmatmul.mubr.msk.bf16.vlgmr.msra.gmra.mrb[36].mxu0 %vm783_vm2, %v1598_v41 }
 0xa14   : > { %2290 = vmatprep.mubr.msk.bf16.mxu0 %vm2756_vm1, %v2755_v16 }
 0xa15   : > { %v2457_v42 = vpop.eup %2456 }
 0xa16   : > { %v1441_v43 = vmul.f32 %v2457_v42, %v2453_v31 }
 0xa18   : > { %v1443_v44 = vpack.c.bf16 %v1441_v43, %v1441_v43 }
 0xa1a   : > { %2261 = vmatmul.mubr.msk.bf16.vlgmr.msra.gmra.mrb[28].mxu1 %vm783_vm2, %v1443_v44 }
 0xa1b   : > { %2272 = vmatprep.mubr.msk.bf16.mxu1 %vm2756_vm1, %v2755_v16  ;;  %2271 = vmatpush3.bf16.msra.mxu1 %v1552_v50 }
 0xa1c   : > { %2282 = vmatprep.subr.bf16.mxu1 %v2755_v16 }
 0xa54   : > { %v1535_v63 = vpop.f32.mrb[32].mxu0 }
 0xa55   : > { %v2268_v45 = vpop.f32.mrb[33].mxu0 }
 0xa56   : > { %v1538_v46 = vpop.f32.mrb[34].mxu0 }
 0xa57   : > { %v2269_v47 = vpop.f32.mrb[35].mxu0 }
 0xae6   : > { %v1641_v51 = vpop.f32.mrb[36].mxu0 }
 0xae7   : > { %v1642_v52 = vadd.f32 %v1641_v51, %v3182_v9  ;;  %v2280_v54 = vpop.f32.mrb[37].mxu0 }
 0xae8   : > { %v1644_v55 = vpop.f32.mrb[38].mxu0 }
 0xae9   : > { %v2281_v56 = vpop.f32.mrb[39].mxu0  ;;  %v1697_v57 = vsel %vm783_vm2, %v1642_v52, -inf }
 0xaea   : > { %1698 = vmax.xlane.f32.xlu0 %v1697_v57 }
 0xaed   : > { %v1487_v59 = vpop.f32.mrb[28].mxu1 }
 0xaee   : > { %v2110_v60 = vpack.c.bf16 %v1535_v63, %v1487_v59  ;;  %v2262_v61 = vpop.f32.mrb[29].mxu1 }
 0xaef   : > { %v1490_v62 = vpop.f32.mrb[30].mxu1 }
 0xaf0   : > { %v2263_v4 = vpop.f32.mrb[31].mxu1  ;;  %2273 = vmatmul.mubr.msk.bf16.vlgmr.msra.gmra.mrb[32].mxu1 %vm783_vm2, %v2110_v60 }
 0xaf1   : > { %2283 = vmatpush3.bf16.xpose.msra.mxu1 %v1655_v3  ;;  %2284 = vmatprep.mubr.msk.bf16.mxu1 %vm2756_vm1, %v2755_v16 }
 0xaf2   : > { %2294 = vmatprep.subr.bf16.mxu1 %v2755_v16 }
 0xaf8   : > { %2285 = vmatmul.mubr.msk.bf16.vlgmr.msra.gmra.mrb[36].mxu1 %vm783_vm2, %v1648_v7 }
 0xaf9   : > { %2296 = vmatprep.mubr.msk.bf16.mxu1 %vm2756_vm1, %v2755_v16 }
 0xb77   : > { %v1699_v8 = vpop.xlane.xlu0 %1698 }
 0xb78   : > { %v1703_v10 = vsub.f32 %v1642_v52, %v1699_v8 }
 0xb7a   : > { %v1705_v11 = vmul.f32 1.442695, %v1703_v10 }
 0xb7c   : > { %2458 = vpow2.f32 %v1705_v11 }
 0xb86   : > { %v2459_v12 = vpop.eup %2458 }
 0xb87   : > { %v1709_v13 = vsel %vm783_vm2, %v2459_v12, 0.0 }
 0xb88   : > { %1710 = vadd.xlane.f32.xlu0 %v1709_v13 }
 0xbc3   : > { %v1588_v14 = vpop.f32.mrb[32].mxu1 }
 0xbc4   : > { %v1595_v15 = vadd.f32 %v1588_v14, %v3289_v17  ;;  %v2274_v18 = vpop.f32.mrb[33].mxu1 }
 0xbc5   : > { %v1591_v48 = vpop.f32.mrb[34].mxu1 }
 0xbc6   : > { %v1596_v53 = vadd.f32 %v1591_v48, %v3291_v19  ;;  %v2275_v20 = vpop.f32.mrb[35].mxu1 }
 0xbcb   : > { %v1691_v5 = vpop.f32.mrb[36].mxu1 }
 0xbcc   : > { %v1692_v21 = vadd.f32 %v1691_v5, %v3182_v9  ;;  %v2286_v22 = vpop.f32.mrb[37].mxu1 }
 0xbcd   : > { %v1694_v23 = vpop.f32.mrb[38].mxu1 }
 0xbce   : > { %v2287_v24 = vpop.f32.mrb[39].mxu1  ;;  %v1700_v25 = vsel %vm783_vm2, %v1692_v21, -inf }
 0xbcf   : > { %1701 = vmax.xlane.f32.xlu1 %v1700_v25 }
 0xbe0   : > { %1769 = vrot.lane.b32.xlu1 %v3166_v6, %s2759_s19 }
 0xc15   : > { %v1711_v30 = vpop.xlane.xlu0 %1710 }
 0xc5c   : > { %v1702_v26 = vpop.xlane.xlu1 %1701 }
 0xc5d   : > { %v1704_v27 = vsub.f32 %v1692_v21, %v1702_v26 }
 0xc5f   : > { %v1707_v17 = vmul.f32 1.442695, %v1704_v27 }
 0xc60   : > { %v1770_v28 = vpop.permute.xlu1 %1769 }
 0xc61   : > { %2460 = vpow2.f32 %v1707_v17  ;;  %v1775_v19 = vsel %vm903_vm3, %v1770_v28, 0 }
 0xc62   : > { %2295 = vmatpush3.bf16.msra.mxu1 %v1775_v19  ;;  %2462 = vrcp.f32 %v1711_v30 }
 0xc6b   : > { %v2461_v29 = vpop.eup %2460 }
 0xc6c   : > { %v1712_v9 = vsel %vm783_vm2, %v2461_v29, 0.0  ;;  %v2463_v31 = vpop.eup %2462 }
 0xc6d   : > { %1713 = vadd.xlane.f32.xlu0 %v1712_v9  ;;  %v1717_v6 = vmul.f32 %v2463_v31, %v2459_v12 }
 0xc6f   : > { %v1719_v35 = vpack.c.bf16 %v1717_v6, %v1717_v6 }
 0xc83   : > { %1721 = vrot.lane.b32.xlu0 %v3162_v2, %s2759_s19 }
 0xcfa   : > { %v1714_v32 = vpop.xlane.xlu0 %1713 }
 0xcfb   : > { %2464 = vrcp.f32 %v1714_v32 }
 0xcfe   : > { %v1722_v33 = vpop.permute.xlu0 %1721 }
 0xcff   : > { %v1727_v34 = vsel %vm903_vm3, %v1722_v33, 0 }
 0xd00   : > { %2289 = vmatpush3.bf16.msra.mxu0 %v1727_v34 }
 0xd01   : > { %2300 = vmatprep.subr.bf16.mxu0 %v2755_v16 }
 0xd03   : > { %2291 = vmatmul.mubr.msk.bf16.vlgmr.msra.gmra.mrb[40].mxu0 %vm783_vm2, %v1719_v35 }
 0xd04   : > { %2302 = vmatprep.mubr.msk.bf16.mxu0 %vm2756_vm1, %v2755_v16  ;;  %2301 = vmatpush3.bf16.msra.mxu0 %v1828_v39 }
 0xd05   : > { %v2465_v36 = vpop.eup %2464 }
 0xd06   : > { %v1718_v2 = vmul.f32 %v2465_v36, %v2461_v29 }
 0xd08   : > { %v1720_v37 = vpack.c.bf16 %v1718_v2, %v1718_v2 }
 0xd0a   : > { %2297 = vmatmul.mubr.msk.bf16.vlgmr.msra.gmra.mrb[40].mxu1 %vm783_vm2, %v1720_v37 }
 0xdd6   : > { %v1763_v40 = vpop.f32.mrb[40].mxu0 }
 0xdd7   : > { %v2292_v41 = vpop.f32.mrb[41].mxu0 }
 0xdd8   : > { %v1766_v42 = vpop.f32.mrb[42].mxu0 }
 0xdd9   : > { %v2293_v43 = vpop.f32.mrb[43].mxu0 }
 0xddd   : > { %v1811_v44 = vpop.f32.mrb[40].mxu1 }
 0xdde   : > { %v2111_v16 = vpack.c.bf16 %v1811_v44, %v1763_v40  ;;  %v2298_v63 = vpop.f32.mrb[41].mxu1 }
 0xddf   : > { %v1814_v45 = vpop.f32.mrb[42].mxu1 }
 0xde0   : > { %v2299_v46 = vpop.f32.mrb[43].mxu1  ;;  %2303 = vmatmul.mubr.msk.bf16.vlgmr.msra.gmra.mrb[44].mxu0 %vm783_vm2, %v2111_v16 }
 0xeb3   : > { %v1864_v47 = vpop.f32.mrb[44].mxu0 }
 0xeb4   : > { %v1871_v50 = vadd.f32 %v1864_v47, %v1595_v15  ;;  %v2304_v51 = vpop.f32.mrb[45].mxu0 }
 0xeb5   : > { %v1867_v52 = vpop.f32.mrb[46].mxu0 }
 0xeb6   : > { %v1880_v54 = vadd.f32 %v2095_v49, %v1871_v50  ;;  %v1872_v55 = vadd.f32 %v1867_v52, %v1596_v53  ;;  %v2305_v56 = vpop.f32.mrb[47].mxu0 }
 0xeb8   : > { %v1882_v57 = vadd.f32 %v1880_v54, %v3105_v0  ;;  %v1881_v58 = vadd.f32 %v2095_v49, %v1872_v55 }
 0xeba   : > { %1884 = vst.msk [vmem:[%s510_s28] sm:$0xff] %vm516_vm0, %v1882_v57  ;;  %v1883_v59 = vadd.f32 %v1881_v58, %v3107_v1 }
 0xebc   : > { %1885 = vst.msk [vmem:[%s510_s28 + $0x8] sm:$0xff] %vm516_vm0, %v1883_v59 }
 0xebd   : > { %2677 = shalt.err (!%p2674_p8)
}
 0xebe   : > { %s2678_s14 = scalar_lea.hbm %s3361_s12, 256  ;;  %s2682_s19 = scalar_lea.hbm %s3454_s16, 512 }
 0xebf   : > { %p2679_p13 = scmp.ne.s32.totalorder %s3361_s12, %s2678_s14  ;;  %p2683_p9 = scmp.lt.u32.totalorder %s3361_s12, %s3454_s16 }
 0xec0   : > { %p2684_p10 = scmp.lt.u32.totalorder %s2682_s19, %s2678_s14  ;;  %p2686_p6 = scmp.lt.u32.totalorder %s2678_s14, %s3361_s12 }
 0xec1   : > { %p2680_p0 = pnand %p2679_p13, %p3455_p12 }
 0xec2   : > { %p2685_p11 = por %p2684_p10, %p2683_p9 }
 0xec3   : > { %p2681_p2 = pneg %p2680_p0 }
 0xec4   : > { %p2687_p5 = por %p2686_p6, %p2685_p11 }
 0xec6   : > { %p2688_p7 = pnand %p2687_p5, %p2681_p2 }
 0xec8   : > { %2691 = shalt.err (!%p2688_p7)
}
 0xec9   : > { %s2761_s17 = smov 128   ;;  %s2762_s30 = smov 8  }
 0xeca   : > { %2332 = dma.vmem_to_hbm [thread:$0]  (%p3455_p12), %s3363_s29, 256, %s3361_s12, %s1887_s27, %s2761_s17, %s2761_s17, %s2762_s30  }
 0xecb PF: > { %s1915_s11 = sand.u32 1, %s2730_s21   ;;  %p3456_p4 = scmp.ne.s32.totalorder %s3444_s15, 0 }
 0xecc   : > { %p3457_p1 = scmp.ge.s32.totalorder %s2742_s24, 2  ;;  %s1916_s14 = scalar_lea.sflag [#allocation4], %s1915_s11 }
 0xece   : > { %p2358_p3 = pnand %p3457_p1, %p3456_p4 }
 0xed0   : > { %2725 = dma.done.wait (!%p2358_p3), %s1916_s14, 256  }
 0xed1   : > { %2727 = vsyncadd (!%p2358_p3), %s1916_s14, 4294967040  ;;  %p28_p8 = scmp.ge.s32.totalorder %s3004_s13, 4   ;;  %s3458_s21 = smov %s2734_s22 }
 0xed2   : > { %s3459_s22 = smov %s2738_s23  ;;  %s3460_s23 = smov %s3015_s26 }
 0xed3   : > { %s3461_s24 = smov %s3004_s13  ;;  %30 = sbr.rel (!%p28_p8) target bundleno = 13 (0xd), region = 137 }
 0xeda   :  { %1921 = vsyncpa [#allocation3], 1 }
 0xedb   :  { %1923 = vsyncpa [#allocation3 + $0x1], 1 }
 0xedc   :  { %1924 = vsyncpa [#allocation6], 1 }
 0xedd   :  { %1925 = vsyncpa [#allocation9], 1 }
 0xede   :  { %1926 = vsyncpa [#allocation12], 1 }
 0xedf   :  { %1927 = vsyncpa [#allocation4], 1 }
 0xee0   :  { %1929 = vsyncpa [#allocation4 + $0x1], 1 }

</bundles_post_ra>
